<compile_context>
chip_gen: v7x
topology: tpu7x:2x2x1
jax: 0.10.0
libtpu: 0.0.40
codegen_flags: <defaults>
</compile_context>

<pallas_src>
import functools

import numpy as np

import jax
import jax.numpy as jnp
from jax.experimental import pallas as pl
from jax.experimental.pallas import tpu as pltpu


# ----------------------------------------------------------------------------
# Fused kernel.
#   p_ref  : (n_pos*rows, 90)  bf16  conv1 patches (+ per-tap bias indicators)
#   w1_ref : (90, 288)         bf16  block-diagonal conv1 weight (+ bias rows)
#   w2_ref : (288, 64)         bf16  conv2 weight, rows ordered (kh, kw, Cin)
#   b2_ref : (1, 64)           f32
#   wf1_ref: (3136, 256)       bf16  fc1 weight, rows ordered (oh, ow, C)
#   bf1_ref: (1, 256)          f32
#   wh_ref : (256, 128)        bf16  [mean | logvar | zero-pad] heads
#   bh_ref : (1, 128)          f32
#   o_ref  : (rows, 128)       f32
#   flat_ref: (rows, 3136)     f32   VMEM scratch for the flatten relayout
# ----------------------------------------------------------------------------
def _encoder_fused_kernel(p_ref, w1_ref, w2_ref, b2_ref, wf1_ref, bf1_ref,
                          wh_ref, bh_ref, o_ref, flat_ref,
                          *, n_pos, rows, c2):
    f32, bf16 = jnp.float32, jnp.bfloat16

    # conv1 (bias and conv2 zero-padding mask folded into the weight):
    # (n_pos*rows, 90) @ (90, 288) -> f32
    a1 = jnp.dot(p_ref[...], w1_ref[...], preferred_element_type=f32)
    a1 = jnp.maximum(a1, 0.0).astype(bf16)                 # (n_pos*rows, 288)

    # conv2: single (n_pos*rows, 288) @ (288, 64) matmul
    y2 = jnp.dot(a1, w2_ref[...], preferred_element_type=f32)
    y2 = jnp.maximum(y2 + b2_ref[...], 0.0)                # (n_pos*rows, 64) f32

    # Relayout (pos, batch, c) -> (batch, pos*c) via static-slice stores into
    # VMEM scratch.  The NCHW flatten is folded into wf1's row permutation.
    for o in range(n_pos):
        flat_ref[:, o * c2:(o + 1) * c2] = y2[o * rows:(o + 1) * rows, :]

    # fc1: single (rows, 3136) @ (3136, 256) matmul
    flat = flat_ref[...].astype(bf16)
    h = jnp.dot(flat, wf1_ref[...], preferred_element_type=f32)
    h = jnp.maximum(h + bf1_ref[...], 0.0).astype(bf16)    # (rows, 256)

    # merged mean|logvar heads, lane-padded to 128 output columns
    z = jnp.dot(h, wh_ref[...], preferred_element_type=f32)
    o_ref[...] = (z + bh_ref[...]).astype(o_ref.dtype)


# ----------------------------------------------------------------------------
# Trace-time numpy constants: gather indices + validity/indicator patterns.
# Column layout: col = tap*9 + (kh1*3 + kw1) for 81 patch columns, then 9
# per-tap bias-indicator columns.
# ----------------------------------------------------------------------------
def _patch_constants(B, rows):
    H_IN, H1, H2, K = 28, 14, 7, 3
    taps, n_pos = K * K, H2 * H2
    ncol = taps * 9 + taps                      # 90
    pix = np.zeros((n_pos, 1, ncol), np.int32)
    val = np.zeros((n_pos, 1, ncol), np.float32)
    ind = np.zeros((n_pos, 1, ncol), np.float32)
    for oh in range(H2):
        for ow in range(H2):
            pos = oh * H2 + ow
            for kh2 in range(K):
                for kw2 in range(K):
                    t = kh2 * K + kw2
                    h1, w1 = oh * 2 - 1 + kh2, ow * 2 - 1 + kw2
                    tap_ok = (0 <= h1 < H1) and (0 <= w1 < H1)
                    ind[pos, 0, taps * 9 + t] = 1.0 if tap_ok else 0.0
                    for kh1 in range(K):
                        for kw1 in range(K):
                            e = kh1 * K + kw1
                            hi, wi = h1 * 2 - 1 + kh1, w1 * 2 - 1 + kw1
                            ok = tap_ok and (0 <= hi < H_IN) and (0 <= wi < H_IN)
                            if ok:
                                pix[pos, 0, t * 9 + e] = hi * H_IN + wi
                                val[pos, 0, t * 9 + e] = 1.0
    b_idx = np.minimum(np.arange(rows), B - 1).reshape(1, rows, 1).astype(np.int32)
    return b_idx, pix, val, ind


# ----------------------------------------------------------------------------
# One-time parameter preparation (hoisted out of the hot path).
# ----------------------------------------------------------------------------
def prepare_params(params):
    taps, c1, c2, n_pos, n_hid = 9, 32, 64, 49, 256
    lat = int(params["fc2m_b"].shape[0])

    # conv1: block-diagonal (90, 288) with per-tap bias rows
    w1k = np.asarray(params["conv1_w"], np.float32).reshape(c1, taps).T   # (9, 32)
    b1 = np.asarray(params["conv1_b"], np.float32)
    w1 = np.zeros((taps * 9 + taps, taps * c1), np.float32)
    for t in range(taps):
        w1[t * 9:(t + 1) * 9, t * c1:(t + 1) * c1] = w1k
        w1[taps * 9 + t, t * c1:(t + 1) * c1] = b1

    # conv2: rows ordered (kh, kw, Cin) to match a1's (tap, Cin) columns
    w2 = np.transpose(np.asarray(params["conv2_w"], np.float32),
                      (2, 3, 1, 0)).reshape(taps * c1, c2)
    b2 = np.asarray(params["conv2_b"], np.float32).reshape(1, c2)

    # fc1: rows ordered (oh, ow, C) to match the scratch column layout
    wf1 = np.transpose(np.asarray(params["fc1_w"], np.float32)
                       .reshape(n_hid, c2, 7, 7), (2, 3, 1, 0)).reshape(n_pos * c2, n_hid)
    bf1 = np.asarray(params["fc1_b"], np.float32).reshape(1, n_hid)

    # merged heads, zero-padded to 128 output lanes
    wh = np.zeros((n_hid, 128), np.float32)
    wh[:, :lat] = np.asarray(params["fc2m_w"], np.float32).T
    wh[:, lat:2 * lat] = np.asarray(params["fc2v_w"], np.float32).T
    bh = np.zeros((1, 128), np.float32)
    bh[0, :lat] = np.asarray(params["fc2m_b"], np.float32)
    bh[0, lat:2 * lat] = np.asarray(params["fc2v_b"], np.float32)

    return {
        "w1": jnp.asarray(w1, jnp.bfloat16),
        "w2": jnp.asarray(w2, jnp.bfloat16),
        "b2": jnp.asarray(b2, jnp.float32),
        "wf1": jnp.asarray(wf1, jnp.bfloat16),
        "bf1": jnp.asarray(bf1, jnp.float32),
        "wh": jnp.asarray(wh, jnp.bfloat16),
        "bh": jnp.asarray(bh, jnp.float32),
    }


# ----------------------------------------------------------------------------
# Forward pass: one gather + one pallas_call.
# ----------------------------------------------------------------------------
@functools.partial(jax.jit, static_argnames=("latent_dim",))
def encoder_forward(prep, x_nchw, *, latent_dim):
    B = x_nchw.shape[0]
    rows = max(8, ((B + 7) // 8) * 8)          # batch padded to a sublane multiple
    n_pos, c2, ncol = 49, 64, 90
    n_rows = n_pos * rows

    b_idx, pix, val, ind = _patch_constants(B, rows)    # numpy trace-time constants
    xb = x_nchw.reshape(B, 28 * 28).astype(jnp.float32)
    g = xb[b_idx, pix]                                    # (n_pos, rows, 90) gather
    p = (g * val + ind).reshape(n_rows, ncol).astype(jnp.bfloat16)

    args = (p, prep["w1"], prep["w2"], prep["b2"],
            prep["wf1"], prep["bf1"], prep["wh"], prep["bh"])

    out = pl.pallas_call(
        functools.partial(_encoder_fused_kernel, n_pos=n_pos, rows=rows, c2=c2),
        out_shape=jax.ShapeDtypeStruct((rows, 128), jnp.float32),
        in_specs=[pl.BlockSpec(a.shape, lambda: (0, 0)) for a in args],
        out_specs=pl.BlockSpec((rows, 128), lambda: (0, 0)),
        scratch_shapes=[pltpu.VMEM((rows, n_pos * c2), jnp.float32)],
        compiler_params=pltpu.CompilerParams(
            vmem_limit_bytes=32 * 1024 * 1024),
    )(*args)

    return out[:B, :latent_dim], out[:B, latent_dim:2 * latent_dim]


# ----------------------------------------------------------------------------
# Deterministic synthetic parameters (PyTorch layer shapes) and a pure-JAX
# reference used as a numerical self-check.
# ----------------------------------------------------------------------------
def init_params(latent_dim, key):
    ks = jax.random.split(key, 10)

    def u(k, shape, fan_in):
        bound = 1.0 / jnp.sqrt(float(fan_in))
        return jax.random.uniform(k, shape, jnp.float32, -bound, bound)

    return {
        "conv1_w": u(ks[0], (32, 1, 3, 3), 1 * 3 * 3),
        "conv1_b": u(ks[1], (32,), 1 * 3 * 3),
        "conv2_w": u(ks[2], (64, 32, 3, 3), 32 * 3 * 3),
        "conv2_b": u(ks[3], (64,), 32 * 3 * 3),
        "fc1_w": u(ks[4], (256, 64 * 7 * 7), 64 * 7 * 7),
        "fc1_b": u(ks[5], (256,), 64 * 7 * 7),
        "fc2m_w": u(ks[6], (latent_dim, 256), 256),
        "fc2m_b": u(ks[7], (latent_dim,), 256),
        "fc2v_w": u(ks[8], (latent_dim, 256), 256),
        "fc2v_b": u(ks[9], (latent_dim,), 256),
    }


@jax.jit
def encoder_reference(params, x):
    y = jax.lax.conv_general_dilated(
        x, params["conv1_w"], window_strides=(2, 2), padding=((1, 1), (1, 1)),
        dimension_numbers=("NCHW", "OIHW", "NCHW"))
    y = jax.nn.relu(y + params["conv1_b"][None, :, None, None])
    y = jax.lax.conv_general_dilated(
        y, params["conv2_w"], window_strides=(2, 2), padding=((1, 1), (1, 1)),
        dimension_numbers=("NCHW", "OIHW", "NCHW"))
    y = jax.nn.relu(y + params["conv2_b"][None, :, None, None])
    flat = y.reshape(y.shape[0], -1)
    h = jax.nn.relu(flat @ params["fc1_w"].T + params["fc1_b"])
    zm = h @ params["fc2m_w"].T + params["fc2m_b"]
    zv = h @ params["fc2v_w"].T + params["fc2v_b"]
    return zm, zv


if __name__ == "__main__":
    latent_dim = 16
    batch = 2

    key = jax.random.PRNGKey(0)
    k_params, k_x = jax.random.split(key)
    params = init_params(latent_dim, k_params)
    x = jax.random.normal(k_x, (batch, 1, 28, 28), jnp.float32)

    prep = prepare_params(params)
    z_mean, z_logvar = encoder_forward(prep, x, latent_dim=latent_dim)
    jax.block_until_ready((z_mean, z_logvar))

    assert z_mean.shape == (batch, latent_dim)
    assert z_logvar.shape == (batch, latent_dim)

    # Numerical self-check against a pure-JAX f32 reference (bf16 MXU operands
    # in the kernel => small, bounded deviation).
    zm_ref, zv_ref = encoder_reference(params, x)
    err = max(float(jnp.max(jnp.abs(z_mean - zm_ref))),
              float(jnp.max(jnp.abs(z_logvar - zv_ref))))
    assert err < 3e-2, f"kernel/reference mismatch: max abs err = {err}"

    print("KERNEL_OK")
</pallas_src>

<mosaic_0001>
module attributes {stable_mosaic.version = 11 : i64} {
  func.func @_encoder_fused_kernel(%arg0: memref<392x90xbf16, #tpu.memory_space<vmem>>, %arg1: memref<90x288xbf16, #tpu.memory_space<vmem>>, %arg2: memref<288x64xbf16, #tpu.memory_space<vmem>>, %arg3: memref<1x64xf32, #tpu.memory_space<vmem>>, %arg4: memref<3136x256xbf16, #tpu.memory_space<vmem>>, %arg5: memref<1x256xf32, #tpu.memory_space<vmem>>, %arg6: memref<256x128xbf16, #tpu.memory_space<vmem>>, %arg7: memref<1x128xf32, #tpu.memory_space<vmem>>, %arg8: memref<8x128xf32, #tpu.memory_space<vmem>>, %arg9: memref<8x3136xf32, #tpu.memory_space<vmem>>) attributes {dimension_semantics = [], scalar_prefetch = 0 : i64, scratch_operands = 1 : i64, tpu.core_type = #tpu.core_type<tc>} {
    %c0 = arith.constant 0 : index
    %c0_0 = arith.constant 0 : index
    %0 = vector.load %arg0[%c0, %c0_0] : memref<392x90xbf16, #tpu.memory_space<vmem>>, vector<392x90xbf16>
    %c0_1 = arith.constant 0 : index
    %c0_2 = arith.constant 0 : index
    %1 = vector.load %arg1[%c0_1, %c0_2] : memref<90x288xbf16, #tpu.memory_space<vmem>>, vector<90x288xbf16>
    %cst = arith.constant dense<0.000000e+00> : vector<392x288xf32>
    %2 = tpu.matmul %0, %1, %cst {dimension_numbers = #tpu.dot_dimension_numbers<[1], [0], [0], [1], [0, 0, 1, 1], [], []>} : vector<392x90xbf16>, vector<90x288xbf16>, vector<392x288xf32> -> vector<392x288xf32>
    %cst_3 = arith.constant 0.000000e+00 : f32
    %3 = vector.broadcast %cst_3 : f32 to vector<392x288xf32>
    %4 = arith.maximumf %2, %3 : vector<392x288xf32>
    %5 = arith.truncf %4 : vector<392x288xf32> to vector<392x288xbf16>
    %c0_4 = arith.constant 0 : index
    %c0_5 = arith.constant 0 : index
    %6 = vector.load %arg2[%c0_4, %c0_5] : memref<288x64xbf16, #tpu.memory_space<vmem>>, vector<288x64xbf16>
    %cst_6 = arith.constant dense<0.000000e+00> : vector<392x64xf32>
    %7 = tpu.matmul %5, %6, %cst_6 {dimension_numbers = #tpu.dot_dimension_numbers<[1], [0], [0], [1], [0, 0, 1, 1], [], []>} : vector<392x288xbf16>, vector<288x64xbf16>, vector<392x64xf32> -> vector<392x64xf32>
    %c0_7 = arith.constant 0 : index
    %c0_8 = arith.constant 0 : index
    %8 = vector.load %arg3[%c0_7, %c0_8] : memref<1x64xf32, #tpu.memory_space<vmem>>, vector<1x64xf32>
    %9 = vector.broadcast %8 : vector<1x64xf32> to vector<392x64xf32>
    %10 = arith.addf %7, %9 : vector<392x64xf32>
    %cst_9 = arith.constant 0.000000e+00 : f32
    %11 = vector.broadcast %cst_9 : f32 to vector<392x64xf32>
    %12 = arith.maximumf %10, %11 : vector<392x64xf32>
    %13 = vector.extract_strided_slice %12 {offsets = [0, 0], sizes = [8, 64], strides = [1, 1]} : vector<392x64xf32> to vector<8x64xf32>
    %c0_10 = arith.constant 0 : index
    %c0_11 = arith.constant 0 : index
    %14 = vector.load %arg9[%c0_10, %c0_11] : memref<8x3136xf32, #tpu.memory_space<vmem>>, vector<8x64xf32>
    tpu.vector_store %arg9[%c0_10, %c0_11], %13 {strides = array<i32>} : memref<8x3136xf32, #tpu.memory_space<vmem>>, vector<8x64xf32>,
    %15 = vector.extract_strided_slice %12 {offsets = [8, 0], sizes = [8, 64], strides = [1, 1]} : vector<392x64xf32> to vector<8x64xf32>
    %c0_12 = arith.constant 0 : index
    %c64 = arith.constant 64 : index
    %16 = vector.load %arg9[%c0_12, %c64] : memref<8x3136xf32, #tpu.memory_space<vmem>>, vector<8x64xf32>
    tpu.vector_store %arg9[%c0_12, %c64], %15 {strides = array<i32>} : memref<8x3136xf32, #tpu.memory_space<vmem>>, vector<8x64xf32>,
    %17 = vector.extract_strided_slice %12 {offsets = [16, 0], sizes = [8, 64], strides = [1, 1]} : vector<392x64xf32> to vector<8x64xf32>
    %c0_13 = arith.constant 0 : index
    %c128 = arith.constant 128 : index
    %18 = vector.load %arg9[%c0_13, %c128] : memref<8x3136xf32, #tpu.memory_space<vmem>>, vector<8x64xf32>
    tpu.vector_store %arg9[%c0_13, %c128], %17 {strides = array<i32>} : memref<8x3136xf32, #tpu.memory_space<vmem>>, vector<8x64xf32>,
    %19 = vector.extract_strided_slice %12 {offsets = [24, 0], sizes = [8, 64], strides = [1, 1]} : vector<392x64xf32> to vector<8x64xf32>
    %c0_14 = arith.constant 0 : index
    %c192 = arith.constant 192 : index
    %20 = vector.load %arg9[%c0_14, %c192] : memref<8x3136xf32, #tpu.memory_space<vmem>>, vector<8x64xf32>
    tpu.vector_store %arg9[%c0_14, %c192], %19 {strides = array<i32>} : memref<8x3136xf32, #tpu.memory_space<vmem>>, vector<8x64xf32>,
    %21 = vector.extract_strided_slice %12 {offsets = [32, 0], sizes = [8, 64], strides = [1, 1]} : vector<392x64xf32> to vector<8x64xf32>
    %c0_15 = arith.constant 0 : index
    %c256 = arith.constant 256 : index
    %22 = vector.load %arg9[%c0_15, %c256] : memref<8x3136xf32, #tpu.memory_space<vmem>>, vector<8x64xf32>
    tpu.vector_store %arg9[%c0_15, %c256], %21 {strides = array<i32>} : memref<8x3136xf32, #tpu.memory_space<vmem>>, vector<8x64xf32>,
    %23 = vector.extract_strided_slice %12 {offsets = [40, 0], sizes = [8, 64], strides = [1, 1]} : vector<392x64xf32> to vector<8x64xf32>
    %c0_16 = arith.constant 0 : index
    %c320 = arith.constant 320 : index
    %24 = vector.load %arg9[%c0_16, %c320] : memref<8x3136xf32, #tpu.memory_space<vmem>>, vector<8x64xf32>
    tpu.vector_store %arg9[%c0_16, %c320], %23 {strides = array<i32>} : memref<8x3136xf32, #tpu.memory_space<vmem>>, vector<8x64xf32>,
    %25 = vector.extract_strided_slice %12 {offsets = [48, 0], sizes = [8, 64], strides = [1, 1]} : vector<392x64xf32> to vector<8x64xf32>
    %c0_17 = arith.constant 0 : index
    %c384 = arith.constant 384 : index
    %26 = vector.load %arg9[%c0_17, %c384] : memref<8x3136xf32, #tpu.memory_space<vmem>>, vector<8x64xf32>
    tpu.vector_store %arg9[%c0_17, %c384], %25 {strides = array<i32>} : memref<8x3136xf32, #tpu.memory_space<vmem>>, vector<8x64xf32>,
    %27 = vector.extract_strided_slice %12 {offsets = [56, 0], sizes = [8, 64], strides = [1, 1]} : vector<392x64xf32> to vector<8x64xf32>
    %c0_18 = arith.constant 0 : index
    %c448 = arith.constant 448 : index
    %28 = vector.load %arg9[%c0_18, %c448] : memref<8x3136xf32, #tpu.memory_space<vmem>>, vector<8x64xf32>
    tpu.vector_store %arg9[%c0_18, %c448], %27 {strides = array<i32>} : memref<8x3136xf32, #tpu.memory_space<vmem>>, vector<8x64xf32>,
    %29 = vector.extract_strided_slice %12 {offsets = [64, 0], sizes = [8, 64], strides = [1, 1]} : vector<392x64xf32> to vector<8x64xf32>
    %c0_19 = arith.constant 0 : index
    %c512 = arith.constant 512 : index
    %30 = vector.load %arg9[%c0_19, %c512] : memref<8x3136xf32, #tpu.memory_space<vmem>>, vector<8x64xf32>
    tpu.vector_store %arg9[%c0_19, %c512], %29 {strides = array<i32>} : memref<8x3136xf32, #tpu.memory_space<vmem>>, vector<8x64xf32>,
    %31 = vector.extract_strided_slice %12 {offsets = [72, 0], sizes = [8, 64], strides = [1, 1]} : vector<392x64xf32> to vector<8x64xf32>
    %c0_20 = arith.constant 0 : index
    %c576 = arith.constant 576 : index
    %32 = vector.load %arg9[%c0_20, %c576] : memref<8x3136xf32, #tpu.memory_space<vmem>>, vector<8x64xf32>
    tpu.vector_store %arg9[%c0_20, %c576], %31 {strides = array<i32>} : memref<8x3136xf32, #tpu.memory_space<vmem>>, vector<8x64xf32>,
    %33 = vector.extract_strided_slice %12 {offsets = [80, 0], sizes = [8, 64], strides = [1, 1]} : vector<392x64xf32> to vector<8x64xf32>
    %c0_21 = arith.constant 0 : index
    %c640 = arith.constant 640 : index
    %34 = vector.load %arg9[%c0_21, %c640] : memref<8x3136xf32, #tpu.memory_space<vmem>>, vector<8x64xf32>
    tpu.vector_store %arg9[%c0_21, %c640], %33 {strides = array<i32>} : memref<8x3136xf32, #tpu.memory_space<vmem>>, vector<8x64xf32>,
    %35 = vector.extract_strided_slice %12 {offsets = [88, 0], sizes = [8, 64], strides = [1, 1]} : vector<392x64xf32> to vector<8x64xf32>
    %c0_22 = arith.constant 0 : index
    %c704 = arith.constant 704 : index
    %36 = vector.load %arg9[%c0_22, %c704] : memref<8x3136xf32, #tpu.memory_space<vmem>>, vector<8x64xf32>
    tpu.vector_store %arg9[%c0_22, %c704], %35 {strides = array<i32>} : memref<8x3136xf32, #tpu.memory_space<vmem>>, vector<8x64xf32>,
    %37 = vector.extract_strided_slice %12 {offsets = [96, 0], sizes = [8, 64], strides = [1, 1]} : vector<392x64xf32> to vector<8x64xf32>
    %c0_23 = arith.constant 0 : index
    %c768 = arith.constant 768 : index
    %38 = vector.load %arg9[%c0_23, %c768] : memref<8x3136xf32, #tpu.memory_space<vmem>>, vector<8x64xf32>
    tpu.vector_store %arg9[%c0_23, %c768], %37 {strides = array<i32>} : memref<8x3136xf32, #tpu.memory_space<vmem>>, vector<8x64xf32>,
    %39 = vector.extract_strided_slice %12 {offsets = [104, 0], sizes = [8, 64], strides = [1, 1]} : vector<392x64xf32> to vector<8x64xf32>
    %c0_24 = arith.constant 0 : index
    %c832 = arith.constant 832 : index
    %40 = vector.load %arg9[%c0_24, %c832] : memref<8x3136xf32, #tpu.memory_space<vmem>>, vector<8x64xf32>
    tpu.vector_store %arg9[%c0_24, %c832], %39 {strides = array<i32>} : memref<8x3136xf32, #tpu.memory_space<vmem>>, vector<8x64xf32>,
    %41 = vector.extract_strided_slice %12 {offsets = [112, 0], sizes = [8, 64], strides = [1, 1]} : vector<392x64xf32> to vector<8x64xf32>
    %c0_25 = arith.constant 0 : index
    %c896 = arith.constant 896 : index
    %42 = vector.load %arg9[%c0_25, %c896] : memref<8x3136xf32, #tpu.memory_space<vmem>>, vector<8x64xf32>
    tpu.vector_store %arg9[%c0_25, %c896], %41 {strides = array<i32>} : memref<8x3136xf32, #tpu.memory_space<vmem>>, vector<8x64xf32>,
    %43 = vector.extract_strided_slice %12 {offsets = [120, 0], sizes = [8, 64], strides = [1, 1]} : vector<392x64xf32> to vector<8x64xf32>
    %c0_26 = arith.constant 0 : index
    %c960 = arith.constant 960 : index
    %44 = vector.load %arg9[%c0_26, %c960] : memref<8x3136xf32, #tpu.memory_space<vmem>>, vector<8x64xf32>
    tpu.vector_store %arg9[%c0_26, %c960], %43 {strides = array<i32>} : memref<8x3136xf32, #tpu.memory_space<vmem>>, vector<8x64xf32>,
    %45 = vector.extract_strided_slice %12 {offsets = [128, 0], sizes = [8, 64], strides = [1, 1]} : vector<392x64xf32> to vector<8x64xf32>
    %c0_27 = arith.constant 0 : index
    %c1024 = arith.constant 1024 : index
    %46 = vector.load %arg9[%c0_27, %c1024] : memref<8x3136xf32, #tpu.memory_space<vmem>>, vector<8x64xf32>
    tpu.vector_store %arg9[%c0_27, %c1024], %45 {strides = array<i32>} : memref<8x3136xf32, #tpu.memory_space<vmem>>, vector<8x64xf32>,
    %47 = vector.extract_strided_slice %12 {offsets = [136, 0], sizes = [8, 64], strides = [1, 1]} : vector<392x64xf32> to vector<8x64xf32>
    %c0_28 = arith.constant 0 : index
    %c1088 = arith.constant 1088 : index
    %48 = vector.load %arg9[%c0_28, %c1088] : memref<8x3136xf32, #tpu.memory_space<vmem>>, vector<8x64xf32>
    tpu.vector_store %arg9[%c0_28, %c1088], %47 {strides = array<i32>} : memref<8x3136xf32, #tpu.memory_space<vmem>>, vector<8x64xf32>,
    %49 = vector.extract_strided_slice %12 {offsets = [144, 0], sizes = [8, 64], strides = [1, 1]} : vector<392x64xf32> to vector<8x64xf32>
    %c0_29 = arith.constant 0 : index
    %c1152 = arith.constant 1152 : index
    %50 = vector.load %arg9[%c0_29, %c1152] : memref<8x3136xf32, #tpu.memory_space<vmem>>, vector<8x64xf32>
    tpu.vector_store %arg9[%c0_29, %c1152], %49 {strides = array<i32>} : memref<8x3136xf32, #tpu.memory_space<vmem>>, vector<8x64xf32>,
    %51 = vector.extract_strided_slice %12 {offsets = [152, 0], sizes = [8, 64], strides = [1, 1]} : vector<392x64xf32> to vector<8x64xf32>
    %c0_30 = arith.constant 0 : index
    %c1216 = arith.constant 1216 : index
    %52 = vector.load %arg9[%c0_30, %c1216] : memref<8x3136xf32, #tpu.memory_space<vmem>>, vector<8x64xf32>
    tpu.vector_store %arg9[%c0_30, %c1216], %51 {strides = array<i32>} : memref<8x3136xf32, #tpu.memory_space<vmem>>, vector<8x64xf32>,
    %53 = vector.extract_strided_slice %12 {offsets = [160, 0], sizes = [8, 64], strides = [1, 1]} : vector<392x64xf32> to vector<8x64xf32>
    %c0_31 = arith.constant 0 : index
    %c1280 = arith.constant 1280 : index
    %54 = vector.load %arg9[%c0_31, %c1280] : memref<8x3136xf32, #tpu.memory_space<vmem>>, vector<8x64xf32>
    tpu.vector_store %arg9[%c0_31, %c1280], %53 {strides = array<i32>} : memref<8x3136xf32, #tpu.memory_space<vmem>>, vector<8x64xf32>,
    %55 = vector.extract_strided_slice %12 {offsets = [168, 0], sizes = [8, 64], strides = [1, 1]} : vector<392x64xf32> to vector<8x64xf32>
    %c0_32 = arith.constant 0 : index
    %c1344 = arith.constant 1344 : index
    %56 = vector.load %arg9[%c0_32, %c1344] : memref<8x3136xf32, #tpu.memory_space<vmem>>, vector<8x64xf32>
    tpu.vector_store %arg9[%c0_32, %c1344], %55 {strides = array<i32>} : memref<8x3136xf32, #tpu.memory_space<vmem>>, vector<8x64xf32>,
    %57 = vector.extract_strided_slice %12 {offsets = [176, 0], sizes = [8, 64], strides = [1, 1]} : vector<392x64xf32> to vector<8x64xf32>
    %c0_33 = arith.constant 0 : index
    %c1408 = arith.constant 1408 : index
    %58 = vector.load %arg9[%c0_33, %c1408] : memref<8x3136xf32, #tpu.memory_space<vmem>>, vector<8x64xf32>
    tpu.vector_store %arg9[%c0_33, %c1408], %57 {strides = array<i32>} : memref<8x3136xf32, #tpu.memory_space<vmem>>, vector<8x64xf32>,
    %59 = vector.extract_strided_slice %12 {offsets = [184, 0], sizes = [8, 64], strides = [1, 1]} : vector<392x64xf32> to vector<8x64xf32>
    %c0_34 = arith.constant 0 : index
    %c1472 = arith.constant 1472 : index
    %60 = vector.load %arg9[%c0_34, %c1472] : memref<8x3136xf32, #tpu.memory_space<vmem>>, vector<8x64xf32>
    tpu.vector_store %arg9[%c0_34, %c1472], %59 {strides = array<i32>} : memref<8x3136xf32, #tpu.memory_space<vmem>>, vector<8x64xf32>,
    %61 = vector.extract_strided_slice %12 {offsets = [192, 0], sizes = [8, 64], strides = [1, 1]} : vector<392x64xf32> to vector<8x64xf32>
    %c0_35 = arith.constant 0 : index
    %c1536 = arith.constant 1536 : index
    %62 = vector.load %arg9[%c0_35, %c1536] : memref<8x3136xf32, #tpu.memory_space<vmem>>, vector<8x64xf32>
    tpu.vector_store %arg9[%c0_35, %c1536], %61 {strides = array<i32>} : memref<8x3136xf32, #tpu.memory_space<vmem>>, vector<8x64xf32>,
    %63 = vector.extract_strided_slice %12 {offsets = [200, 0], sizes = [8, 64], strides = [1, 1]} : vector<392x64xf32> to vector<8x64xf32>
    %c0_36 = arith.constant 0 : index
    %c1600 = arith.constant 1600 : index
    %64 = vector.load %arg9[%c0_36, %c1600] : memref<8x3136xf32, #tpu.memory_space<vmem>>, vector<8x64xf32>
    tpu.vector_store %arg9[%c0_36, %c1600], %63 {strides = array<i32>} : memref<8x3136xf32, #tpu.memory_space<vmem>>, vector<8x64xf32>,
    %65 = vector.extract_strided_slice %12 {offsets = [208, 0], sizes = [8, 64], strides = [1, 1]} : vector<392x64xf32> to vector<8x64xf32>
    %c0_37 = arith.constant 0 : index
    %c1664 = arith.constant 1664 : index
    %66 = vector.load %arg9[%c0_37, %c1664] : memref<8x3136xf32, #tpu.memory_space<vmem>>, vector<8x64xf32>
    tpu.vector_store %arg9[%c0_37, %c1664], %65 {strides = array<i32>} : memref<8x3136xf32, #tpu.memory_space<vmem>>, vector<8x64xf32>,
    %67 = vector.extract_strided_slice %12 {offsets = [216, 0], sizes = [8, 64], strides = [1, 1]} : vector<392x64xf32> to vector<8x64xf32>
    %c0_38 = arith.constant 0 : index
    %c1728 = arith.constant 1728 : index
    %68 = vector.load %arg9[%c0_38, %c1728] : memref<8x3136xf32, #tpu.memory_space<vmem>>, vector<8x64xf32>
    tpu.vector_store %arg9[%c0_38, %c1728], %67 {strides = array<i32>} : memref<8x3136xf32, #tpu.memory_space<vmem>>, vector<8x64xf32>,
    %69 = vector.extract_strided_slice %12 {offsets = [224, 0], sizes = [8, 64], strides = [1, 1]} : vector<392x64xf32> to vector<8x64xf32>
    %c0_39 = arith.constant 0 : index
    %c1792 = arith.constant 1792 : index
    %70 = vector.load %arg9[%c0_39, %c1792] : memref<8x3136xf32, #tpu.memory_space<vmem>>, vector<8x64xf32>
    tpu.vector_store %arg9[%c0_39, %c1792], %69 {strides = array<i32>} : memref<8x3136xf32, #tpu.memory_space<vmem>>, vector<8x64xf32>,
    %71 = vector.extract_strided_slice %12 {offsets = [232, 0], sizes = [8, 64], strides = [1, 1]} : vector<392x64xf32> to vector<8x64xf32>
    %c0_40 = arith.constant 0 : index
    %c1856 = arith.constant 1856 : index
    %72 = vector.load %arg9[%c0_40, %c1856] : memref<8x3136xf32, #tpu.memory_space<vmem>>, vector<8x64xf32>
    tpu.vector_store %arg9[%c0_40, %c1856], %71 {strides = array<i32>} : memref<8x3136xf32, #tpu.memory_space<vmem>>, vector<8x64xf32>,
    %73 = vector.extract_strided_slice %12 {offsets = [240, 0], sizes = [8, 64], strides = [1, 1]} : vector<392x64xf32> to vector<8x64xf32>
    %c0_41 = arith.constant 0 : index
    %c1920 = arith.constant 1920 : index
    %74 = vector.load %arg9[%c0_41, %c1920] : memref<8x3136xf32, #tpu.memory_space<vmem>>, vector<8x64xf32>
    tpu.vector_store %arg9[%c0_41, %c1920], %73 {strides = array<i32>} : memref<8x3136xf32, #tpu.memory_space<vmem>>, vector<8x64xf32>,
    %75 = vector.extract_strided_slice %12 {offsets = [248, 0], sizes = [8, 64], strides = [1, 1]} : vector<392x64xf32> to vector<8x64xf32>
    %c0_42 = arith.constant 0 : index
    %c1984 = arith.constant 1984 : index
    %76 = vector.load %arg9[%c0_42, %c1984] : memref<8x3136xf32, #tpu.memory_space<vmem>>, vector<8x64xf32>
    tpu.vector_store %arg9[%c0_42, %c1984], %75 {strides = array<i32>} : memref<8x3136xf32, #tpu.memory_space<vmem>>, vector<8x64xf32>,
    %77 = vector.extract_strided_slice %12 {offsets = [256, 0], sizes = [8, 64], strides = [1, 1]} : vector<392x64xf32> to vector<8x64xf32>
    %c0_43 = arith.constant 0 : index
    %c2048 = arith.constant 2048 : index
    %78 = vector.load %arg9[%c0_43, %c2048] : memref<8x3136xf32, #tpu.memory_space<vmem>>, vector<8x64xf32>
    tpu.vector_store %arg9[%c0_43, %c2048], %77 {strides = array<i32>} : memref<8x3136xf32, #tpu.memory_space<vmem>>, vector<8x64xf32>,
    %79 = vector.extract_strided_slice %12 {offsets = [264, 0], sizes = [8, 64], strides = [1, 1]} : vector<392x64xf32> to vector<8x64xf32>
    %c0_44 = arith.constant 0 : index
    %c2112 = arith.constant 2112 : index
    %80 = vector.load %arg9[%c0_44, %c2112] : memref<8x3136xf32, #tpu.memory_space<vmem>>, vector<8x64xf32>
    tpu.vector_store %arg9[%c0_44, %c2112], %79 {strides = array<i32>} : memref<8x3136xf32, #tpu.memory_space<vmem>>, vector<8x64xf32>,
    %81 = vector.extract_strided_slice %12 {offsets = [272, 0], sizes = [8, 64], strides = [1, 1]} : vector<392x64xf32> to vector<8x64xf32>
    %c0_45 = arith.constant 0 : index
    %c2176 = arith.constant 2176 : index
    %82 = vector.load %arg9[%c0_45, %c2176] : memref<8x3136xf32, #tpu.memory_space<vmem>>, vector<8x64xf32>
    tpu.vector_store %arg9[%c0_45, %c2176], %81 {strides = array<i32>} : memref<8x3136xf32, #tpu.memory_space<vmem>>, vector<8x64xf32>,
    %83 = vector.extract_strided_slice %12 {offsets = [280, 0], sizes = [8, 64], strides = [1, 1]} : vector<392x64xf32> to vector<8x64xf32>
    %c0_46 = arith.constant 0 : index
    %c2240 = arith.constant 2240 : index
    %84 = vector.load %arg9[%c0_46, %c2240] : memref<8x3136xf32, #tpu.memory_space<vmem>>, vector<8x64xf32>
    tpu.vector_store %arg9[%c0_46, %c2240], %83 {strides = array<i32>} : memref<8x3136xf32, #tpu.memory_space<vmem>>, vector<8x64xf32>,
    %85 = vector.extract_strided_slice %12 {offsets = [288, 0], sizes = [8, 64], strides = [1, 1]} : vector<392x64xf32> to vector<8x64xf32>
    %c0_47 = arith.constant 0 : index
    %c2304 = arith.constant 2304 : index
    %86 = vector.load %arg9[%c0_47, %c2304] : memref<8x3136xf32, #tpu.memory_space<vmem>>, vector<8x64xf32>
    tpu.vector_store %arg9[%c0_47, %c2304], %85 {strides = array<i32>} : memref<8x3136xf32, #tpu.memory_space<vmem>>, vector<8x64xf32>,
    %87 = vector.extract_strided_slice %12 {offsets = [296, 0], sizes = [8, 64], strides = [1, 1]} : vector<392x64xf32> to vector<8x64xf32>
    %c0_48 = arith.constant 0 : index
    %c2368 = arith.constant 2368 : index
    %88 = vector.load %arg9[%c0_48, %c2368] : memref<8x3136xf32, #tpu.memory_space<vmem>>, vector<8x64xf32>
    tpu.vector_store %arg9[%c0_48, %c2368], %87 {strides = array<i32>} : memref<8x3136xf32, #tpu.memory_space<vmem>>, vector<8x64xf32>,
    %89 = vector.extract_strided_slice %12 {offsets = [304, 0], sizes = [8, 64], strides = [1, 1]} : vector<392x64xf32> to vector<8x64xf32>
    %c0_49 = arith.constant 0 : index
    %c2432 = arith.constant 2432 : index
    %90 = vector.load %arg9[%c0_49, %c2432] : memref<8x3136xf32, #tpu.memory_space<vmem>>, vector<8x64xf32>
    tpu.vector_store %arg9[%c0_49, %c2432], %89 {strides = array<i32>} : memref<8x3136xf32, #tpu.memory_space<vmem>>, vector<8x64xf32>,
    %91 = vector.extract_strided_slice %12 {offsets = [312, 0], sizes = [8, 64], strides = [1, 1]} : vector<392x64xf32> to vector<8x64xf32>
    %c0_50 = arith.constant 0 : index
    %c2496 = arith.constant 2496 : index
    %92 = vector.load %arg9[%c0_50, %c2496] : memref<8x3136xf32, #tpu.memory_space<vmem>>, vector<8x64xf32>
    tpu.vector_store %arg9[%c0_50, %c2496], %91 {strides = array<i32>} : memref<8x3136xf32, #tpu.memory_space<vmem>>, vector<8x64xf32>,
    %93 = vector.extract_strided_slice %12 {offsets = [320, 0], sizes = [8, 64], strides = [1, 1]} : vector<392x64xf32> to vector<8x64xf32>
    %c0_51 = arith.constant 0 : index
    %c2560 = arith.constant 2560 : index
    %94 = vector.load %arg9[%c0_51, %c2560] : memref<8x3136xf32, #tpu.memory_space<vmem>>, vector<8x64xf32>
    tpu.vector_store %arg9[%c0_51, %c2560], %93 {strides = array<i32>} : memref<8x3136xf32, #tpu.memory_space<vmem>>, vector<8x64xf32>,
    %95 = vector.extract_strided_slice %12 {offsets = [328, 0], sizes = [8, 64], strides = [1, 1]} : vector<392x64xf32> to vector<8x64xf32>
    %c0_52 = arith.constant 0 : index
    %c2624 = arith.constant 2624 : index
    %96 = vector.load %arg9[%c0_52, %c2624] : memref<8x3136xf32, #tpu.memory_space<vmem>>, vector<8x64xf32>
    tpu.vector_store %arg9[%c0_52, %c2624], %95 {strides = array<i32>} : memref<8x3136xf32, #tpu.memory_space<vmem>>, vector<8x64xf32>,
    %97 = vector.extract_strided_slice %12 {offsets = [336, 0], sizes = [8, 64], strides = [1, 1]} : vector<392x64xf32> to vector<8x64xf32>
    %c0_53 = arith.constant 0 : index
    %c2688 = arith.constant 2688 : index
    %98 = vector.load %arg9[%c0_53, %c2688] : memref<8x3136xf32, #tpu.memory_space<vmem>>, vector<8x64xf32>
    tpu.vector_store %arg9[%c0_53, %c2688], %97 {strides = array<i32>} : memref<8x3136xf32, #tpu.memory_space<vmem>>, vector<8x64xf32>,
    %99 = vector.extract_strided_slice %12 {offsets = [344, 0], sizes = [8, 64], strides = [1, 1]} : vector<392x64xf32> to vector<8x64xf32>
    %c0_54 = arith.constant 0 : index
    %c2752 = arith.constant 2752 : index
    %100 = vector.load %arg9[%c0_54, %c2752] : memref<8x3136xf32, #tpu.memory_space<vmem>>, vector<8x64xf32>
    tpu.vector_store %arg9[%c0_54, %c2752], %99 {strides = array<i32>} : memref<8x3136xf32, #tpu.memory_space<vmem>>, vector<8x64xf32>,
    %101 = vector.extract_strided_slice %12 {offsets = [352, 0], sizes = [8, 64], strides = [1, 1]} : vector<392x64xf32> to vector<8x64xf32>
    %c0_55 = arith.constant 0 : index
    %c2816 = arith.constant 2816 : index
    %102 = vector.load %arg9[%c0_55, %c2816] : memref<8x3136xf32, #tpu.memory_space<vmem>>, vector<8x64xf32>
    tpu.vector_store %arg9[%c0_55, %c2816], %101 {strides = array<i32>} : memref<8x3136xf32, #tpu.memory_space<vmem>>, vector<8x64xf32>,
    %103 = vector.extract_strided_slice %12 {offsets = [360, 0], sizes = [8, 64], strides = [1, 1]} : vector<392x64xf32> to vector<8x64xf32>
    %c0_56 = arith.constant 0 : index
    %c2880 = arith.constant 2880 : index
    %104 = vector.load %arg9[%c0_56, %c2880] : memref<8x3136xf32, #tpu.memory_space<vmem>>, vector<8x64xf32>
    tpu.vector_store %arg9[%c0_56, %c2880], %103 {strides = array<i32>} : memref<8x3136xf32, #tpu.memory_space<vmem>>, vector<8x64xf32>,
    %105 = vector.extract_strided_slice %12 {offsets = [368, 0], sizes = [8, 64], strides = [1, 1]} : vector<392x64xf32> to vector<8x64xf32>
    %c0_57 = arith.constant 0 : index
    %c2944 = arith.constant 2944 : index
    %106 = vector.load %arg9[%c0_57, %c2944] : memref<8x3136xf32, #tpu.memory_space<vmem>>, vector<8x64xf32>
    tpu.vector_store %arg9[%c0_57, %c2944], %105 {strides = array<i32>} : memref<8x3136xf32, #tpu.memory_space<vmem>>, vector<8x64xf32>,
    %107 = vector.extract_strided_slice %12 {offsets = [376, 0], sizes = [8, 64], strides = [1, 1]} : vector<392x64xf32> to vector<8x64xf32>
    %c0_58 = arith.constant 0 : index
    %c3008 = arith.constant 3008 : index
    %108 = vector.load %arg9[%c0_58, %c3008] : memref<8x3136xf32, #tpu.memory_space<vmem>>, vector<8x64xf32>
    tpu.vector_store %arg9[%c0_58, %c3008], %107 {strides = array<i32>} : memref<8x3136xf32, #tpu.memory_space<vmem>>, vector<8x64xf32>,
    %109 = vector.extract_strided_slice %12 {offsets = [384, 0], sizes = [8, 64], strides = [1, 1]} : vector<392x64xf32> to vector<8x64xf32>
    %c0_59 = arith.constant 0 : index
    %c3072 = arith.constant 3072 : index
    %110 = vector.load %arg9[%c0_59, %c3072] : memref<8x3136xf32, #tpu.memory_space<vmem>>, vector<8x64xf32>
    tpu.vector_store %arg9[%c0_59, %c3072], %109 {strides = array<i32>} : memref<8x3136xf32, #tpu.memory_space<vmem>>, vector<8x64xf32>,
    %c0_60 = arith.constant 0 : index
    %c0_61 = arith.constant 0 : index
    %111 = vector.load %arg9[%c0_60, %c0_61] : memref<8x3136xf32, #tpu.memory_space<vmem>>, vector<8x3136xf32>
    %112 = arith.truncf %111 : vector<8x3136xf32> to vector<8x3136xbf16>
    %c0_62 = arith.constant 0 : index
    %c0_63 = arith.constant 0 : index
    %113 = vector.load %arg4[%c0_62, %c0_63] : memref<3136x256xbf16, #tpu.memory_space<vmem>>, vector<3136x256xbf16>
    %cst_64 = arith.constant dense<0.000000e+00> : vector<8x256xf32>
    %114 = tpu.matmul %112, %113, %cst_64 {dimension_numbers = #tpu.dot_dimension_numbers<[1], [0], [0], [1], [0, 0, 1, 1], [], []>} : vector<8x3136xbf16>, vector<3136x256xbf16>, vector<8x256xf32> -> vector<8x256xf32>
    %c0_65 = arith.constant 0 : index
    %c0_66 = arith.constant 0 : index
    %115 = vector.load %arg5[%c0_65, %c0_66] : memref<1x256xf32, #tpu.memory_space<vmem>>, vector<1x256xf32>
    %116 = vector.broadcast %115 : vector<1x256xf32> to vector<8x256xf32>
    %117 = arith.addf %114, %116 : vector<8x256xf32>
    %cst_67 = arith.constant 0.000000e+00 : f32
    %118 = vector.broadcast %cst_67 : f32 to vector<8x256xf32>
    %119 = arith.maximumf %117, %118 : vector<8x256xf32>
    %120 = arith.truncf %119 : vector<8x256xf32> to vector<8x256xbf16>
    %c0_68 = arith.constant 0 : index
    %c0_69 = arith.constant 0 : index
    %121 = vector.load %arg6[%c0_68, %c0_69] : memref<256x128xbf16, #tpu.memory_space<vmem>>, vector<256x128xbf16>
    %cst_70 = arith.constant dense<0.000000e+00> : vector<8x128xf32>
    %122 = tpu.matmul %120, %121, %cst_70 {dimension_numbers = #tpu.dot_dimension_numbers<[1], [0], [0], [1], [0, 0, 1, 1], [], []>} : vector<8x256xbf16>, vector<256x128xbf16>, vector<8x128xf32> -> vector<8x128xf32>
    %c0_71 = arith.constant 0 : index
    %c0_72 = arith.constant 0 : index
    %123 = vector.load %arg7[%c0_71, %c0_72] : memref<1x128xf32, #tpu.memory_space<vmem>>, vector<1x128xf32>
    %124 = vector.broadcast %123 : vector<1x128xf32> to vector<8x128xf32>
    %125 = arith.addf %122, %124 : vector<8x128xf32>
    %c0_73 = arith.constant 0 : index
    %c0_74 = arith.constant 0 : index
    %126 = vector.load %arg8[%c0_73, %c0_74] : memref<8x128xf32, #tpu.memory_space<vmem>>, vector<8x128xf32>
    tpu.vector_store %arg8[%c0_73, %c0_74], %125 {strides = array<i32>} : memref<8x128xf32, #tpu.memory_space<vmem>>, vector<8x128xf32>,
    return
  }
}

</mosaic_0001>

<bundles_post_ra>
// kernel: encoder_forward.1
= control target key start
LH: loop header
LB: loop body
LE: loop exit
PB: predicated region body
PF: predicated region fallthrough
CT: control target
= control target key end

     0   :  { %v6902_v1 = vmov 0   ;;  %vm395_vm0 = vcmask 1044480   ;;  %vm319_vm1 = vcmask 736256   ;;  %v6903_v16 = vmov 0.0   ;;  %s9061_s1 = inlined_call_operand.vmem [shape: bf16[90,288], index: 1, kind: input, shape index: {}]   ;;  %s9062_s0 = inlined_call_operand.vmem [shape: bf16[392,90], index: 0, kind: input, shape index: {}]   ;;  %s9063_s2 = inlined_call_operand.vmem [shape: bf16[288,64], index: 2, kind: input, shape index: {}]   ;;  %s9064_s4 = inlined_call_operand.vmem [shape: bf16[3136,256], index: 4, kind: input, shape index: {}]   ;;  %s9065_s3 = inlined_call_operand.vmem [shape: f32[1,64], index: 3, kind: input, shape index: {}]   ;;  %s9066_s6 = inlined_call_operand.vmem [shape: bf16[256,128], index: 6, kind: input, shape index: {}]   ;;  %s9067_s5 = inlined_call_operand.vmem [shape: f32[1,256], index: 5, kind: input, shape index: {}]   ;;  %s9068_s7 = inlined_call_operand.vmem [shape: f32[1,128], index: 7, kind: input, shape index: {}]   ;;  %s9069_s8 = inlined_call_operand.vmem [shape: f32[8,128], index: 8, kind: output, shape index: {}]  }
   0x1   :  { %v6230_v0 = vld [vmem:[%s9061_s1 + $0x4] ss:$12 sps:$4 sm:$0xff]   ;;  %437 = vmatprep.mubr.bf16.mxu0 %v6902_v1  ;;  %657 = vmatprep.mubr.bf16.mxu1 %v6902_v1  ;;  %v6232_v2 = vld [vmem:[%s9061_s1] ss:$12 sps:$4 sm:$0xff]   ;;  %v6233_v3 = vld [vmem:[%s9061_s1 + $0x1c] ss:$12 sps:$4 sm:$0xff]  }
   0x2   :  { %405 = vmatprep.subr.bf16.mxu0 %v6230_v0  ;;  %6005 = vmatprep.subr.bf16.mxu1 %v6230_v0  ;;  %v6235_v4 = vld [vmem:[%s9061_s1 + $0x18] ss:$12 sps:$4 sm:$0xff]   ;;  %v6236_v5 = vld [vmem:[%s9061_s1 + $0x34] ss:$12 sps:$4 sm:$0xff]   ;;  %v6238_v6 = vld [vmem:[%s9061_s1 + $0x30] ss:$12 sps:$4 sm:$0xff]  }
   0x3   :  { %406 = vmatpush1.bf16.msra.mxu0 %v6232_v2  ;;  %6011 = vmatpush1.bf16.msra.mxu1 %v6232_v2  ;;  %v6239_v7 = vld [vmem:[%s9061_s1 + $0x4c] ss:$12 sps:$4 sm:$0xff]   ;;  %v6241_v8 = vld [vmem:[%s9061_s1 + $0x48] ss:$12 sps:$4 sm:$0xff]   ;;  %v6242_v9 = vld [vmem:[%s9061_s1 + $0x64] ss:$12 sps:$4 sm:$0xff]  }
   0x4   :  { %407 = vmatprep.subr.bf16.mxu0 %v6233_v3  ;;  %6006 = vmatprep.subr.bf16.mxu1 %v6233_v3  ;;  %v6245_v10 = vld [vmem:[%s9061_s1 + $0x7c] ss:$12 sps:$4 sm:$0x1f]   ;;  %v6247_v11 = vld [vmem:[%s9061_s1 + $0x78] ss:$12 sps:$4 sm:$0x1f]  }
   0x5   :  { %v6244_v12 = vld [vmem:[%s9061_s1 + $0x60] ss:$12 sps:$4 sm:$0xff]   ;;  %v397_v13 = vsel %vm395_vm0, %v6247_v11, 0  ;;  %v7000_v15 = vld [vmem:[%s9061_s1 + $0x8] ss:$12 sps:$4 sm:$0xff]   ;;  %v7062_v25 = vld [vmem:[%s9062_s0 + $0x18] sm:$0xff]  }
   0x6   :  { %v6995_v14 = vld [vmem:[%s9062_s0] sm:$0xff]   ;;  %v7017_v18 = vld [vmem:[%s9062_s0 + $0x8] sm:$0xff]   ;;  %v7033_v20 = vld [vmem:[%s9061_s1 + $0x50] ss:$12 sps:$4 sm:$0xff]   ;;  %vm6904_vm2 = vmmov 0   ;;  %vm1291_vm3 = vcmask 261120  }
   0x7   :  { %408 = vmatpush1.bf16.msra.mxu0 %v6235_v4  ;;  %6012 = vmatpush1.bf16.msra.mxu1 %v6235_v4  ;;  %v7011_v17 = vld [vmem:[%s9061_s1 + $0x20] ss:$12 sps:$4 sm:$0xff]   ;;  %v7022_v19 = vld [vmem:[%s9061_s1 + $0x38] ss:$12 sps:$4 sm:$0xff]   ;;  %v7039_v21 = vld [vmem:[%s9062_s0 + $0x10] sm:$0xff]   ;;  %vm1880_vm4 = vcmask 523264  }
   0x8   :  { %409 = vmatprep.subr.bf16.mxu0 %v6236_v5  ;;  %6007 = vmatprep.subr.bf16.mxu1 %v6236_v5  ;;  %v7045_v22 = vld [vmem:[%s9061_s1 + $0x68] ss:$12 sps:$4 sm:$0xff]   ;;  %v6272_v23 = vld [vmem:[%s9061_s1 + $0x80] ss:$12 sps:$4 sm:$0x1f]   ;;  %v7096_v29 = vld [vmem:[%s9062_s0 + $0x38] sm:$0xff]  }
   0x9   :  { %v7057_v24 = vsel %vm395_vm0, %v6272_v23, 0  ;;  %v7072_v26 = vld [vmem:[%s9062_s0 + $0x20] sm:$0xff]   ;;  %v7080_v27 = vld [vmem:[%s9062_s0 + $0x28] sm:$0xff]   ;;  %v7088_v28 = vld [vmem:[%s9062_s0 + $0x30] sm:$0xff]   ;;  %s6905_s1 = smov 64   ;;  %vm1886_vm5 = vcmask 1048064  }
   0xa   :  { %v7104_v30 = vld [vmem:[%s9062_s0 + $0x40] sm:$0xff]   ;;  %v7112_v31 = vld [vmem:[%s9062_s0 + $0x48] sm:$0xff]   ;;  %v7120_v32 = vld [vmem:[%s9062_s0 + $0x50] sm:$0xff]  }
   0xb   :  { %410 = vmatpush1.bf16.msra.mxu0 %v6238_v6  ;;  %6013 = vmatpush1.bf16.msra.mxu1 %v6238_v6  ;;  %v7128_v33 = vld [vmem:[%s9062_s0 + $0x58] sm:$0xff]   ;;  %v7136_v34 = vld [vmem:[%s9062_s0 + $0x60] sm:$0xff]   ;;  %v7144_v35 = vld [vmem:[%s9062_s0 + $0x68] sm:$0xff]  }
   0xc   :  { %411 = vmatprep.subr.bf16.mxu0 %v6239_v7  ;;  %6008 = vmatprep.subr.bf16.mxu1 %v6239_v7  ;;  %v7152_v36 = vld [vmem:[%s9062_s0 + $0x70] sm:$0xff]   ;;  %v7160_v37 = vld [vmem:[%s9062_s0 + $0x78] sm:$0xff]   ;;  %v7168_v38 = vld [vmem:[%s9062_s0 + $0x80] sm:$0xff]  }
   0xd   :  { %v6270_v39 = vld [vmem:[%s9062_s0 + $0x88] sm:$0xff]   ;;  %v7179_v40 = vld [vmem:[%s9062_s0 + $0xb0] sm:$0xff]   ;;  %v7195_v42 = vld [vmem:[%s9062_s0 + $0xb8] sm:$0xff]  }
   0xe   :  { %v6271_v41 = vld [vmem:[%s9062_s0 + $0x90] sm:$0xff]   ;;  %v6273_v43 = vld [vmem:[%s9062_s0 + $0x98] sm:$0xff]   ;;  %v7215_v44 = vld [vmem:[%s9062_s0 + $0xc0] ss:$0 sps:$4 sm:$0xff]  }
   0xf   :  { %412 = vmatpush1.bf16.msra.mxu0 %v6241_v8  ;;  %6014 = vmatpush1.bf16.msra.mxu1 %v6241_v8  ;;  %v6274_v45 = vld [vmem:[%s9062_s0 + $0xa0] sm:$0xff]   ;;  %v6275_v46 = vld [vmem:[%s9062_s0 + $0xa8] sm:$0xff]   ;;  %v6278_v49 = vld [vmem:[%s9063_s2 + $0x10] sm:$0xff]  }
  0x10   :  { %413 = vmatprep.subr.bf16.mxu0 %v6242_v9  ;;  %6009 = vmatprep.subr.bf16.mxu1 %v6242_v9  ;;  %v6276_v47 = vld [vmem:[%s9063_s2] sm:$0xff]   ;;  %v6277_v48 = vld [vmem:[%s9063_s2 + $0x8] sm:$0xff]   ;;  %v6279_v50 = vld [vmem:[%s9063_s2 + $0x18] sm:$0xff]  }
  0x11   :  { %v6280_v51 = vld [vmem:[%s9063_s2 + $0x20] sm:$0xff]   ;;  %v6281_v52 = vld [vmem:[%s9063_s2 + $0x28] sm:$0xff]   ;;  %v6282_v53 = vld [vmem:[%s9063_s2 + $0x30] sm:$0xff]  }
  0x12   :  { %v6283_v54 = vld [vmem:[%s9063_s2 + $0x38] sm:$0xff]   ;;  %v6284_v55 = vld [vmem:[%s9063_s2 + $0x40] sm:$0xff]   ;;  %v6285_v56 = vld [vmem:[%s9063_s2 + $0x48] sm:$0xff]  }
  0x13   :  { %414 = vmatpush1.bf16.msra.mxu0 %v6244_v12  ;;  %6015 = vmatpush1.bf16.msra.mxu1 %v6244_v12  ;;  %v6286_v60 = vld [vmem:[%s9063_s2 + $0x50] sm:$0xff]   ;;  %v6288_v4 = vld [vmem:[%s9063_s2 + $0x58] sm:$0xff]   ;;  %v6290_v9 = vld [vmem:[%s9063_s2 + $0x60] sm:$0xff]  }
  0x14   :  { %5204 = vmatprep.subr.msk.bf16.mxu0 %vm395_vm0, %v6245_v10  ;;  %6010 = vmatprep.subr.msk.bf16.mxu1 %vm395_vm0, %v6245_v10 }
  0x17   :  { %416 = vmatpush1.bf16.msra.mxu0 %v397_v13  ;;  %6016 = vmatpush1.bf16.msra.mxu1 %v397_v13 }
  0x18   :  { %5789 = vmatprep.subr.bf16.mxu0 %v6903_v16  ;;  %6017 = vmatprep.subr.bf16.mxu1 %v6903_v16 }
  0x1a   :  { %5205 = vmatmul.mubr.msk.bf16.vlgmr.msra.gmra.mrb[0].mxu0 %vm319_vm1, %v6995_v14  ;;  %5227 = vmatmul.mubr.msk.bf16.vlgmr.msra.gmra.mrb[0].mxu1 %vm319_vm1, %v7179_v40 }
  0x1b   :  { %5790 = vmatpush3.bf16.msra.mxu0 %v7000_v15  ;;  %447 = vmatprep.mubr.bf16.mxu0 %v6902_v1 }
  0x1c   :  { %5791 = vmatprep.subr.bf16.mxu0 %v6903_v16  ;;  %667 = vmatprep.mubr.bf16.mxu1 %v6902_v1 }
  0x1d   :  { %6023 = vmatpush3.bf16.msra.mxu1 %v7000_v15 }
  0x1e   :  { %6018 = vmatprep.subr.bf16.mxu1 %v6903_v16 }
  0x1f   :  { %5792 = vmatpush3.bf16.msra.mxu0 %v7011_v17 }
  0x20   :  { %5793 = vmatprep.subr.bf16.mxu0 %v6903_v16 }
  0x21   :  { %6024 = vmatpush3.bf16.msra.mxu1 %v7011_v17  ;;  %v6292_v17 = vld [vmem:[%s9063_s2 + $0x68] sm:$0xff]  }
  0x22   :  { %5206 = vmatmul.mubr.msk.bf16.gmra.mrb[4].mxu0 %vm319_vm1, %v7017_v18  ;;  %6019 = vmatprep.subr.bf16.mxu1 %v6903_v16 }
  0x23   :  { %457 = vmatprep.mubr.bf16.mxu0 %v6902_v1  ;;  %5794 = vmatpush3.bf16.msra.mxu0 %v7022_v19 }
  0x24   :  { %5795 = vmatprep.subr.bf16.mxu0 %v6903_v16  ;;  %5228 = vmatmul.mubr.msk.bf16.gmra.mrb[4].mxu1 %vm319_vm1, %v7195_v42 }
  0x25   :  { %677 = vmatprep.mubr.bf16.mxu1 %v6902_v1  ;;  %6025 = vmatpush3.bf16.msra.mxu1 %v7022_v19 }
  0x26   :  { %6020 = vmatprep.subr.bf16.mxu1 %v6903_v16 }
  0x27   :  { %5796 = vmatpush3.bf16.msra.mxu0 %v7033_v20 }
  0x28   :  { %5797 = vmatprep.subr.bf16.mxu0 %v6903_v16 }
  0x29   :  { %6026 = vmatpush3.bf16.msra.mxu1 %v7033_v20 }
  0x2a   :  { %5207 = vmatmul.mubr.msk.bf16.gmra.mrb[8].mxu0 %vm319_vm1, %v7039_v21  ;;  %6021 = vmatprep.subr.bf16.mxu1 %v6903_v16 }
  0x2b   :  { %467 = vmatprep.mubr.bf16.mxu0 %v6902_v1  ;;  %5798 = vmatpush3.bf16.msra.mxu0 %v7045_v22 }
  0x2c   :  { %5799 = vmatprep.subr.bf16.mxu0 %v6903_v16  ;;  %5229 = vmatmul.mubr.msk.bf16.gmra.mrb[8].mxu1 %vm319_vm1, %v7215_v44 }
  0x2d   :  { %6027 = vmatpush3.bf16.msra.mxu1 %v7045_v22  ;;  %5869 = vmatprep.mubr.msk.bf16.mxu1 %vm6904_vm2, %v6903_v16  ;;  %v6293_v22 = vld [vmem:[%s9063_s2 + $0x70] sm:$0xff]  }
  0x2e   :  { %6022 = vmatprep.subr.bf16.mxu1 %v6903_v16 }
  0x2f   :  { %5800 = vmatpush3.bf16.msra.mxu0 %v7057_v24 }
  0x30   :  { %1367 = vmatprep.subr.bf16.mxu0 %v6902_v1 }
  0x31   :  { %6028 = vmatpush3.bf16.msra.mxu1 %v7057_v24 }
  0x32   :  { %5208 = vmatmul.mubr.msk.bf16.gmra.mrb[12].mxu0 %vm319_vm1, %v7062_v25 }
  0x33   :  { %477 = vmatprep.mubr.bf16.mxu0 %v6902_v1 }
  0x34   :  { %5870 = vmatmul.mubr.msk.bf16.vlgmr.msra.gmra.mrb[12].mxu1 %vm319_vm1, %v6270_v39 }
  0x35   :  { %5873 = vmatprep.mubr.msk.bf16.mxu1 %vm6904_vm2, %v6903_v16 }
  0x3a   :  { %5209 = vmatmul.mubr.msk.bf16.gmra.mrb[16].mxu0 %vm319_vm1, %v7072_v26 }
  0x3b   :  { %487 = vmatprep.mubr.bf16.mxu0 %v6902_v1 }
  0x3c   :  { %5874 = vmatmul.mubr.msk.bf16.gmra.mrb[16].mxu1 %vm319_vm1, %v6271_v41 }
  0x3d   :  { %5877 = vmatprep.mubr.msk.bf16.mxu1 %vm6904_vm2, %v6903_v16 }
  0x42   :  { %5210 = vmatmul.mubr.msk.bf16.gmra.mrb[20].mxu0 %vm319_vm1, %v7080_v27 }
  0x43   :  { %497 = vmatprep.mubr.bf16.mxu0 %v6902_v1 }
  0x44   :  { %5878 = vmatmul.mubr.msk.bf16.gmra.mrb[20].mxu1 %vm319_vm1, %v6273_v43 }
  0x45   :  { %5881 = vmatprep.mubr.msk.bf16.mxu1 %vm6904_vm2, %v6903_v16 }
  0x4a   :  { %5211 = vmatmul.mubr.msk.bf16.gmra.mrb[24].mxu0 %vm319_vm1, %v7088_v28 }
  0x4b   :  { %507 = vmatprep.mubr.bf16.mxu0 %v6902_v1 }
  0x4c   :  { %5882 = vmatmul.mubr.msk.bf16.gmra.mrb[24].mxu1 %vm319_vm1, %v6274_v45 }
  0x4d   :  { %5885 = vmatprep.mubr.msk.bf16.mxu1 %vm6904_vm2, %v6903_v16 }
  0x52   :  { %5212 = vmatmul.mubr.msk.bf16.gmra.mrb[28].mxu0 %vm319_vm1, %v7096_v29 }
  0x53   :  { %517 = vmatprep.mubr.bf16.mxu0 %v6902_v1 }
  0x54   :  { %5886 = vmatmul.mubr.msk.bf16.gmra.mrb[28].mxu1 %vm319_vm1, %v6275_v46 }
  0x55   :  { %5889 = vmatprep.mubr.msk.bf16.mxu1 %vm6904_vm2, %v6903_v16 }
  0x5a   :  { %5213 = vmatmul.mubr.msk.bf16.gmra.mrb[32].mxu0 %vm319_vm1, %v7104_v30 }
  0x5b   :  { %527 = vmatprep.mubr.bf16.mxu0 %v6902_v1 }
  0x5c   :  { %5890 = vmatmul.mubr.msk.bf16.gmra.mrb[32].mxu1 %vm319_vm1, %v7179_v40  ;;  %v6294_v40 = vld [vmem:[%s9063_s2 + $0x78] sm:$0xff]  }
  0x5d   :  { %5893 = vmatprep.mubr.msk.bf16.mxu1 %vm6904_vm2, %v6903_v16 }
  0x62   :  { %5214 = vmatmul.mubr.msk.bf16.gmra.mrb[36].mxu0 %vm319_vm1, %v7112_v31 }
  0x63   :  { %537 = vmatprep.mubr.bf16.mxu0 %v6902_v1 }
  0x64   :  { %5894 = vmatmul.mubr.msk.bf16.gmra.mrb[36].mxu1 %vm319_vm1, %v7195_v42 }
  0x65   :  { %5897 = vmatprep.mubr.msk.bf16.mxu1 %vm6904_vm2, %v6903_v16 }
  0x6a   :  { %5215 = vmatmul.mubr.msk.bf16.gmra.mrb[40].mxu0 %vm319_vm1, %v7120_v32 }
  0x6b   :  { %547 = vmatprep.mubr.bf16.mxu0 %v6902_v1 }
  0x6c   :  { %5898 = vmatmul.mubr.msk.bf16.gmra.mrb[40].mxu1 %vm319_vm1, %v7215_v44 }
  0x72   :  { %5216 = vmatmul.mubr.msk.bf16.gmra.mrb[44].mxu0 %vm319_vm1, %v7128_v33 }
  0x73   :  { %557 = vmatprep.mubr.bf16.mxu0 %v6902_v1 }
  0x7a   :  { %5217 = vmatmul.mubr.msk.bf16.gmra.mrb[48].mxu0 %vm319_vm1, %v7136_v34 }
  0x7b   :  { %567 = vmatprep.mubr.bf16.mxu0 %v6902_v1 }
  0x82   :  { %5218 = vmatmul.mubr.msk.bf16.gmra.mrb[52].mxu0 %vm319_vm1, %v7144_v35 }
  0x83   :  { %577 = vmatprep.mubr.bf16.mxu0 %v6902_v1 }
  0x8a   :  { %5219 = vmatmul.mubr.msk.bf16.gmra.mrb[56].mxu0 %vm319_vm1, %v7152_v36 }
  0x8b   :  { %587 = vmatprep.mubr.bf16.mxu0 %v6902_v1 }
  0x92   :  { %5220 = vmatmul.mubr.msk.bf16.gmra.mrb[60].mxu0 %vm319_vm1, %v7160_v37 }
  0x93   :  { %597 = vmatprep.mubr.bf16.mxu0 %v6902_v1 }
  0x9a   :  { %5221 = vmatmul.mubr.msk.bf16.gmra.mrb[64].mxu0 %vm319_vm1, %v7168_v38 }
  0x9b   :  { %607 = vmatprep.mubr.bf16.mxu0 %v6902_v1 }
  0xa2   :  { %5222 = vmatmul.mubr.msk.bf16.gmra.mrb[68].mxu0 %vm319_vm1, %v6270_v39 }
  0xa3   :  { %617 = vmatprep.mubr.bf16.mxu0 %v6902_v1 }
  0xaa   :  { %5223 = vmatmul.mubr.msk.bf16.gmra.mrb[72].mxu0 %vm319_vm1, %v6271_v41 }
  0xab   :  { %627 = vmatprep.mubr.bf16.mxu0 %v6902_v1 }
  0xb2   :  { %5224 = vmatmul.mubr.msk.bf16.gmra.mrb[76].mxu0 %vm319_vm1, %v6273_v43 }
  0xb3   :  { %637 = vmatprep.mubr.bf16.mxu0 %v6902_v1 }
  0xba   :  { %5225 = vmatmul.mubr.msk.bf16.gmra.mrb[80].mxu0 %vm319_vm1, %v6274_v45 }
  0xbb   :  { %647 = vmatprep.mubr.bf16.mxu0 %v6902_v1 }
  0xc2   :  { %5226 = vmatmul.mubr.msk.bf16.gmra.mrb[84].mxu0 %vm319_vm1, %v6275_v46 }
  0xc3   :  { %5801 = vmatprep.mubr.msk.bf16.mxu0 %vm6904_vm2, %v6903_v16 }
  0xca   :  { %5802 = vmatmul.mubr.msk.bf16.vlgmr.msra.gmra.mrb[88].mxu0 %vm319_vm1, %v6995_v14 }
  0xcb   :  { %1368 = vmatpush1.bf16.msra.mxu0 %v6276_v47  ;;  %5805 = vmatprep.mubr.msk.bf16.mxu0 %vm6904_vm2, %v6903_v16 }
  0xcc   :  { %1369 = vmatprep.subr.bf16.mxu0 %v6902_v1 }
  0xcf   :  { %1370 = vmatpush1.bf16.msra.mxu0 %v6277_v48 }
  0xd0   :  { %1371 = vmatprep.subr.bf16.mxu0 %v6902_v1 }
  0xd2   :  { %5806 = vmatmul.mubr.msk.bf16.gmra.mrb[92].mxu0 %vm319_vm1, %v7017_v18 }
  0xd3   :  { %5809 = vmatprep.mubr.msk.bf16.mxu0 %vm6904_vm2, %v6903_v16  ;;  %1372 = vmatpush1.bf16.msra.mxu0 %v6278_v49 }
  0xd4   :  { %1373 = vmatprep.subr.bf16.mxu0 %v6902_v1 }
  0xd7   :  { %1374 = vmatpush1.bf16.msra.mxu0 %v6279_v50 }
  0xd8   :  { %1375 = vmatprep.subr.bf16.mxu0 %v6902_v1 }
  0xda   :  { %5810 = vmatmul.mubr.msk.bf16.gmra.mrb[96].mxu0 %vm319_vm1, %v7039_v21 }
  0xdb   :  { %5813 = vmatprep.mubr.msk.bf16.mxu0 %vm6904_vm2, %v6903_v16  ;;  %1376 = vmatpush1.bf16.msra.mxu0 %v6280_v51 }
  0xdc   :  { %1377 = vmatprep.subr.bf16.mxu0 %v6902_v1 }
  0xdf   :  { %1378 = vmatpush1.bf16.msra.mxu0 %v6281_v52 }
  0xe0   :  { %1379 = vmatprep.subr.bf16.mxu0 %v6902_v1 }
  0xe2   :  { %5814 = vmatmul.mubr.msk.bf16.gmra.mrb[100].mxu0 %vm319_vm1, %v7062_v25 }
  0xe3   :  { %5817 = vmatprep.mubr.msk.bf16.mxu0 %vm6904_vm2, %v6903_v16  ;;  %1380 = vmatpush1.bf16.msra.mxu0 %v6282_v53 }
  0xe4   :  { %1381 = vmatprep.subr.bf16.mxu0 %v6902_v1 }
  0xe7   :  { %1382 = vmatpush1.bf16.msra.mxu0 %v6283_v54 }
  0xe8   :  { %1383 = vmatprep.subr.bf16.mxu0 %v6902_v1 }
  0xea   :  { %5818 = vmatmul.mubr.msk.bf16.gmra.mrb[104].mxu0 %vm319_vm1, %v7072_v26 }
  0xeb   :  { %5821 = vmatprep.mubr.msk.bf16.mxu0 %vm6904_vm2, %v6903_v16  ;;  %1384 = vmatpush1.bf16.msra.mxu0 %v6284_v55 }
  0xec   :  { %1385 = vmatprep.subr.bf16.mxu0 %v6902_v1 }
  0xed   :  { %v439_v57 = vpop.f32.mrb[0].mxu0 }
  0xee   :  { %v441_v58 = vpop.f32.mrb[1].mxu0  ;;  %v918_v61 = vmax.f32 %v439_v57, 0.0 }
  0xef   :  { %v443_v59 = vpop.f32.mrb[2].mxu0  ;;  %1386 = vmatpush1.bf16.msra.mxu0 %v6285_v56  ;;  %v919_v0 = vmax.f32 %v441_v58, 0.0 }
  0xf0   :  { %v921_v62 = vmax.f32 %v443_v59, 0.0  ;;  %v445_v63 = vpop.f32.mrb[3].mxu0  ;;  %1387 = vmatprep.subr.bf16.mxu0 %v6902_v1 }
  0xf1   :  { %v922_v2 = vmax.f32 %v445_v63, 0.0 }
  0xf2   :  { %v7321_v3 = vpack.c.bf16 %v921_v62, %v918_v61  ;;  %5822 = vmatmul.mubr.msk.bf16.gmra.mrb[108].mxu0 %vm319_vm1, %v7080_v27 }
  0xf3   :  { %5825 = vmatprep.mubr.msk.bf16.mxu0 %vm6904_vm2, %v6903_v16  ;;  %1388 = vmatpush1.bf16.msra.mxu0 %v6286_v60  ;;  %v7330_v5 = vpack.c.bf16 %v922_v2, %v919_v0 }
  0xf4   :  { %1389 = vmatprep.subr.bf16.mxu0 %v6902_v1 }
  0xf5   :  { %v449_v6 = vpop.f32.mrb[4].mxu0 }
  0xf6   :  { %v451_v7 = vpop.f32.mrb[5].mxu0  ;;  %v924_v10 = vmax.f32 %v449_v6, 0.0 }
  0xf7   :  { %v453_v8 = vpop.f32.mrb[6].mxu0  ;;  %1390 = vmatpush1.bf16.msra.mxu0 %v6288_v4  ;;  %v925_v13 = vmax.f32 %v451_v7, 0.0 }
  0xf8   :  { %v927_v11 = vmax.f32 %v453_v8, 0.0  ;;  %v455_v12 = vpop.f32.mrb[7].mxu0  ;;  %1391 = vmatprep.subr.bf16.mxu0 %v6902_v1 }
  0xf9   :  { %v928_v14 = vmax.f32 %v455_v12, 0.0 }
  0xfa   :  { %5826 = vmatmul.mubr.msk.bf16.gmra.mrb[112].mxu0 %vm319_vm1, %v7088_v28  ;;  %v7341_v15 = vpack.c.bf16 %v927_v11, %v924_v10 }
  0xfb   :  { %5829 = vmatprep.mubr.msk.bf16.mxu0 %vm6904_vm2, %v6903_v16  ;;  %1392 = vmatpush1.bf16.msra.mxu0 %v6290_v9  ;;  %v7348_v18 = vpack.c.bf16 %v928_v14, %v925_v13 }
  0xfc   :  { %1393 = vmatprep.subr.bf16.mxu0 %v6902_v1 }
  0xfd   :  { %v459_v19 = vpop.f32.mrb[8].mxu0 }
  0xfe   :  { %v461_v20 = vpop.f32.mrb[9].mxu0  ;;  %v930_v23 = vmax.f32 %v459_v19, 0.0 }
  0xff   :  { %v463_v21 = vpop.f32.mrb[10].mxu0  ;;  %1394 = vmatpush1.bf16.msra.mxu0 %v6292_v17  ;;  %v931_v26 = vmax.f32 %v461_v20, 0.0 }
 0x100   :  { %v933_v24 = vmax.f32 %v463_v21, 0.0  ;;  %v465_v25 = vpop.f32.mrb[11].mxu0  ;;  %1395 = vmatprep.subr.bf16.mxu0 %v6902_v1 }
 0x101   :  { %v934_v27 = vmax.f32 %v465_v25, 0.0 }
 0x102   :  { %v7355_v28 = vpack.c.bf16 %v933_v24, %v930_v23  ;;  %5830 = vmatmul.mubr.msk.bf16.gmra.mrb[116].mxu0 %vm319_vm1, %v7096_v29 }
 0x103   :  { %v7359_v39 = vpack.c.bf16 %v934_v27, %v931_v26  ;;  %5833 = vmatprep.mubr.msk.bf16.mxu0 %vm6904_vm2, %v6903_v16  ;;  %1396 = vmatpush1.bf16.msra.mxu0 %v6293_v22 }
 0x104   :  { %1397 = vmatprep.subr.bf16.mxu0 %v6902_v1 }
 0x105   :  { %v469_v41 = vpop.f32.mrb[12].mxu0 }
 0x106   :  { %v471_v42 = vpop.f32.mrb[13].mxu0  ;;  %v936_v44 = vmax.f32 %v469_v41, 0.0 }
 0x107   :  { %v473_v43 = vpop.f32.mrb[14].mxu0  ;;  %1398 = vmatpush1.bf16.msra.mxu0 %v6294_v40  ;;  %v937_v29 = vmax.f32 %v471_v42, 0.0 }
 0x108   :  { %v939_v45 = vmax.f32 %v473_v43, 0.0  ;;  %v475_v46 = vpop.f32.mrb[15].mxu0  ;;  %5901 = vmatprep.subr.bf16.mxu0 %v6903_v16 }
 0x109   :  { %v940_v47 = vmax.f32 %v475_v46, 0.0 }
 0x10a   :  { %v7368_v48 = vpack.c.bf16 %v939_v45, %v936_v44  ;;  %5834 = vmatmul.mubr.msk.bf16.gmra.mrb[120].mxu0 %vm319_vm1, %v7104_v30 }
 0x10b   :  { %v7372_v49 = vpack.c.bf16 %v940_v47, %v937_v29  ;;  %5837 = vmatprep.mubr.msk.bf16.mxu0 %vm6904_vm2, %v6903_v16 }
 0x10d   :  { %v479_v50 = vpop.f32.mrb[16].mxu0 }
 0x10e   :  { %v481_v51 = vpop.f32.mrb[17].mxu0  ;;  %v942_v53 = vmax.f32 %v479_v50, 0.0 }
 0x10f   :  { %v483_v52 = vpop.f32.mrb[18].mxu0  ;;  %v943_v56 = vmax.f32 %v481_v51, 0.0 }
 0x110   :  { %v945_v54 = vmax.f32 %v483_v52, 0.0  ;;  %v485_v55 = vpop.f32.mrb[19].mxu0 }
 0x111   :  { %v946_v57 = vmax.f32 %v485_v55, 0.0 }
 0x112   :  { %v7376_v58 = vpack.c.bf16 %v945_v54, %v942_v53  ;;  %5838 = vmatmul.mubr.msk.bf16.gmra.mrb[124].mxu0 %vm319_vm1, %v7112_v31 }
 0x113   :  { %v7380_v59 = vpack.c.bf16 %v946_v57, %v943_v56  ;;  %5841 = vmatprep.mubr.msk.bf16.mxu0 %vm6904_vm2, %v6903_v16 }
 0x115   :  { %v489_v30 = vpop.f32.mrb[20].mxu0 }
 0x116   :  { %v491_v60 = vpop.f32.mrb[21].mxu0  ;;  %v948_v62 = vmax.f32 %v489_v30, 0.0 }
 0x117   :  { %v493_v61 = vpop.f32.mrb[22].mxu0  ;;  %v949_v2 = vmax.f32 %v491_v60, 0.0 }
 0x118   :  { %v951_v63 = vmax.f32 %v493_v61, 0.0  ;;  %v495_v0 = vpop.f32.mrb[23].mxu0 }
 0x119   :  { %v952_v4 = vmax.f32 %v495_v0, 0.0 }
 0x11a   :  { %v7384_v6 = vpack.c.bf16 %v951_v63, %v948_v62  ;;  %5842 = vmatmul.mubr.msk.bf16.gmra.mrb[128].mxu0 %vm319_vm1, %v7120_v32 }
 0x11b   :  { %v7388_v7 = vpack.c.bf16 %v952_v4, %v949_v2  ;;  %5845 = vmatprep.mubr.msk.bf16.mxu0 %vm6904_vm2, %v6903_v16 }
 0x11d   :  { %v499_v31 = vpop.f32.mrb[24].mxu0 }
 0x11e   :  { %v501_v8 = vpop.f32.mrb[25].mxu0  ;;  %v954_v10 = vmax.f32 %v499_v31, 0.0 }
 0x11f   :  { %v503_v9 = vpop.f32.mrb[26].mxu0  ;;  %v955_v13 = vmax.f32 %v501_v8, 0.0 }
 0x120   :  { %v957_v11 = vmax.f32 %v503_v9, 0.0  ;;  %v505_v12 = vpop.f32.mrb[27].mxu0 }
 0x121   :  { %v958_v14 = vmax.f32 %v505_v12, 0.0 }
 0x122   :  { %v7392_v17 = vpack.c.bf16 %v957_v11, %v954_v10  ;;  %5846 = vmatmul.mubr.msk.bf16.gmra.mrb[132].mxu0 %vm319_vm1, %v7128_v33 }
 0x123   :  { %v7396_v19 = vpack.c.bf16 %v958_v14, %v955_v13  ;;  %5849 = vmatprep.mubr.msk.bf16.mxu0 %vm6904_vm2, %v6903_v16 }
 0x125   :  { %v509_v32 = vpop.f32.mrb[28].mxu0 }
 0x126   :  { %v511_v20 = vpop.f32.mrb[29].mxu0  ;;  %v960_v22 = vmax.f32 %v509_v32, 0.0 }
 0x127   :  { %v513_v21 = vpop.f32.mrb[30].mxu0  ;;  %v961_v25 = vmax.f32 %v511_v20, 0.0 }
 0x128   :  { %v963_v23 = vmax.f32 %v513_v21, 0.0  ;;  %v515_v24 = vpop.f32.mrb[31].mxu0 }
 0x129   :  { %v964_v26 = vmax.f32 %v515_v24, 0.0 }
 0x12a   :  { %v7400_v27 = vpack.c.bf16 %v963_v23, %v960_v22  ;;  %5850 = vmatmul.mubr.msk.bf16.gmra.mrb[136].mxu0 %vm319_vm1, %v7136_v34 }
 0x12b   :  { %v7404_v40 = vpack.c.bf16 %v964_v26, %v961_v25  ;;  %5853 = vmatprep.mubr.msk.bf16.mxu0 %vm6904_vm2, %v6903_v16  ;;  %v6295_v25 = vld [vmem:[%s9063_s2 + $0x80] sm:$0xff]  }
 0x12d   :  { %v519_v33 = vpop.f32.mrb[32].mxu0 }
 0x12e   :  { %v521_v41 = vpop.f32.mrb[33].mxu0  ;;  %v966_v43 = vmax.f32 %v519_v33, 0.0 }
 0x12f   :  { %v523_v42 = vpop.f32.mrb[34].mxu0  ;;  %v967_v46 = vmax.f32 %v521_v41, 0.0 }
 0x130   :  { %v969_v44 = vmax.f32 %v523_v42, 0.0  ;;  %v525_v45 = vpop.f32.mrb[35].mxu0 }
 0x131   :  { %v970_v29 = vmax.f32 %v525_v45, 0.0 }
 0x132   :  { %v7408_v47 = vpack.c.bf16 %v969_v44, %v966_v43  ;;  %5854 = vmatmul.mubr.msk.bf16.gmra.mrb[140].mxu0 %vm319_vm1, %v7144_v35 }
 0x133   :  { %v7412_v50 = vpack.c.bf16 %v970_v29, %v967_v46  ;;  %5857 = vmatprep.mubr.msk.bf16.mxu0 %vm6904_vm2, %v6903_v16 }
 0x135   :  { %v529_v34 = vpop.f32.mrb[36].mxu0 }
 0x136   :  { %v531_v51 = vpop.f32.mrb[37].mxu0  ;;  %v972_v53 = vmax.f32 %v529_v34, 0.0 }
 0x137   :  { %v533_v52 = vpop.f32.mrb[38].mxu0  ;;  %v973_v56 = vmax.f32 %v531_v51, 0.0 }
 0x138   :  { %v975_v54 = vmax.f32 %v533_v52, 0.0  ;;  %v535_v55 = vpop.f32.mrb[39].mxu0 }
 0x139   :  { %v976_v57 = vmax.f32 %v535_v55, 0.0 }
 0x13a   :  { %v7416_v30 = vpack.c.bf16 %v975_v54, %v972_v53  ;;  %5858 = vmatmul.mubr.msk.bf16.gmra.mrb[144].mxu0 %vm319_vm1, %v7152_v36 }
 0x13b   :  { %v7420_v60 = vpack.c.bf16 %v976_v57, %v973_v56  ;;  %5861 = vmatprep.mubr.msk.bf16.mxu0 %vm6904_vm2, %v6903_v16 }
 0x13d   :  { %v539_v35 = vpop.f32.mrb[40].mxu0 }
 0x13e   :  { %v541_v61 = vpop.f32.mrb[41].mxu0  ;;  %v978_v63 = vmax.f32 %v539_v35, 0.0 }
 0x13f   :  { %v543_v62 = vpop.f32.mrb[42].mxu0  ;;  %v979_v4 = vmax.f32 %v541_v61, 0.0 }
 0x140   :  { %v981_v0 = vmax.f32 %v543_v62, 0.0  ;;  %v545_v2 = vpop.f32.mrb[43].mxu0 }
 0x141   :  { %v982_v31 = vmax.f32 %v545_v2, 0.0 }
 0x142   :  { %v7424_v8 = vpack.c.bf16 %v981_v0, %v978_v63  ;;  %5862 = vmatmul.mubr.msk.bf16.gmra.mrb[148].mxu0 %vm319_vm1, %v7160_v37 }
 0x143   :  { %v7428_v9 = vpack.c.bf16 %v982_v31, %v979_v4  ;;  %5865 = vmatprep.mubr.msk.bf16.mxu0 %vm6904_vm2, %v6903_v16 }
 0x145   :  { %v549_v36 = vpop.f32.mrb[44].mxu0 }
 0x146   :  { %v551_v10 = vpop.f32.mrb[45].mxu0  ;;  %v984_v12 = vmax.f32 %v549_v36, 0.0 }
 0x147   :  { %v553_v11 = vpop.f32.mrb[46].mxu0  ;;  %v985_v32 = vmax.f32 %v551_v10, 0.0 }
 0x148   :  { %v987_v13 = vmax.f32 %v553_v11, 0.0  ;;  %v555_v14 = vpop.f32.mrb[47].mxu0 }
 0x149   :  { %v988_v20 = vmax.f32 %v555_v14, 0.0 }
 0x14a   :  { %v7432_v21 = vpack.c.bf16 %v987_v13, %v984_v12  ;;  %5866 = vmatmul.mubr.msk.bf16.gmra.mrb[152].mxu0 %vm319_vm1, %v7168_v38 }
 0x14b   :  { %v7436_v22 = vpack.c.bf16 %v988_v20, %v985_v32  ;;  %1399 = vmatprep.mubr.bf16.mxu0 %v7330_v5  ;;  %v6296_v5 = vld [vmem:[%s9063_s2 + $0x88] sm:$0xff]  }
 0x14d   :  { %v559_v37 = vpop.f32.mrb[48].mxu0 }
 0x14e   :  { %v561_v23 = vpop.f32.mrb[49].mxu0  ;;  %v990_v26 = vmax.f32 %v559_v37, 0.0 }
 0x14f   :  { %v563_v24 = vpop.f32.mrb[50].mxu0  ;;  %v991_v42 = vmax.f32 %v561_v23, 0.0 }
 0x150   :  { %v993_v33 = vmax.f32 %v563_v24, 0.0  ;;  %v565_v41 = vpop.f32.mrb[51].mxu0 }
 0x151   :  { %v994_v43 = vmax.f32 %v565_v41, 0.0 }
 0x152   :  { %v7442_v44 = vpack.c.bf16 %v993_v33, %v990_v26  ;;  %1400 = vmatmul.mubr.bf16.vlgmr.msra.gmra.mrb[156].mxu0 %v7321_v3 }
 0x153   :  { %v7445_v38 = vpack.c.bf16 %v994_v43, %v991_v42  ;;  %1407 = vmatprep.mubr.bf16.mxu0 %v7348_v18  ;;  %5902 = vmatpush3.bf16.msra.mxu0 %v6295_v25  ;;  %v659_v43 = vpop.f32.mrb[0].mxu1 }
 0x154   :  { %5903 = vmatprep.subr.bf16.mxu0 %v6903_v16 }
 0x155   :  { %v569_v45 = vpop.f32.mrb[52].mxu0 }
 0x156   :  { %v571_v46 = vpop.f32.mrb[53].mxu0  ;;  %v996_v34 = vmax.f32 %v569_v45, 0.0 }
 0x157   :  { %v573_v29 = vpop.f32.mrb[54].mxu0  ;;  %5904 = vmatpush3.bf16.msra.mxu0 %v6296_v5  ;;  %v997_v53 = vmax.f32 %v571_v46, 0.0  ;;  %v661_v5 = vpop.f32.mrb[1].mxu1 }
 0x158   :  { %v999_v51 = vmax.f32 %v573_v29, 0.0  ;;  %v575_v52 = vpop.f32.mrb[55].mxu0 }
 0x159   :  { %v1000_v3 = vmax.f32 %v575_v52, 0.0 }
 0x15a   :  { %v7452_v54 = vpack.c.bf16 %v999_v51, %v996_v34  ;;  %1408 = vmatmul.mubr.bf16.gmra.mrb[160].mxu0 %v7341_v15  ;;  %v1050_v34 = vmax.f32 %v659_v43, 0.0  ;;  %v663_v51 = vpop.f32.mrb[2].mxu1 }
 0x15b   :  { %v7455_v18 = vpack.c.bf16 %v1000_v3, %v997_v53  ;;  %1415 = vmatprep.mubr.bf16.mxu0 %v7359_v39  ;;  %v665_v3 = vpop.f32.mrb[3].mxu1 }
 0x15d   :  { %v579_v55 = vpop.f32.mrb[56].mxu0 }
 0x15e   :  { %v581_v56 = vpop.f32.mrb[57].mxu0  ;;  %v1002_v35 = vmax.f32 %v579_v55, 0.0 }
 0x15f   :  { %v583_v57 = vpop.f32.mrb[58].mxu0  ;;  %v1003_v63 = vmax.f32 %v581_v56, 0.0  ;;  %v1053_v56 = vmax.f32 %v663_v51, 0.0 }
 0x160   :  { %v1005_v61 = vmax.f32 %v583_v57, 0.0  ;;  %v585_v62 = vpop.f32.mrb[59].mxu0 }
 0x161   :  { %v1006_v0 = vmax.f32 %v585_v62, 0.0 }
 0x162   :  { %v7458_v2 = vpack.c.bf16 %v1005_v61, %v1002_v35  ;;  %1416 = vmatmul.mubr.bf16.gmra.mrb[164].mxu0 %v7355_v28  ;;  %v7482_v35 = vpack.c.bf16 %v1053_v56, %v1050_v34 }
 0x163   :  { %v7461_v4 = vpack.c.bf16 %v1006_v0, %v1003_v63  ;;  %1423 = vmatprep.mubr.bf16.mxu0 %v7372_v49  ;;  %v669_v0 = vpop.f32.mrb[4].mxu1 }
 0x165   :  { %v589_v15 = vpop.f32.mrb[60].mxu0 }
 0x166   :  { %v591_v31 = vpop.f32.mrb[61].mxu0  ;;  %v1008_v39 = vmax.f32 %v589_v15, 0.0 }
 0x167   :  { %v593_v36 = vpop.f32.mrb[62].mxu0  ;;  %v1009_v12 = vmax.f32 %v591_v31, 0.0  ;;  %v671_v31 = vpop.f32.mrb[5].mxu1 }
 0x168   :  { %v1011_v10 = vmax.f32 %v593_v36, 0.0  ;;  %v595_v11 = vpop.f32.mrb[63].mxu0 }
 0x169   :  { %v1012_v13 = vmax.f32 %v595_v11, 0.0  ;;  %v673_v11 = vpop.f32.mrb[6].mxu1 }
 0x16a   :  { %v7464_v14 = vpack.c.bf16 %v1011_v10, %v1008_v39  ;;  %1424 = vmatmul.mubr.bf16.gmra.mrb[168].mxu0 %v7368_v48 }
 0x16b   :  { %v7467_v32 = vpack.c.bf16 %v1012_v13, %v1009_v12  ;;  %1431 = vmatprep.mubr.bf16.mxu0 %v7380_v59 }
 0x16d   :  { %v599_v28 = vpop.f32.mrb[64].mxu0 }
 0x16e   :  { %v601_v20 = vpop.f32.mrb[65].mxu0  ;;  %v1014_v49 = vmax.f32 %v599_v28, 0.0  ;;  %v675_v28 = vpop.f32.mrb[7].mxu1 }
 0x16f   :  { %v603_v37 = vpop.f32.mrb[66].mxu0  ;;  %v1015_v25 = vmax.f32 %v601_v20, 0.0 }
 0x170   :  { %v1017_v23 = vmax.f32 %v603_v37, 0.0  ;;  %v605_v24 = vpop.f32.mrb[67].mxu0  ;;  %v1059_v37 = vmax.f32 %v673_v11, 0.0 }
 0x171   :  { %v1018_v26 = vmax.f32 %v605_v24, 0.0 }
 0x172   :  { %v7470_v33 = vpack.c.bf16 %v1017_v23, %v1014_v49  ;;  %1432 = vmatmul.mubr.bf16.gmra.mrb[172].mxu0 %v7376_v58  ;;  %v1051_v58 = vmax.f32 %v661_v5, 0.0  ;;  %v1060_v49 = vmax.f32 %v675_v28, 0.0 }
 0x173   :  { %v7473_v41 = vpack.c.bf16 %v1018_v26, %v1015_v25  ;;  %1439 = vmatprep.mubr.bf16.mxu0 %v7388_v7  ;;  %v1054_v7 = vmax.f32 %v665_v3, 0.0 }
 0x175   :  { %v609_v48 = vpop.f32.mrb[68].mxu0  ;;  %v7484_v61 = vpack.c.bf16 %v1054_v7, %v1051_v58 }
 0x176   :  { %v611_v42 = vpop.f32.mrb[69].mxu0  ;;  %v1020_v45 = vmax.f32 %v609_v48, 0.0 }
 0x177   :  { %v613_v59 = vpop.f32.mrb[70].mxu0  ;;  %v1021_v52 = vmax.f32 %v611_v42, 0.0 }
 0x178   :  { %v1023_v46 = vmax.f32 %v613_v59, 0.0  ;;  %v615_v29 = vpop.f32.mrb[71].mxu0 }
 0x179   :  { %v1024_v53 = vmax.f32 %v615_v29, 0.0 }
 0x17a   :  { %v7476_v55 = vpack.c.bf16 %v1023_v46, %v1020_v45  ;;  %1440 = vmatmul.mubr.bf16.gmra.mrb[176].mxu0 %v7384_v6  ;;  %v1056_v6 = vmax.f32 %v669_v0, 0.0  ;;  %v7496_v45 = vpop.f32.mrb[8].mxu1 }
 0x17b   :  { %v7479_v57 = vpack.c.bf16 %v1024_v53, %v1021_v52  ;;  %1447 = vmatprep.mubr.bf16.mxu0 %v7396_v19  ;;  %v1057_v19 = vmax.f32 %v671_v31, 0.0  ;;  %v7498_v29 = vpop.f32.mrb[9].mxu1 }
 0x17c   :  { %v7492_v24 = vpack.c.bf16 %v1059_v37, %v1056_v6 }
 0x17d   :  { %v619_v62 = vpop.f32.mrb[72].mxu0  ;;  %v7494_v25 = vpack.c.bf16 %v1060_v49, %v1057_v19 }
 0x17e   :  { %v621_v63 = vpop.f32.mrb[73].mxu0  ;;  %v1026_v36 = vmax.f32 %v619_v62, 0.0 }
 0x17f   :  { %v623_v15 = vpop.f32.mrb[74].mxu0  ;;  %v1027_v12 = vmax.f32 %v621_v63, 0.0 }
 0x180   :  { %v1029_v39 = vmax.f32 %v623_v15, 0.0  ;;  %v625_v10 = vpop.f32.mrb[75].mxu0 }
 0x181   :  { %v1030_v13 = vmax.f32 %v625_v10, 0.0 }
 0x182   :  { %v7486_v20 = vpack.c.bf16 %v1029_v39, %v1026_v36  ;;  %1448 = vmatmul.mubr.bf16.gmra.mrb[180].mxu0 %v7392_v17 }
 0x183   :  { %v7489_v23 = vpack.c.bf16 %v1030_v13, %v1027_v12  ;;  %1455 = vmatprep.mubr.bf16.mxu0 %v7404_v40  ;;  %v683_v40 = vpop.f32.mrb[10].mxu1 }
 0x184   :  { %v684_v52 = vpop.f32.mrb[11].mxu1 }
 0x185   :  { %v629_v26 = vpop.f32.mrb[76].mxu0 }
 0x186   :  { %v631_v48 = vpop.f32.mrb[77].mxu0  ;;  %v1032_v43 = vmax.f32 %v629_v26, 0.0 }
 0x187   :  { %v633_v42 = vpop.f32.mrb[78].mxu0  ;;  %v1033_v17 = vmax.f32 %v631_v48, 0.0 }
 0x188   :  { %v1035_v59 = vmax.f32 %v633_v42, 0.0  ;;  %v635_v5 = vpop.f32.mrb[79].mxu0 }
 0x189   :  { %v1036_v46 = vmax.f32 %v635_v5, 0.0 }
 0x18a   :  { %v7500_v34 = vpack.c.bf16 %v1035_v59, %v1032_v43  ;;  %1456 = vmatmul.mubr.bf16.gmra.mrb[184].mxu0 %v7400_v27 }
 0x18b   :  { %v7503_v51 = vpack.c.bf16 %v1036_v46, %v1033_v17  ;;  %1463 = vmatprep.mubr.bf16.mxu0 %v7412_v50 }
 0x18d   :  { %v639_v53 = vpop.f32.mrb[80].mxu0 }
 0x18e   :  { %v641_v3 = vpop.f32.mrb[81].mxu0  ;;  %v1038_v56 = vmax.f32 %v639_v53, 0.0 }
 0x18f   :  { %v643_v58 = vpop.f32.mrb[82].mxu0  ;;  %v1039_v63 = vmax.f32 %v641_v3, 0.0 }
 0x190   :  { %v1041_v7 = vmax.f32 %v643_v58, 0.0  ;;  %v645_v62 = vpop.f32.mrb[83].mxu0 }
 0x191   :  { %v1042_v0 = vmax.f32 %v645_v62, 0.0 }
 0x192   :  { %v7506_v15 = vpack.c.bf16 %v1041_v7, %v1038_v56  ;;  %1464 = vmatmul.mubr.bf16.gmra.mrb[188].mxu0 %v7408_v47 }
 0x193   :  { %v7509_v31 = vpack.c.bf16 %v1042_v0, %v1039_v63  ;;  %1471 = vmatprep.mubr.bf16.mxu0 %v7420_v60 }
 0x195   :  { %v649_v27 = vpop.f32.mrb[84].mxu0 }
 0x196   :  { %v651_v36 = vpop.f32.mrb[85].mxu0  ;;  %v1044_v39 = vmax.f32 %v649_v27, 0.0 }
 0x197   :  { %v653_v50 = vpop.f32.mrb[86].mxu0  ;;  %v1045_v11 = vmax.f32 %v651_v36, 0.0 }
 0x198   :  { %v1047_v10 = vmax.f32 %v653_v50, 0.0  ;;  %v655_v6 = vpop.f32.mrb[87].mxu0 }
 0x199   :  { %v1048_v12 = vmax.f32 %v655_v6, 0.0 }
 0x19a   :  { %v7512_v13 = vpack.c.bf16 %v1047_v10, %v1044_v39  ;;  %1472 = vmatmul.mubr.bf16.gmra.mrb[192].mxu0 %v7416_v30 }
 0x19b   :  { %v7515_v28 = vpack.c.bf16 %v1048_v12, %v1045_v11  ;;  %1479 = vmatprep.mubr.bf16.mxu0 %v7428_v9 }
 0x19d   :  { %v720_v47 = vpop.f32.mrb[88].mxu0 }
 0x19e   :  { %v5803_v19 = vpop.f32.mrb[89].mxu0  ;;  %v920_v60 = vmax.f32 %v720_v47, 0.0 }
 0x19f   :  { %v723_v37 = vpop.f32.mrb[90].mxu0 }
 0x1a0   :  { %v923_v49 = vmax.f32 %v723_v37, 0.0  ;;  %v5804_v26 = vpop.f32.mrb[91].mxu0 }
 0x1a2   :  { %v7518_v48 = vpack.c.bf16 %v923_v49, %v920_v60  ;;  %1480 = vmatmul.mubr.bf16.gmra.mrb[196].mxu0 %v7424_v8 }
 0x1a3   :  { %1487 = vmatprep.mubr.bf16.mxu0 %v7436_v22 }
 0x1a5   :  { %v728_v42 = vpop.f32.mrb[92].mxu0 }
 0x1a6   :  { %v5807_v43 = vpop.f32.mrb[93].mxu0  ;;  %v926_v30 = vmax.f32 %v728_v42, 0.0 }
 0x1a7   :  { %v731_v59 = vpop.f32.mrb[94].mxu0 }
 0x1a8   :  { %v929_v5 = vmax.f32 %v731_v59, 0.0  ;;  %v5808_v17 = vpop.f32.mrb[95].mxu0 }
 0x1aa   :  { %v7522_v46 = vpack.c.bf16 %v929_v5, %v926_v30  ;;  %1488 = vmatmul.mubr.bf16.gmra.mrb[200].mxu0 %v7432_v21 }
 0x1ab   :  { %1495 = vmatprep.mubr.bf16.mxu0 %v7445_v38 }
 0x1ad   :  { %v736_v9 = vpop.f32.mrb[96].mxu0 }
 0x1ae   :  { %v5811_v40 = vpop.f32.mrb[97].mxu0  ;;  %v932_v53 = vmax.f32 %v736_v9, 0.0 }
 0x1af   :  { %v739_v52 = vpop.f32.mrb[98].mxu0 }
 0x1b0   :  { %v935_v3 = vmax.f32 %v739_v52, 0.0  ;;  %v5812_v8 = vpop.f32.mrb[99].mxu0 }
 0x1b2   :  { %v7526_v58 = vpack.c.bf16 %v935_v3, %v932_v53  ;;  %1496 = vmatmul.mubr.bf16.gmra.mrb[204].mxu0 %v7442_v44 }
 0x1b3   :  { %1503 = vmatprep.mubr.bf16.mxu0 %v7455_v18 }
 0x1b5   :  { %v744_v22 = vpop.f32.mrb[100].mxu0 }
 0x1b6   :  { %v5815_v56 = vpop.f32.mrb[101].mxu0  ;;  %v938_v62 = vmax.f32 %v744_v22, 0.0 }
 0x1b7   :  { %v747_v7 = vpop.f32.mrb[102].mxu0 }
 0x1b8   :  { %v941_v63 = vmax.f32 %v747_v7, 0.0  ;;  %v5816_v21 = vpop.f32.mrb[103].mxu0 }
 0x1ba   :  { %v7530_v0 = vpack.c.bf16 %v941_v63, %v938_v62  ;;  %1504 = vmatmul.mubr.bf16.gmra.mrb[208].mxu0 %v7452_v54 }
 0x1bb   :  { %1511 = vmatprep.mubr.bf16.mxu0 %v7461_v4 }
 0x1bd   :  { %v752_v38 = vpop.f32.mrb[104].mxu0 }
 0x1be   :  { %v5819_v27 = vpop.f32.mrb[105].mxu0  ;;  %v944_v50 = vmax.f32 %v752_v38, 0.0 }
 0x1bf   :  { %v755_v36 = vpop.f32.mrb[106].mxu0 }
 0x1c0   :  { %v947_v39 = vmax.f32 %v755_v36, 0.0  ;;  %v5820_v44 = vpop.f32.mrb[107].mxu0 }
 0x1c2   :  { %v7534_v10 = vpack.c.bf16 %v947_v39, %v944_v50  ;;  %1512 = vmatmul.mubr.bf16.gmra.mrb[212].mxu0 %v7458_v2 }
 0x1c3   :  { %1519 = vmatprep.mubr.bf16.mxu0 %v7467_v32 }
 0x1c5   :  { %v760_v18 = vpop.f32.mrb[108].mxu0 }
 0x1c6   :  { %v5823_v6 = vpop.f32.mrb[109].mxu0  ;;  %v950_v12 = vmax.f32 %v760_v18, 0.0 }
 0x1c7   :  { %v763_v11 = vpop.f32.mrb[110].mxu0 }
 0x1c8   :  { %v953_v47 = vmax.f32 %v763_v11, 0.0  ;;  %v5824_v54 = vpop.f32.mrb[111].mxu0 }
 0x1ca   :  { %v7538_v19 = vpack.c.bf16 %v953_v47, %v950_v12  ;;  %1520 = vmatmul.mubr.bf16.gmra.mrb[216].mxu0 %v7464_v14 }
 0x1cb   :  { %1527 = vmatprep.mubr.bf16.mxu0 %v7473_v41 }
 0x1cd   :  { %v768_v4 = vpop.f32.mrb[112].mxu0 }
 0x1ce   :  { %v5827_v37 = vpop.f32.mrb[113].mxu0  ;;  %v956_v49 = vmax.f32 %v768_v4, 0.0 }
 0x1cf   :  { %v771_v60 = vpop.f32.mrb[114].mxu0 }
 0x1d0   :  { %v959_v26 = vmax.f32 %v771_v60, 0.0  ;;  %v5828_v2 = vpop.f32.mrb[115].mxu0 }
 0x1d2   :  { %v7542_v42 = vpack.c.bf16 %v959_v26, %v956_v49  ;;  %1528 = vmatmul.mubr.bf16.gmra.mrb[220].mxu0 %v7470_v33 }
 0x1d3   :  { %1535 = vmatprep.mubr.bf16.mxu0 %v7479_v57 }
 0x1d5   :  { %v776_v32 = vpop.f32.mrb[116].mxu0 }
 0x1d6   :  { %v5831_v43 = vpop.f32.mrb[117].mxu0  ;;  %v962_v30 = vmax.f32 %v776_v32, 0.0 }
 0x1d7   :  { %v779_v59 = vpop.f32.mrb[118].mxu0  ;;  %v1062_v43 = vmax.f32 %v7496_v45, 0.0 }
 0x1d8   :  { %v965_v5 = vmax.f32 %v779_v59, 0.0  ;;  %v5832_v14 = vpop.f32.mrb[119].mxu0 }
 0x1da   :  { %v7546_v17 = vpack.c.bf16 %v965_v5, %v962_v30  ;;  %1536 = vmatmul.mubr.bf16.gmra.mrb[224].mxu0 %v7476_v55 }
 0x1db   :  { %1543 = vmatprep.mubr.bf16.mxu0 %v7489_v23 }
 0x1dd   :  { %v784_v41 = vpop.f32.mrb[120].mxu0 }
 0x1de   :  { %v5835_v9 = vpop.f32.mrb[121].mxu0  ;;  %v968_v52 = vmax.f32 %v784_v41, 0.0 }
 0x1df   :  { %v787_v40 = vpop.f32.mrb[122].mxu0 }
 0x1e0   :  { %v971_v53 = vmax.f32 %v787_v40, 0.0  ;;  %v5836_v33 = vpop.f32.mrb[123].mxu0 }
 0x1e2   :  { %v7550_v3 = vpack.c.bf16 %v971_v53, %v968_v52  ;;  %1544 = vmatmul.mubr.bf16.gmra.mrb[228].mxu0 %v7486_v20 }
 0x1e3   :  { %1551 = vmatprep.mubr.bf16.mxu0 %v7503_v51 }
 0x1e5   :  { %v792_v57 = vpop.f32.mrb[124].mxu0 }
 0x1e6   :  { %v5839_v8 = vpop.f32.mrb[125].mxu0  ;;  %v974_v56 = vmax.f32 %v792_v57, 0.0  ;;  %v856_v57 = vpop.f32.mrb[12].mxu1 }
 0x1e7   :  { %v795_v22 = vpop.f32.mrb[126].mxu0  ;;  %v1022_v8 = vmax.f32 %v856_v57, 0.0 }
 0x1e8   :  { %v977_v7 = vmax.f32 %v795_v22, 0.0  ;;  %v5840_v55 = vpop.f32.mrb[127].mxu0  ;;  %v5871_v22 = vpop.f32.mrb[13].mxu1 }
 0x1ea   :  { %v7554_v62 = vpack.c.bf16 %v977_v7, %v974_v56  ;;  %1552 = vmatmul.mubr.bf16.gmra.mrb[232].mxu0 %v7500_v34  ;;  %v859_v56 = vpop.f32.mrb[14].mxu1 }
 0x1eb   :  { %1559 = vmatprep.mubr.bf16.mxu0 %v7509_v31  ;;  %v1025_v55 = vmax.f32 %v859_v56, 0.0 }
 0x1ed   :  { %v800_v23 = vpop.f32.mrb[128].mxu0 }
 0x1ee   :  { %v5843_v63 = vpop.f32.mrb[129].mxu0  ;;  %v980_v38 = vmax.f32 %v800_v23, 0.0  ;;  %v5872_v23 = vpop.f32.mrb[15].mxu1 }
 0x1ef   :  { %v803_v21 = vpop.f32.mrb[130].mxu0 }
 0x1f0   :  { %v983_v27 = vmax.f32 %v803_v21, 0.0  ;;  %v5844_v20 = vpop.f32.mrb[131].mxu0 }
 0x1f2   :  { %v7558_v36 = vpack.c.bf16 %v983_v27, %v980_v38  ;;  %1560 = vmatmul.mubr.bf16.gmra.mrb[236].mxu0 %v7506_v15  ;;  %v7585_v38 = vpack.c.bf16 %v1025_v55, %v1022_v8 }
 0x1f3   :  { %1567 = vmatprep.mubr.bf16.mxu0 %v7515_v28  ;;  %v1063_v28 = vmax.f32 %v7498_v29, 0.0 }
 0x1f5   :  { %v808_v51 = vpop.f32.mrb[132].mxu0 }
 0x1f6   :  { %v5847_v50 = vpop.f32.mrb[133].mxu0  ;;  %v986_v44 = vmax.f32 %v808_v51, 0.0 }
 0x1f7   :  { %v811_v39 = vpop.f32.mrb[134].mxu0 }
 0x1f8   :  { %v989_v18 = vmax.f32 %v811_v39, 0.0  ;;  %v5848_v34 = vpop.f32.mrb[135].mxu0 }
 0x1fa   :  { %v7562_v6 = vpack.c.bf16 %v989_v18, %v986_v44  ;;  %1568 = vmatmul.mubr.bf16.gmra.mrb[240].mxu0 %v7512_v13  ;;  %v1138_v13 = vpack.c.bf16 %v1063_v28, %v1063_v28 }
 0x1fb   :  { %1575 = vmatprep.mubr.bf16.mxu0 %v7484_v61 }
 0x1fd   :  { %v816_v31 = vpop.f32.mrb[136].mxu0 }
 0x1fe   :  { %v5851_v11 = vpop.f32.mrb[137].mxu0  ;;  %v992_v47 = vmax.f32 %v816_v31, 0.0 }
 0x1ff   :  { %v819_v12 = vpop.f32.mrb[138].mxu0 }
 0x200   :  { %v995_v54 = vmax.f32 %v819_v12, 0.0  ;;  %v5852_v15 = vpop.f32.mrb[139].mxu0 }
 0x202   :  { %v7566_v4 = vpack.c.bf16 %v995_v54, %v992_v47  ;;  %1576 = vmatmul.mubr.bf16.gmra.mrb[244].mxu0 %v7482_v35 }
 0x203   :  { %1583 = vmatprep.mubr.bf16.mxu0 %v7494_v25  ;;  %v1137_v25 = vpack.c.bf16 %v1062_v43, %v1062_v43 }
 0x205   :  { %v824_v37 = vpop.f32.mrb[140].mxu0 }
 0x206   :  { %v5855_v60 = vpop.f32.mrb[141].mxu0  ;;  %v998_v26 = vmax.f32 %v824_v37, 0.0 }
 0x207   :  { %v827_v49 = vpop.f32.mrb[142].mxu0 }
 0x208   :  { %v1001_v61 = vmax.f32 %v827_v49, 0.0  ;;  %v5856_v2 = vpop.f32.mrb[143].mxu0 }
 0x20a   :  { %v7571_v32 = vpack.c.bf16 %v1001_v61, %v998_v26  ;;  %1584 = vmatmul.mubr.bf16.gmra.mrb[248].mxu0 %v7492_v24 }
 0x20b   :  { %1591 = vmatprep.mubr.bf16.mxu0 %v1138_v13 }
 0x20d   :  { %v832_v59 = vpop.f32.mrb[144].mxu0 }
 0x20e   :  { %v5859_v35 = vpop.f32.mrb[145].mxu0  ;;  %v1004_v5 = vmax.f32 %v832_v59, 0.0 }
 0x20f   :  { %v835_v30 = vpop.f32.mrb[146].mxu0 }
 0x210   :  { %v1007_v29 = vmax.f32 %v835_v30, 0.0  ;;  %v5860_v14 = vpop.f32.mrb[147].mxu0 }
 0x212   :  { %v7575_v41 = vpack.c.bf16 %v1007_v29, %v1004_v5  ;;  %1592 = vmatmul.mubr.bf16.gmra.mrb[252].mxu0 %v1137_v25 }
 0x213   :  { %5905 = vmatprep.mubr.msk.bf16.mxu0 %vm6904_vm2, %v6903_v16 }
 0x215   :  { %v840_v9 = vpop.f32.mrb[148].mxu0 }
 0x216   :  { %v5863_v40 = vpop.f32.mrb[149].mxu0  ;;  %v1010_v24 = vmax.f32 %v840_v9, 0.0 }
 0x217   :  { %v843_v52 = vpop.f32.mrb[150].mxu0 }
 0x218   :  { %v1013_v53 = vmax.f32 %v843_v52, 0.0  ;;  %v5864_v45 = vpop.f32.mrb[151].mxu0 }
 0x21a   :  { %v7579_v33 = vpack.c.bf16 %v1013_v53, %v1010_v24  ;;  %5906 = vmatmul.mubr.msk.bf16.vlgmr.msra.gmra.mrb[156].mxu0 %vm1291_vm3, %v7518_v48  ;;  %v864_v48 = vpop.f32.mrb[16].mxu1 }
 0x21b   :  { %5909 = vmatprep.mubr.msk.bf16.mxu0 %vm6904_vm2, %v6903_v16  ;;  %v1028_v39 = vmax.f32 %v864_v48, 0.0  ;;  %v5875_v44 = vpop.f32.mrb[17].mxu1  ;;  %v6318_v48 = vld [vmem:[%s9064_s4 + $0x170] ss:$8 sps:$4 sm:$0xff]  }
 0x21c   :  { %v867_v18 = vpop.f32.mrb[18].mxu1  ;;  %v6321_v44 = vld [vmem:[%s9064_s4 + $0x180] ss:$8 sps:$4 sm:$0xff]  }
 0x21d   :  { %v848_v7 = vpop.f32.mrb[152].mxu0  ;;  %v1031_v34 = vmax.f32 %v867_v18, 0.0  ;;  %v5876_v31 = vpop.f32.mrb[19].mxu1  ;;  %v6323_v18 = vld [vmem:[%s9064_s4 + $0x184] ss:$8 sps:$4 sm:$0xff]  }
 0x21e   :  { %v5867_v63 = vpop.f32.mrb[153].mxu0  ;;  %v1016_v27 = vmax.f32 %v848_v7, 0.0  ;;  %v872_v12 = vpop.f32.mrb[20].mxu1 }
 0x21f   :  { %v851_v21 = vpop.f32.mrb[154].mxu0  ;;  %v7593_v11 = vpack.c.bf16 %v1031_v34, %v1028_v39  ;;  %v1034_v47 = vmax.f32 %v872_v12, 0.0  ;;  %v6306_v63 = vld [vmem:[%s9064_s4 + $0x130] ss:$8 sps:$4 sm:$0xff]   ;;  %v7733_v39 = vld [vmem:[%s9065_s3] ss:$0 sm:$0xff] }
 0x220   :  { %v1019_v20 = vmax.f32 %v851_v21, 0.0  ;;  %v5868_v51 = vpop.f32.mrb[155].mxu0  ;;  %v6309_v21 = vld [vmem:[%s9064_s4 + $0x140] ss:$8 sps:$4 sm:$0xff]   ;;  %v6326_v12 = vld [vmem:[%s9064_s4 + $0x194] ss:$8 sps:$4 sm:$0xff]  }
 0x221   :  { %v6317_v51 = vld [vmem:[%s9064_s4 + $0x164] ss:$8 sps:$4 sm:$0xff]  }
 0x222   :  { %v7587_v50 = vpack.c.bf16 %v1019_v20, %v1016_v27  ;;  %5910 = vmatmul.mubr.msk.bf16.gmra.mrb[160].mxu0 %vm1291_vm3, %v7522_v46  ;;  %v5879_v46 = vpop.f32.mrb[21].mxu1  ;;  %v6312_v27 = vld [vmem:[%s9064_s4 + $0x150] ss:$8 sps:$4 sm:$0xff]   ;;  %v6315_v20 = vld [vmem:[%s9064_s4 + $0x160] ss:$8 sps:$4 sm:$0xff]  }
 0x223   :  { %5913 = vmatprep.mubr.msk.bf16.mxu0 %vm6904_vm2, %v6903_v16  ;;  %v875_v54 = vpop.f32.mrb[22].mxu1  ;;  %v6324_v46 = vld [vmem:[%s9064_s4 + $0x190] ss:$8 sps:$4 sm:$0xff]  }
 0x224   :  { %v1037_v15 = vmax.f32 %v875_v54, 0.0  ;;  %v5880_v28 = vpop.f32.mrb[23].mxu1 }
 0x225   :  { %v880_v60 = vpop.f32.mrb[24].mxu1  ;;  %v6327_v28 = vld [vmem:[%s9064_s4 + $0x1a0] ss:$8 sps:$4 sm:$0xff]  }
 0x226   :  { %v7599_v37 = vpack.c.bf16 %v1037_v15, %v1034_v47  ;;  %v1040_v49 = vmax.f32 %v880_v60, 0.0 }
 0x22a   :  { %5914 = vmatmul.mubr.msk.bf16.gmra.mrb[164].mxu0 %vm1291_vm3, %v7526_v58  ;;  %v5883_v58 = vpop.f32.mrb[25].mxu1 }
 0x22b   :  { %5917 = vmatprep.mubr.msk.bf16.mxu0 %vm6904_vm2, %v6903_v16  ;;  %v883_v13 = vpop.f32.mrb[26].mxu1 }
 0x22c   :  { %v1043_v26 = vmax.f32 %v883_v13, 0.0  ;;  %v5884_v61 = vpop.f32.mrb[27].mxu1  ;;  %v6332_v13 = vld [vmem:[%s9064_s4 + $0x1b4] ss:$8 sps:$4 sm:$0xff]  }
 0x22d   :  { %v888_v43 = vpop.f32.mrb[28].mxu1  ;;  %v6330_v61 = vld [vmem:[%s9064_s4 + $0x1b0] ss:$8 sps:$4 sm:$0xff]  }
 0x22e   :  { %v1127_v2 = vpack.c.bf16 %v1043_v26, %v1040_v49  ;;  %v1046_v59 = vmax.f32 %v888_v43, 0.0  ;;  %v5887_v35 = vpop.f32.mrb[29].mxu1 }
 0x22f   :  { %v6335_v35 = vld [vmem:[%s9064_s4 + $0x1c4] ss:$8 sps:$4 sm:$0xff]  }
 0x232   :  { %5918 = vmatmul.mubr.msk.bf16.gmra.mrb[168].mxu0 %vm1291_vm3, %v7530_v0  ;;  %v891_v0 = vpop.f32.mrb[30].mxu1 }
 0x233   :  { %5921 = vmatprep.mubr.msk.bf16.mxu0 %vm6904_vm2, %v6903_v16  ;;  %v1049_v30 = vmax.f32 %v891_v0, 0.0  ;;  %v5888_v25 = vpop.f32.mrb[31].mxu1 }
 0x234   :  { %v896_v29 = vpop.f32.mrb[32].mxu1 }
 0x235   :  { %v1130_v5 = vpack.c.bf16 %v1049_v30, %v1046_v59  ;;  %v1052_v14 = vmax.f32 %v896_v29, 0.0  ;;  %v5891_v9 = vpop.f32.mrb[33].mxu1  ;;  %v6333_v59 = vld [vmem:[%s9064_s4 + $0x1c0] ss:$8 sps:$4 sm:$0xff]  }
 0x23a   :  { %5922 = vmatmul.mubr.msk.bf16.gmra.mrb[172].mxu0 %vm1291_vm3, %v7534_v10  ;;  %v899_v10 = vpop.f32.mrb[34].mxu1 }
 0x23b   :  { %5925 = vmatprep.mubr.msk.bf16.mxu0 %vm6904_vm2, %v6903_v16  ;;  %v1055_v40 = vmax.f32 %v899_v10, 0.0  ;;  %v5892_v52 = vpop.f32.mrb[35].mxu1 }
 0x23c   :  { %v904_v53 = vpop.f32.mrb[36].mxu1  ;;  %v6339_v52 = vld [vmem:[%s9064_s4 + $0x1e0] ss:$8 sps:$4 sm:$0xff]  }
 0x23d   :  { %v1133_v24 = vpack.c.bf16 %v1055_v40, %v1052_v14  ;;  %v1058_v45 = vmax.f32 %v904_v53, 0.0  ;;  %v5895_v57 = vpop.f32.mrb[37].mxu1  ;;  %v6336_v14 = vld [vmem:[%s9064_s4 + $0x1d0] ss:$8 sps:$4 sm:$0xff]   ;;  %v6341_v40 = vld [vmem:[%s9064_s4 + $0x1e4] ss:$8 sps:$4 sm:$0xff]  }
 0x23e   :  { %v6344_v57 = vld [vmem:[%s9064_s4 + $0x1f4] ss:$8 sps:$4 sm:$0xff]  }
 0x242   :  { %5926 = vmatmul.mubr.msk.bf16.gmra.mrb[176].mxu0 %vm1291_vm3, %v7538_v19  ;;  %v907_v19 = vpop.f32.mrb[38].mxu1 }
 0x243   :  { %5929 = vmatprep.mubr.msk.bf16.mxu0 %vm6904_vm2, %v6903_v16  ;;  %v1061_v8 = vmax.f32 %v907_v19, 0.0  ;;  %v5896_v22 = vpop.f32.mrb[39].mxu1 }
 0x244   :  { %v912_v7 = vpop.f32.mrb[40].mxu1 }
 0x245   :  { %v1136_v56 = vpack.c.bf16 %v1061_v8, %v1058_v45  ;;  %v5899_v55 = vpop.f32.mrb[41].mxu1  ;;  %v6342_v8 = vld [vmem:[%s9064_s4 + $0x1f0] ss:$8 sps:$4 sm:$0xff]  }
 0x246   :  { %v915_v23 = vpop.f32.mrb[42].mxu1 }
 0x24a   :  { %5930 = vmatmul.mubr.msk.bf16.gmra.mrb[180].mxu0 %vm1291_vm3, %v7542_v42  ;;  %v5900_v42 = vpop.f32.mrb[43].mxu1 }
 0x24b   :  { %5933 = vmatprep.mubr.msk.bf16.mxu0 %vm6904_vm2, %v6903_v16  ;;  %v6347_v42 = vld [vmem:[%s9064_s4 + $0x204] ss:$8 sps:$4 sm:$0xff]  }
 0x252   :  { %5934 = vmatmul.mubr.msk.bf16.gmra.mrb[184].mxu0 %vm1291_vm3, %v7546_v17  ;;  %v6297_v17 = vld [vmem:[%s9064_s4 + $0x100] ss:$8 sps:$4 sm:$0xff]  }
 0x253   :  { %5937 = vmatprep.mubr.msk.bf16.mxu0 %vm6904_vm2, %v6903_v16 }
 0x25a   :  { %5938 = vmatmul.mubr.msk.bf16.gmra.mrb[188].mxu0 %vm1291_vm3, %v7550_v3  ;;  %v6299_v3 = vld [vmem:[%s9064_s4 + $0x104] ss:$8 sps:$4 sm:$0xff]  }
 0x25b   :  { %5941 = vmatprep.mubr.msk.bf16.mxu0 %vm6904_vm2, %v6903_v16  ;;  %4485 = vmatprep.subr.bf16.mxu1 %v6299_v3 }
 0x25c   :  { %4486 = vmatpush1.bf16.msra.mxu1 %v6297_v17 }
 0x262   :  { %5942 = vmatmul.mubr.msk.bf16.gmra.mrb[192].mxu0 %vm1291_vm3, %v7554_v62  ;;  %v6302_v62 = vld [vmem:[%s9064_s4 + $0x114] ss:$8 sps:$4 sm:$0xff]  }
 0x263   :  { %5945 = vmatprep.mubr.msk.bf16.mxu0 %vm6904_vm2, %v6903_v16  ;;  %4487 = vmatprep.subr.bf16.mxu1 %v6302_v62 }
 0x26a   :  { %5946 = vmatmul.mubr.msk.bf16.gmra.mrb[196].mxu0 %vm1291_vm3, %v7558_v36  ;;  %v6300_v36 = vld [vmem:[%s9064_s4 + $0x110] ss:$8 sps:$4 sm:$0xff]  }
 0x26b   :  { %5949 = vmatprep.mubr.msk.bf16.mxu0 %vm6904_vm2, %v6903_v16  ;;  %4488 = vmatpush1.bf16.msra.mxu1 %v6300_v36 }
 0x272   :  { %5950 = vmatmul.mubr.msk.bf16.gmra.mrb[200].mxu0 %vm1291_vm3, %v7562_v6  ;;  %v1064_v6 = vmax.f32 %v912_v7, 0.0 }
 0x273   :  { %5953 = vmatprep.mubr.msk.bf16.mxu0 %vm6904_vm2, %v6903_v16 }
 0x27a   :  { %5954 = vmatmul.mubr.msk.bf16.gmra.mrb[204].mxu0 %vm1291_vm3, %v7566_v4  ;;  %v6303_v4 = vld [vmem:[%s9064_s4 + $0x120] ss:$8 sps:$4 sm:$0xff]  }
 0x27b   :  { %5957 = vmatprep.mubr.msk.bf16.mxu0 %vm6904_vm2, %v6903_v16 }
 0x282   :  { %5958 = vmatmul.mubr.msk.bf16.gmra.mrb[208].mxu0 %vm1291_vm3, %v7571_v32  ;;  %v6305_v32 = vld [vmem:[%s9064_s4 + $0x124] ss:$8 sps:$4 sm:$0xff]  }
 0x283   :  { %5961 = vmatprep.mubr.msk.bf16.mxu0 %vm6904_vm2, %v6903_v16  ;;  %4489 = vmatprep.subr.bf16.mxu1 %v6305_v32 }
 0x284   :  { %4490 = vmatpush1.bf16.msra.mxu1 %v6303_v4 }
 0x28a   :  { %5962 = vmatmul.mubr.msk.bf16.gmra.mrb[212].mxu0 %vm1291_vm3, %v7575_v41  ;;  %v1139_v41 = vpack.c.bf16 %v1064_v6, %v1064_v6 }
 0x28b   :  { %5965 = vmatprep.mubr.msk.bf16.mxu0 %vm6904_vm2, %v6903_v16 }
 0x292   :  { %5966 = vmatmul.mubr.msk.bf16.gmra.mrb[216].mxu0 %vm1291_vm3, %v7579_v33  ;;  %v6308_v33 = vld [vmem:[%s9064_s4 + $0x134] ss:$8 sps:$4 sm:$0xff]  }
 0x293   :  { %5969 = vmatprep.mubr.msk.bf16.mxu0 %vm6904_vm2, %v6903_v16  ;;  %4491 = vmatprep.subr.bf16.mxu1 %v6308_v33 }
 0x294   :  { %4492 = vmatpush1.bf16.msra.mxu1 %v6306_v63 }
 0x29a   :  { %5970 = vmatmul.mubr.msk.bf16.gmra.mrb[220].mxu0 %vm1291_vm3, %v7587_v50  ;;  %v6320_v50 = vld [vmem:[%s9064_s4 + $0x174] ss:$8 sps:$4 sm:$0xff]  }
 0x29b   :  { %5973 = vmatprep.mubr.msk.bf16.mxu0 %vm6904_vm2, %v6903_v16 }
 0x2a2   :  { %5974 = vmatmul.mubr.msk.bf16.gmra.mrb[224].mxu0 %vm1291_vm3, %v7585_v38  ;;  %v6314_v38 = vld [vmem:[%s9064_s4 + $0x154] ss:$8 sps:$4 sm:$0xff]  }
 0x2a3   :  { %5977 = vmatprep.mubr.msk.bf16.mxu0 %vm6904_vm2, %v6903_v16 }
 0x2aa   :  { %5978 = vmatmul.mubr.msk.bf16.gmra.mrb[228].mxu0 %vm1291_vm3, %v7593_v11 }
 0x2ab   :  { %5981 = vmatprep.mubr.msk.bf16.mxu0 %vm6904_vm2, %v6903_v16 }
 0x2b2   :  { %5982 = vmatmul.mubr.msk.bf16.gmra.mrb[232].mxu0 %vm1291_vm3, %v7599_v37  ;;  %v6329_v37 = vld [vmem:[%s9064_s4 + $0x1a4] ss:$8 sps:$4 sm:$0xff]  }
 0x2b3   :  { %5985 = vmatprep.mubr.msk.bf16.mxu0 %vm6904_vm2, %v6903_v16 }
 0x2ba   :  { %5986 = vmatmul.mubr.msk.bf16.gmra.mrb[236].mxu0 %vm1291_vm3, %v1127_v2 }
 0x2bb   :  { %5989 = vmatprep.mubr.msk.bf16.mxu0 %vm6904_vm2, %v6903_v16 }
 0x2c2   :  { %5990 = vmatmul.mubr.msk.bf16.gmra.mrb[240].mxu0 %vm1291_vm3, %v1130_v5  ;;  %v6338_v5 = vld [vmem:[%s9064_s4 + $0x1d4] ss:$8 sps:$4 sm:$0xff]  }
 0x2c3   :  { %5993 = vmatprep.mubr.msk.bf16.mxu0 %vm6904_vm2, %v6903_v16 }
 0x2ca   :  { %5994 = vmatmul.mubr.msk.bf16.gmra.mrb[244].mxu0 %vm1291_vm3, %v1133_v24 }
 0x2cb   :  { %5997 = vmatprep.mubr.msk.bf16.mxu0 %vm6904_vm2, %v6903_v16 }
 0x2d2   :  { %5998 = vmatmul.mubr.msk.bf16.gmra.mrb[248].mxu0 %vm1291_vm3, %v1136_v56 }
 0x2d3   :  { %6001 = vmatprep.mubr.msk.bf16.mxu0 %vm6904_vm2, %v6903_v16  ;;  %v6311_v16 = vld [vmem:[%s9064_s4 + $0x144] ss:$8 sps:$4 sm:$0xff]  }
 0x2d4   :  { %4493 = vmatprep.subr.bf16.mxu1 %v6311_v16 }
 0x2d5   :  { %4494 = vmatpush1.bf16.msra.mxu1 %v6309_v21 }
 0x2d6   :  { %4495 = vmatprep.subr.bf16.mxu1 %v6314_v38 }
 0x2d9   :  { %4496 = vmatpush1.bf16.msra.mxu1 %v6312_v27 }
 0x2da   :  { %6002 = vmatmul.mubr.msk.bf16.gmra.mrb[252].mxu0 %vm1291_vm3, %v1139_v41  ;;  %4497 = vmatprep.subr.bf16.mxu1 %v6317_v51 }
 0x2dd   :  { %4498 = vmatpush1.bf16.msra.mxu1 %v6315_v20 }
 0x2de   :  { %4499 = vmatprep.subr.bf16.mxu1 %v6320_v50 }
 0x2e1   :  { %4500 = vmatpush1.bf16.msra.mxu1 %v6318_v48 }
 0x2e2   :  { %4501 = vmatprep.subr.bf16.mxu1 %v6323_v18 }
 0x2e5   :  { %4502 = vmatpush1.bf16.msra.mxu1 %v6321_v44 }
 0x2e6   :  { %4503 = vmatprep.subr.bf16.mxu1 %v6326_v12 }
 0x2e9   :  { %4504 = vmatpush1.bf16.msra.mxu1 %v6324_v46 }
 0x2ea   :  { %4505 = vmatprep.subr.bf16.mxu1 %v6329_v37 }
 0x2ed   :  { %v1633_v34 = vpop.f32.mrb[156].mxu0  ;;  %4506 = vmatpush1.bf16.msra.mxu1 %v6327_v28 }
 0x2ee   :  { %v6029_v31 = vadd.f32 %v7733_v39, %v1633_v34  ;;  %v5907_v11 = vpop.f32.mrb[157].mxu0  ;;  %4507 = vmatprep.subr.bf16.mxu1 %v6332_v13 }
 0x2ef   :  { %v7745_v47 = vpop.f32.mrb[158].mxu0 }
 0x2f0   :  { %v1831_v54 = vmax.f32 %v6029_v31, 0.0  ;;  %v5908_v15 = vpop.f32.mrb[159].mxu0 }
 0x2f1   :  { %4508 = vmatpush1.bf16.msra.mxu1 %v6330_v61 }
 0x2f2   :  { %1881 = vst.msk [vmem:[#allocation2] sm:$0xff] %vm1880_vm4, %v1831_v54  ;;  %4509 = vmatprep.subr.bf16.mxu1 %v6335_v35 }
 0x2f5   :  { %v1641_v60 = vpop.f32.mrb[160].mxu0  ;;  %4510 = vmatpush1.bf16.msra.mxu1 %v6333_v59 }
 0x2f6   :  { %v6031_v49 = vadd.f32 %v7733_v39, %v1641_v60  ;;  %v5911_v58 = vpop.f32.mrb[161].mxu0  ;;  %4511 = vmatprep.subr.bf16.mxu1 %v6338_v5 }
 0x2f7   :  { %v7761_v26 = vpop.f32.mrb[162].mxu0 }
 0x2f8   :  { %v1833_v2 = vmax.f32 %v6031_v49, 0.0  ;;  %v5912_v43 = vpop.f32.mrb[163].mxu0 }
 0x2f9   :  { %4512 = vmatpush1.bf16.msra.mxu1 %v6336_v14 }
 0x2fa   :  { %1888 = vst.msk [vmem:[#allocation2 + $0x8] sm:$0xff] %vm1880_vm4, %v1833_v2  ;;  %4513 = vmatprep.subr.bf16.mxu1 %v6341_v40 }
 0x2fd   :  { %v1649_v0 = vpop.f32.mrb[164].mxu0  ;;  %4514 = vmatpush1.bf16.msra.mxu1 %v6339_v52 }
 0x2fe   :  { %v6033_v30 = vadd.f32 %v7733_v39, %v1649_v0  ;;  %v5915_v25 = vpop.f32.mrb[165].mxu0  ;;  %4515 = vmatprep.subr.bf16.mxu1 %v6344_v57 }
 0x2ff   :  { %v1652_v29 = vpop.f32.mrb[166].mxu0 }
 0x300   :  { %v1835_v9 = vmax.f32 %v6033_v30, 0.0  ;;  %v5916_v10 = vpop.f32.mrb[167].mxu0  ;;  %v6034_v55 = vadd.f32 %v7733_v39, %v1652_v29 }
 0x301   :  { %4516 = vmatpush1.bf16.msra.mxu1 %v6342_v8 }
 0x302   :  { %1894 = vst.msk [vmem:[#allocation2 + $0x10] sm:$0xff] %vm1880_vm4, %v1835_v9  ;;  %4526 = vmatprep.subr.bf16.mxu1 %v6347_v42  ;;  %v1836_v3 = vmax.f32 %v6034_v55, 0.0 }
 0x305   :  { %v1657_v24 = vpop.f32.mrb[168].mxu0 }
 0x306   :  { %v6035_v53 = vadd.f32 %v7733_v39, %v1657_v24  ;;  %v5919_v45 = vpop.f32.mrb[169].mxu0 }
 0x307   :  { %v1660_v19 = vpop.f32.mrb[170].mxu0 }
 0x308   :  { %v1837_v22 = vmax.f32 %v6035_v53, 0.0  ;;  %v6036_v56 = vadd.f32 %v7733_v39, %v1660_v19  ;;  %v5920_v7 = vpop.f32.mrb[171].mxu0 }
 0x30a   :  { %1900 = vst.msk [vmem:[#allocation2 + $0x18] sm:$0xff] %vm1880_vm4, %v1837_v22  ;;  %v1838_v23 = vmax.f32 %v6036_v56, 0.0 }
 0x30c   :  { %1902 = vrot.lane.b32.xlu0 %v1838_v23, %s6905_s1 }
 0x30d   :  { %v1665_v17 = vpop.f32.mrb[172].mxu0 }
 0x30e   :  { %v6037_v62 = vadd.f32 %v7733_v39, %v1665_v17  ;;  %v5923_v36 = vpop.f32.mrb[173].mxu0 }
 0x30f   :  { %v1668_v6 = vpop.f32.mrb[174].mxu0 }
 0x310   :  { %v1839_v4 = vmax.f32 %v6037_v62, 0.0  ;;  %1896 = vrot.lane.b32.xlu0 %v1836_v3, %s6905_s1  ;;  %v5924_v32 = vpop.f32.mrb[175].mxu0  ;;  %v6038_v20 = vadd.f32 %v7733_v39, %v1668_v6 }
 0x312   :  { %1906 = vst.msk [vmem:[#allocation2 + $0x20] sm:$0xff] %vm1880_vm4, %v1839_v4  ;;  %v1840_v48 = vmax.f32 %v6038_v20, 0.0 }
 0x315   :  { %v1673_v41 = vpop.f32.mrb[176].mxu0 }
 0x316   :  { %v6039_v33 = vadd.f32 %v7733_v39, %v1673_v41  ;;  %v5927_v63 = vpop.f32.mrb[177].mxu0 }
 0x317   :  { %v1676_v21 = vpop.f32.mrb[178].mxu0 }
 0x318   :  { %v1841_v16 = vmax.f32 %v6039_v33, 0.0  ;;  %v6040_v38 = vadd.f32 %v7733_v39, %v1676_v21  ;;  %v5928_v27 = vpop.f32.mrb[179].mxu0 }
 0x31a   :  { %1912 = vst.msk [vmem:[#allocation2 + $0x28] sm:$0xff] %vm1880_vm4, %v1841_v16  ;;  %v1842_v51 = vmax.f32 %v6040_v38, 0.0 }
 0x31c   :  { %1914 = vrot.lane.b32.xlu1 %v1842_v51, %s6905_s1 }
 0x31d   :  { %v1681_v50 = vpop.f32.mrb[180].mxu0 }
 0x31e   :  { %v6041_v44 = vadd.f32 %v7733_v39, %v1681_v50  ;;  %v5931_v18 = vpop.f32.mrb[181].mxu0 }
 0x31f   :  { %v1684_v34 = vpop.f32.mrb[182].mxu0 }
 0x320   :  { %v1843_v31 = vmax.f32 %v6041_v44, 0.0  ;;  %v6042_v11 = vadd.f32 %v7733_v39, %v1684_v34  ;;  %1908 = vrot.lane.b32.xlu1 %v1840_v48, %s6905_s1  ;;  %v5932_v12 = vpop.f32.mrb[183].mxu0 }
 0x322   :  { %1918 = vst.msk [vmem:[#allocation2 + $0x30] sm:$0xff] %vm1880_vm4, %v1843_v31  ;;  %v1844_v46 = vmax.f32 %v6042_v11, 0.0 }
 0x324   :  { %1920 = vrot.lane.b32.xlu1 %v1844_v46, %s6905_s1 }
 0x325   :  { %v1689_v54 = vpop.f32.mrb[184].mxu0 }
 0x326   :  { %v6043_v15 = vadd.f32 %v7733_v39, %v1689_v54  ;;  %v5935_v28 = vpop.f32.mrb[185].mxu0 }
 0x327   :  { %v1692_v37 = vpop.f32.mrb[186].mxu0 }
 0x328   :  { %v1845_v60 = vmax.f32 %v6043_v15, 0.0  ;;  %v6044_v49 = vadd.f32 %v7733_v39, %v1692_v37  ;;  %v5936_v58 = vpop.f32.mrb[187].mxu0 }
 0x32a   :  { %1924 = vst.msk [vmem:[#allocation2 + $0x38] sm:$0xff] %vm1880_vm4, %v1845_v60  ;;  %v1846_v13 = vmax.f32 %v6044_v49, 0.0 }
 0x32c   :  { %1926 = vrot.lane.b32.xlu0 %v1846_v13, %s6905_s1 }
 0x32d   :  { %v1697_v61 = vpop.f32.mrb[188].mxu0 }
 0x32e   :  { %v6045_v2 = vadd.f32 %v7733_v39, %v1697_v61  ;;  %v5939_v43 = vpop.f32.mrb[189].mxu0 }
 0x32f   :  { %v1700_v59 = vpop.f32.mrb[190].mxu0 }
 0x330   :  { %v1847_v35 = vmax.f32 %v6045_v2, 0.0  ;;  %v6046_v0 = vadd.f32 %v7733_v39, %v1700_v59  ;;  %v5940_v30 = vpop.f32.mrb[191].mxu0 }
 0x332   :  { %1930 = vst.msk [vmem:[#allocation2 + $0x40] sm:$0xff] %vm1880_vm4, %v1847_v35  ;;  %v1848_v25 = vmax.f32 %v6046_v0, 0.0  ;;  %v6422_v0 = vld [vmem:[%s9064_s4 + $0x4] ss:$8 sps:$4 sm:$0xff]  }
 0x333   :  { %4444 = vmatprep.subr.bf16.mxu0 %v6422_v0  ;;  %v6348_v0 = vld [vmem:[%s9064_s4 + $0x210] ss:$8 sps:$4 sm:$0xff]  }
 0x334   :  { %1932 = vrot.lane.b32.xlu1 %v1848_v25, %s6905_s1 }
 0x335   :  { %v1705_v5 = vpop.f32.mrb[192].mxu0 }
 0x336   :  { %v6047_v29 = vadd.f32 %v7733_v39, %v1705_v5  ;;  %v5943_v14 = vpop.f32.mrb[193].mxu0  ;;  %v6420_v5 = vld [vmem:[%s9064_s4] ss:$8 sps:$4 sm:$0xff]  }
 0x337   :  { %v1708_v9 = vpop.f32.mrb[194].mxu0  ;;  %4445 = vmatpush1.bf16.msra.mxu0 %v6420_v5  ;;  %v6353_v5 = vld [vmem:[%s9064_s4 + $0x224] ss:$8 sps:$4 sm:$0xff]  }
 0x338   :  { %v1849_v10 = vmax.f32 %v6047_v29, 0.0  ;;  %v6048_v40 = vadd.f32 %v7733_v39, %v1708_v9  ;;  %v5944_v52 = vpop.f32.mrb[195].mxu0  ;;  %v7860_v9 = vld [vmem:[%s9065_s3] ss:$0 sm:$0xff] }
 0x33a   :  { %1936 = vst.msk [vmem:[#allocation2 + $0x48] sm:$0xff] %vm1880_vm4, %v1849_v10  ;;  %v1850_v24 = vmax.f32 %v6048_v40, 0.0 }
 0x33c   :  { %1938 = vrot.lane.b32.xlu0 %v1850_v24, %s6905_s1  ;;  %v6426_v24 = vld [vmem:[%s9064_s4 + $0x10] ss:$8 sps:$4 sm:$0xff]  }
 0x33d   :  { %v1713_v53 = vpop.f32.mrb[196].mxu0 }
 0x33e   :  { %v6049_v45 = vadd.f32 %v7733_v39, %v1713_v53  ;;  %v5947_v57 = vpop.f32.mrb[197].mxu0 }
 0x33f   :  { %v1716_v19 = vpop.f32.mrb[198].mxu0 }
 0x340   :  { %v1851_v8 = vmax.f32 %v6049_v45, 0.0  ;;  %v6050_v22 = vadd.f32 %v7733_v39, %v1716_v19  ;;  %v5948_v56 = vpop.f32.mrb[199].mxu0  ;;  %v6434_v45 = vld [vmem:[%s9064_s4 + $0x24] ss:$8 sps:$4 sm:$0xff]  }
 0x342   :  { %1942 = vst.msk [vmem:[#allocation2 + $0x50] sm:$0xff] %vm1880_vm4, %v1851_v8  ;;  %v1852_v7 = vmax.f32 %v6050_v22, 0.0  ;;  %v6432_v8 = vld [vmem:[%s9064_s4 + $0x20] ss:$8 sps:$4 sm:$0xff]  }
 0x344   :  { %1944 = vrot.lane.b32.xlu1 %v1852_v7, %s6905_s1 }
 0x345   :  { %v1721_v55 = vpop.f32.mrb[200].mxu0 }
 0x346   :  { %v6051_v23 = vadd.f32 %v7733_v39, %v1721_v55  ;;  %v5951_v42 = vpop.f32.mrb[201].mxu0 }
 0x347   :  { %v1724_v17 = vpop.f32.mrb[202].mxu0 }
 0x348   :  { %v1853_v3 = vmax.f32 %v6051_v23, 0.0  ;;  %v6052_v62 = vadd.f32 %v7733_v39, %v1724_v17  ;;  %v5952_v36 = vpop.f32.mrb[203].mxu0  ;;  %v6440_v23 = vld [vmem:[%s9064_s4 + $0x34] ss:$8 sps:$4 sm:$0xff]   ;;  %v6438_v17 = vld [vmem:[%s9064_s4 + $0x30] ss:$8 sps:$4 sm:$0xff]  }
 0x34a   :  { %1948 = vst.msk [vmem:[#allocation2 + $0x58] sm:$0xff] %vm1880_vm4, %v1853_v3  ;;  %v1854_v6 = vmax.f32 %v6052_v62, 0.0  ;;  %v6446_v62 = vld [vmem:[%s9064_s4 + $0x44] ss:$8 sps:$4 sm:$0xff]  }
 0x34c   :  { %1950 = vrot.lane.b32.xlu0 %v1854_v6, %s6905_s1 }
 0x34d   :  { %v1729_v4 = vpop.f32.mrb[204].mxu0 }
 0x34e   :  { %v6053_v32 = vadd.f32 %v7733_v39, %v1729_v4  ;;  %v5955_v41 = vpop.f32.mrb[205].mxu0 }
 0x34f   :  { %v1732_v33 = vpop.f32.mrb[206].mxu0 }
 0x350   :  { %v1855_v63 = vmax.f32 %v6053_v32, 0.0  ;;  %v6054_v21 = vadd.f32 %v7733_v39, %v1732_v33  ;;  %v5956_v16 = vpop.f32.mrb[207].mxu0  ;;  %v6444_v32 = vld [vmem:[%s9064_s4 + $0x40] ss:$8 sps:$4 sm:$0xff]  }
 0x351   :  { %v6452_v16 = vld [vmem:[%s9064_s4 + $0x54] ss:$8 sps:$4 sm:$0xff]  }
 0x352   :  { %1954 = vst.msk [vmem:[#allocation2 + $0x60] sm:$0xff] %vm1880_vm4, %v1855_v63  ;;  %v1856_v38 = vmax.f32 %v6054_v21, 0.0 }
 0x354   :  { %1956 = vrot.lane.b32.xlu1 %v1856_v38, %s6905_s1 }
 0x355   :  { %v1737_v27 = vpop.f32.mrb[208].mxu0 }
 0x356   :  { %v6055_v20 = vadd.f32 %v7733_v39, %v1737_v27  ;;  %v5959_v51 = vpop.f32.mrb[209].mxu0 }
 0x357   :  { %v1740_v50 = vpop.f32.mrb[210].mxu0 }
 0x358   :  { %v1857_v48 = vmax.f32 %v6055_v20, 0.0  ;;  %v6056_v44 = vadd.f32 %v7733_v39, %v1740_v50  ;;  %v5960_v18 = vpop.f32.mrb[211].mxu0  ;;  %v6450_v20 = vld [vmem:[%s9064_s4 + $0x50] ss:$8 sps:$4 sm:$0xff]   ;;  %v6458_v50 = vld [vmem:[%s9064_s4 + $0x64] ss:$8 sps:$4 sm:$0xff]  }
 0x35a   :  { %1960 = vst.msk [vmem:[#allocation2 + $0x68] sm:$0xff] %vm1880_vm4, %v1857_v48  ;;  %v1858_v34 = vmax.f32 %v6056_v44, 0.0 }
 0x35c   :  { %1962 = vrot.lane.b32.xlu0 %v1858_v34, %s6905_s1  ;;  %v6456_v34 = vld [vmem:[%s9064_s4 + $0x60] ss:$8 sps:$4 sm:$0xff]  }
 0x35d   :  { %v1745_v31 = vpop.f32.mrb[212].mxu0 }
 0x35e   :  { %v6057_v11 = vadd.f32 %v7733_v39, %v1745_v31  ;;  %v5963_v12 = vpop.f32.mrb[213].mxu0 }
 0x35f   :  { %v1748_v46 = vpop.f32.mrb[214].mxu0 }
 0x360   :  { %v1859_v54 = vmax.f32 %v6057_v11, 0.0  ;;  %v6058_v15 = vadd.f32 %v7733_v39, %v1748_v46  ;;  %v5964_v28 = vpop.f32.mrb[215].mxu0 }
 0x362   :  { %1966 = vst.msk [vmem:[#allocation2 + $0x70] sm:$0xff] %vm1880_vm4, %v1859_v54  ;;  %v1860_v37 = vmax.f32 %v6058_v15, 0.0  ;;  %v6464_v15 = vld [vmem:[%s9064_s4 + $0x74] ss:$8 sps:$4 sm:$0xff]  }
 0x364   :  { %1968 = vrot.lane.b32.xlu1 %v1860_v37, %s6905_s1  ;;  %v6345_v37 = vld [vmem:[%s9064_s4 + $0x200] ss:$8 sps:$4 sm:$0xff]  }
 0x365   :  { %v1753_v60 = vpop.f32.mrb[216].mxu0 }
 0x366   :  { %v6059_v49 = vadd.f32 %v7733_v39, %v1753_v60  ;;  %v5967_v58 = vpop.f32.mrb[217].mxu0 }
 0x367   :  { %v1756_v13 = vpop.f32.mrb[218].mxu0 }
 0x368   :  { %v1861_v61 = vmax.f32 %v6059_v49, 0.0  ;;  %v6060_v2 = vadd.f32 %v7733_v39, %v1756_v13  ;;  %v5968_v43 = vpop.f32.mrb[219].mxu0  ;;  %v6462_v49 = vld [vmem:[%s9064_s4 + $0x70] ss:$8 sps:$4 sm:$0xff]   ;;  %v6350_v13 = vld [vmem:[%s9064_s4 + $0x214] ss:$8 sps:$4 sm:$0xff]  }
 0x36a   :  { %1972 = vst.msk [vmem:[#allocation2 + $0x78] sm:$0xff] %vm1880_vm4, %v1861_v61  ;;  %v1862_v59 = vmax.f32 %v6060_v2, 0.0  ;;  %v6470_v2 = vld [vmem:[%s9064_s4 + $0x84] ss:$8 sps:$4 sm:$0xff]  }
 0x36c   :  { %1974 = vrot.lane.b32.xlu0 %v1862_v59, %s6905_s1 }
 0x36d   :  { %v1761_v35 = vpop.f32.mrb[220].mxu0 }
 0x36e   :  { %v6061_v30 = vadd.f32 %v7733_v39, %v1761_v35  ;;  %v5971_v25 = vpop.f32.mrb[221].mxu0  ;;  %v6428_v39 = vld [vmem:[%s9064_s4 + $0x14] ss:$8 sps:$4 sm:$0xff]  }
 0x36f   :  { %v1764_v29 = vpop.f32.mrb[222].mxu0  ;;  %4446 = vmatprep.subr.bf16.mxu0 %v6428_v39 }
 0x370   :  { %v1863_v14 = vmax.f32 %v6061_v30, 0.0  ;;  %v6062_v10 = vadd.f32 %v7860_v9, %v1764_v29  ;;  %v5972_v40 = vpop.f32.mrb[223].mxu0  ;;  %4447 = vmatpush1.bf16.msra.mxu0 %v6426_v24  ;;  %v6468_v30 = vld [vmem:[%s9064_s4 + $0x80] ss:$8 sps:$4 sm:$0xff]  }
 0x371   :  { %4448 = vmatprep.subr.bf16.mxu0 %v6434_v45  ;;  %v6476_v40 = vld [vmem:[%s9064_s4 + $0x94] ss:$8 sps:$4 sm:$0xff]   ;;  %v6351_v24 = vld [vmem:[%s9064_s4 + $0x220] ss:$8 sps:$4 sm:$0xff]  }
 0x372   :  { %1978 = vst.msk [vmem:[#allocation2 + $0x80] sm:$0xff] %vm1880_vm4, %v1863_v14  ;;  %v1864_v52 = vmax.f32 %v6062_v10, 0.0  ;;  %v6356_v45 = vld [vmem:[%s9064_s4 + $0x234] ss:$8 sps:$4 sm:$0xff]  }
 0x374   :  { %1980 = vrot.lane.b32.xlu1 %v1864_v52, %s6905_s1  ;;  %4449 = vmatpush1.bf16.msra.mxu0 %v6432_v8 }
 0x375   :  { %v1769_v53 = vpop.f32.mrb[224].mxu0  ;;  %4450 = vmatprep.subr.bf16.mxu0 %v6440_v23  ;;  %v6480_v23 = vld [vmem:[%s9064_s4 + $0xa0] ss:$8 sps:$4 sm:$0xff]  }
 0x376   :  { %v6063_v57 = vadd.f32 %v7860_v9, %v1769_v53  ;;  %v5975_v19 = vpop.f32.mrb[225].mxu0  ;;  %v6474_v53 = vld [vmem:[%s9064_s4 + $0x90] ss:$8 sps:$4 sm:$0xff]  }
 0x377   :  { %v1772_v22 = vpop.f32.mrb[226].mxu0  ;;  %v6482_v19 = vld [vmem:[%s9064_s4 + $0xa4] ss:$8 sps:$4 sm:$0xff]  }
 0x378   :  { %v1865_v56 = vmax.f32 %v6063_v57, 0.0  ;;  %v6064_v7 = vadd.f32 %v7860_v9, %v1772_v22  ;;  %v5976_v55 = vpop.f32.mrb[227].mxu0  ;;  %4451 = vmatpush1.bf16.msra.mxu0 %v6438_v17 }
 0x379   :  { %4452 = vmatprep.subr.bf16.mxu0 %v6446_v62 }
 0x37a   :  { %1984 = vst.msk [vmem:[#allocation2 + $0x88] sm:$0xff] %vm1880_vm4, %v1865_v56  ;;  %v1866_v42 = vmax.f32 %v6064_v7, 0.0  ;;  %v6354_v7 = vld [vmem:[%s9064_s4 + $0x230] ss:$8 sps:$4 sm:$0xff]  }
 0x37c   :  { %1986 = vrot.lane.b32.xlu0 %v1866_v42, %s6905_s1  ;;  %4453 = vmatpush1.bf16.msra.mxu0 %v6444_v32 }
 0x37d   :  { %v1777_v3 = vpop.f32.mrb[228].mxu0  ;;  %4454 = vmatprep.subr.bf16.mxu0 %v6452_v16  ;;  %v6494_v16 = vld [vmem:[%s9064_s4 + $0xc4] ss:$8 sps:$4 sm:$0xff]  }
 0x37e   :  { %v6065_v36 = vadd.f32 %v7860_v9, %v1777_v3  ;;  %v1903_v6 = vpop.permute.xlu0 %1902  ;;  %v5979_v4 = vpop.f32.mrb[229].mxu0  ;;  %v6359_v3 = vld [vmem:[%s9064_s4 + $0x244] ss:$8 sps:$4 sm:$0xff]  }
 0x37f   :  { %1905 = vst.msk [vmem:[#allocation2 + $0x18] sm:$0xff] %vm1886_vm5, %v1903_v6  ;;  %v1780_v41 = vpop.f32.mrb[230].mxu0  ;;  %v6488_v4 = vld [vmem:[%s9064_s4 + $0xb4] ss:$8 sps:$4 sm:$0xff]  }
 0x380   :  { %v1867_v33 = vmax.f32 %v6065_v36, 0.0  ;;  %v6066_v63 = vadd.f32 %v7860_v9, %v1780_v41  ;;  %v5980_v21 = vpop.f32.mrb[231].mxu0  ;;  %4455 = vmatpush1.bf16.msra.mxu0 %v6450_v20  ;;  %v6357_v41 = vld [vmem:[%s9064_s4 + $0x240] ss:$8 sps:$4 sm:$0xff]  }
 0x381   :  { %4456 = vmatprep.subr.bf16.mxu0 %v6458_v50  ;;  %v6492_v50 = vld [vmem:[%s9064_s4 + $0xc0] ss:$8 sps:$4 sm:$0xff]  }
 0x382   :  { %1990 = vst.msk [vmem:[#allocation2 + $0x90] sm:$0xff] %vm1880_vm4, %v1867_v33  ;;  %v1868_v38 = vmax.f32 %v6066_v63, 0.0  ;;  %v1897_v27 = vpop.permute.xlu0 %1896  ;;  %v6486_v33 = vld [vmem:[%s9064_s4 + $0xb0] ss:$8 sps:$4 sm:$0xff]   ;;  %v6362_v63 = vld [vmem:[%s9064_s4 + $0x254] ss:$8 sps:$4 sm:$0xff]  }
 0x383   :  { %1899 = vst.msk [vmem:[#allocation2 + $0x10] sm:$0xff] %vm1886_vm5, %v1897_v27 }
 0x384   :  { %1992 = vrot.lane.b32.xlu1 %v1868_v38, %s6905_s1  ;;  %4457 = vmatpush1.bf16.msra.mxu0 %v6456_v34 }
 0x385   :  { %v1785_v51 = vpop.f32.mrb[232].mxu0  ;;  %4458 = vmatprep.subr.bf16.mxu0 %v6464_v15  ;;  %v6498_v15 = vld [vmem:[%s9064_s4 + $0xd0] ss:$8 sps:$4 sm:$0xff]  }
 0x386   :  { %v6067_v48 = vadd.f32 %v7860_v9, %v1785_v51  ;;  %v5983_v44 = vpop.f32.mrb[233].mxu0  ;;  %v2030_v18 = vld [vmem:[#allocation2 + $0x18] sm:$0xff] }
 0x387   :  { %v1788_v31 = vpop.f32.mrb[234].mxu0  ;;  %v2055_v11 = vpack.c.bf16 %v2030_v18, %v2030_v18  ;;  %v6360_v51 = vld [vmem:[%s9064_s4 + $0x250] ss:$8 sps:$4 sm:$0xff]   ;;  %v6365_v44 = vld [vmem:[%s9064_s4 + $0x264] ss:$8 sps:$4 sm:$0xff]  }
 0x388   :  { %v1869_v12 = vmax.f32 %v6067_v48, 0.0  ;;  %v6068_v46 = vadd.f32 %v7860_v9, %v1788_v31  ;;  %v5984_v54 = vpop.f32.mrb[235].mxu0  ;;  %4459 = vmatpush1.bf16.msra.mxu0 %v6462_v49 }
 0x389   :  { %4517 = vmatprep.mubr.bf16.mxu1 %v2055_v11  ;;  %4460 = vmatprep.subr.bf16.mxu0 %v6470_v2  ;;  %v6500_v11 = vld [vmem:[%s9064_s4 + $0xd4] ss:$8 sps:$4 sm:$0xff]   ;;  %v6363_v54 = vld [vmem:[%s9064_s4 + $0x260] ss:$8 sps:$4 sm:$0xff]  }
 0x38a   :  { %1996 = vst.msk [vmem:[#allocation2 + $0x98] sm:$0xff] %vm1880_vm4, %v1869_v12  ;;  %v1870_v28 = vmax.f32 %v6068_v46, 0.0  ;;  %v2029_v60 = vld [vmem:[#allocation2 + $0x10] sm:$0xff]  ;;  %v6030_v12 = vadd.f32 %v7860_v9, %v7745_v47  ;;  %v6504_v2 = vld [vmem:[%s9064_s4 + $0xe0] ss:$8 sps:$4 sm:$0xff]  }
 0x38b   :  { %v2054_v58 = vpack.c.bf16 %v2029_v60, %v2029_v60 }
 0x38c   :  { %1998 = vrot.lane.b32.xlu0 %v1870_v28, %s6905_s1  ;;  %4461 = vmatpush1.bf16.msra.mxu0 %v6468_v30  ;;  %v6368_v28 = vld [vmem:[%s9064_s4 + $0x274] ss:$8 sps:$4 sm:$0xff]   ;;  %v1832_v60 = vmax.f32 %v6030_v12, 0.0  ;;  %v6405_v12 = vld [vmem:[%s9064_s4 + $0x340] ss:$8 sps:$4 sm:$0xff]  }
 0x38d   :  { %v1793_v61 = vpop.f32.mrb[236].mxu0  ;;  %4518 = vmatmul.mubr.bf16.vlgmr.msra.gmra.mrb[44].mxu1 %v2054_v58  ;;  %4462 = vmatprep.subr.bf16.mxu0 %v6476_v40  ;;  %v6374_v40 = vld [vmem:[%s9064_s4 + $0x294] ss:$8 sps:$4 sm:$0xff]  }
 0x38e   :  { %v6069_v43 = vadd.f32 %v7860_v9, %v1793_v61  ;;  %4527 = vmatpush1.bf16.msra.mxu1 %v6345_v37  ;;  %v1915_v59 = vpop.permute.xlu1 %1914  ;;  %v5987_v35 = vpop.f32.mrb[237].mxu0  ;;  %v6506_v37 = vld [vmem:[%s9064_s4 + $0xe4] ss:$8 sps:$4 sm:$0xff]   ;;  %v6366_v61 = vld [vmem:[%s9064_s4 + $0x270] ss:$8 sps:$4 sm:$0xff]  }
 0x38f   :  { %1917 = vst.msk [vmem:[#allocation2 + $0x28] sm:$0xff] %vm1886_vm5, %v1915_v59  ;;  %v1796_v25 = vpop.f32.mrb[238].mxu0  ;;  %4528 = vmatprep.subr.bf16.mxu1 %v6350_v13  ;;  %v6371_v59 = vld [vmem:[%s9064_s4 + $0x284] ss:$8 sps:$4 sm:$0xff]  }
 0x390   :  { %v1871_v29 = vmax.f32 %v6069_v43, 0.0  ;;  %v6070_v14 = vadd.f32 %v7860_v9, %v1796_v25  ;;  %v5988_v10 = vpop.f32.mrb[239].mxu0  ;;  %4463 = vmatpush1.bf16.msra.mxu0 %v6474_v53  ;;  %v6512_v25 = vld [vmem:[%s9064_s4 + $0xf4] ss:$8 sps:$4 sm:$0xff]  }
 0x391   :  { %4464 = vmatprep.subr.bf16.mxu0 %v6482_v19  ;;  %v6510_v10 = vld [vmem:[%s9064_s4 + $0xf0] ss:$8 sps:$4 sm:$0xff]   ;;  %v6377_v19 = vld [vmem:[%s9064_s4 + $0x2a4] ss:$8 sps:$4 sm:$0xff]  }
 0x392   :  { %2002 = vst.msk [vmem:[#allocation2 + $0xa0] sm:$0xff] %vm1880_vm4, %v1871_v29  ;;  %v1872_v39 = vmax.f32 %v6070_v14, 0.0  ;;  %4529 = vmatpush1.bf16.msra.mxu1 %v6348_v0  ;;  %v1909_v52 = vpop.permute.xlu1 %1908  ;;  %v6369_v14 = vld [vmem:[%s9064_s4 + $0x280] ss:$8 sps:$4 sm:$0xff]  }
 0x393   :  { %1911 = vst.msk [vmem:[#allocation2 + $0x20] sm:$0xff] %vm1886_vm5, %v1909_v52  ;;  %4530 = vmatprep.subr.bf16.mxu1 %v6353_v5  ;;  %v6032_v5 = vadd.f32 %v7860_v9, %v7761_v26 }
 0x394   :  { %2004 = vrot.lane.b32.xlu1 %v1872_v39, %s6905_s1  ;;  %4465 = vmatpush1.bf16.msra.mxu0 %v6480_v23  ;;  %v6383_v23 = vld [vmem:[%s9064_s4 + $0x2c4] ss:$8 sps:$4 sm:$0xff]  }
 0x395   :  { %v1801_v57 = vpop.f32.mrb[240].mxu0  ;;  %4466 = vmatprep.subr.bf16.mxu0 %v6488_v4  ;;  %v1834_v39 = vmax.f32 %v6032_v5, 0.0  ;;  %v6392_v4 = vld [vmem:[%s9064_s4 + $0x2f4] ss:$8 sps:$4 sm:$0xff]   ;;  %v6443_v5 = vld [vmem:[%s9064_s4 + $0x3c4] ss:$8 sps:$4 sm:$0xff]  }
 0x396   :  { %v6071_v8 = vadd.f32 %v7860_v9, %v1801_v57  ;;  %4531 = vmatpush1.bf16.msra.mxu1 %v6351_v24  ;;  %v1921_v22 = vpop.permute.xlu1 %1920  ;;  %v5991_v56 = vpop.f32.mrb[241].mxu0  ;;  %v2032_v55 = vld [vmem:[#allocation2 + $0x28] sm:$0xff] }
 0x397   :  { %1923 = vst.msk [vmem:[#allocation2 + $0x30] sm:$0xff] %vm1886_vm5, %v1921_v22  ;;  %v1804_v42 = vpop.f32.mrb[242].mxu0  ;;  %4532 = vmatprep.subr.bf16.mxu1 %v6356_v45  ;;  %v2057_v17 = vpack.c.bf16 %v2032_v55, %v2032_v55  ;;  %v6372_v45 = vld [vmem:[%s9064_s4 + $0x290] ss:$8 sps:$4 sm:$0xff]   ;;  %v6380_v56 = vld [vmem:[%s9064_s4 + $0x2b4] ss:$8 sps:$4 sm:$0xff]  }
 0x398   :  { %v1873_v62 = vmax.f32 %v6071_v8, 0.0  ;;  %v6072_v36 = vadd.f32 %v7860_v9, %v1804_v42  ;;  %v5992_v6 = vpop.f32.mrb[243].mxu0  ;;  %4467 = vmatpush1.bf16.msra.mxu0 %v6486_v33  ;;  %v6378_v55 = vld [vmem:[%s9064_s4 + $0x2b0] ss:$8 sps:$4 sm:$0xff]   ;;  %v6381_v42 = vld [vmem:[%s9064_s4 + $0x2c0] ss:$8 sps:$4 sm:$0xff]  }
 0x399   :  { %4558 = vmatprep.mubr.bf16.mxu1 %v2057_v17  ;;  %4468 = vmatprep.subr.bf16.mxu0 %v6494_v16  ;;  %v6386_v17 = vld [vmem:[%s9064_s4 + $0x2d4] ss:$8 sps:$4 sm:$0xff]   ;;  %v6387_v6 = vld [vmem:[%s9064_s4 + $0x2e0] ss:$8 sps:$4 sm:$0xff]   ;;  %v6395_v33 = vld [vmem:[%s9064_s4 + $0x304] ss:$8 sps:$4 sm:$0xff]  }
 0x39a   :  { %2008 = vst.msk [vmem:[#allocation2 + $0xa8] sm:$0xff] %vm1880_vm4, %v1873_v62  ;;  %v1874_v32 = vmax.f32 %v6072_v36, 0.0  ;;  %4533 = vmatpush1.bf16.msra.mxu1 %v6354_v7  ;;  %v6384_v62 = vld [vmem:[%s9064_s4 + $0x2d0] ss:$8 sps:$4 sm:$0xff]   ;;  %v6389_v36 = vld [vmem:[%s9064_s4 + $0x2e4] ss:$8 sps:$4 sm:$0xff]  }
 0x39b   :  { %4534 = vmatprep.subr.bf16.mxu1 %v6359_v3  ;;  %v6393_v16 = vld [vmem:[%s9064_s4 + $0x300] ss:$8 sps:$4 sm:$0xff]  }
 0x39c   :  { %2010 = vrot.lane.b32.xlu0 %v1874_v32, %s6905_s1  ;;  %4469 = vmatpush1.bf16.msra.mxu0 %v6492_v50  ;;  %v6396_v50 = vld [vmem:[%s9064_s4 + $0x310] ss:$8 sps:$4 sm:$0xff]  }
 0x39d   :  { %v1809_v21 = vpop.f32.mrb[244].mxu0  ;;  %4470 = vmatprep.subr.bf16.mxu0 %v6500_v11  ;;  %v6407_v11 = vld [vmem:[%s9064_s4 + $0x344] ss:$8 sps:$4 sm:$0xff]  }
 0x39e   :  { %v6073_v38 = vadd.f32 %v7860_v9, %v1809_v21  ;;  %4535 = vmatpush1.bf16.msra.mxu1 %v6357_v41  ;;  %v1927_v27 = vpop.permute.xlu0 %1926  ;;  %v5995_v20 = vpop.f32.mrb[245].mxu0  ;;  %v6390_v41 = vld [vmem:[%s9064_s4 + $0x2f0] ss:$8 sps:$4 sm:$0xff]  }
 0x39f   :  { %1929 = vst.msk [vmem:[#allocation2 + $0x38] sm:$0xff] %vm1886_vm5, %v1927_v27  ;;  %v1812_v48 = vpop.f32.mrb[246].mxu0  ;;  %4536 = vmatprep.subr.bf16.mxu1 %v6362_v63  ;;  %v2031_v63 = vld [vmem:[#allocation2 + $0x20] sm:$0xff]  ;;  %v6398_v27 = vld [vmem:[%s9064_s4 + $0x314] ss:$8 sps:$4 sm:$0xff]  }
 0x3a0   :  { %v1875_v18 = vmax.f32 %v6073_v38, 0.0  ;;  %v6074_v34 = vadd.f32 %v7860_v9, %v1812_v48  ;;  %v5996_v31 = vpop.f32.mrb[247].mxu0  ;;  %4471 = vmatpush1.bf16.msra.mxu0 %v6498_v15  ;;  %v2056_v38 = vpack.c.bf16 %v2031_v63, %v2031_v63  ;;  %v6401_v48 = vld [vmem:[%s9064_s4 + $0x324] ss:$8 sps:$4 sm:$0xff]   ;;  %v6408_v15 = vld [vmem:[%s9064_s4 + $0x350] ss:$8 sps:$4 sm:$0xff]  }
 0x3a1   :  { %4472 = vmatprep.subr.bf16.mxu0 %v6506_v37  ;;  %v6402_v31 = vld [vmem:[%s9064_s4 + $0x330] ss:$8 sps:$4 sm:$0xff]   ;;  %v6416_v37 = vld [vmem:[%s9064_s4 + $0x374] ss:$8 sps:$4 sm:$0xff]   ;;  %v6503_v63 = vld [vmem:[%s9064_s4 + $0x464] ss:$8 sps:$4 sm:$0xff]  }
 0x3a2   :  { %2014 = vst.msk [vmem:[#allocation2 + $0xb0] sm:$0xff] %vm1880_vm4, %v1875_v18  ;;  %v1876_v46 = vmax.f32 %v6074_v34, 0.0  ;;  %4537 = vmatpush1.bf16.msra.mxu1 %v6360_v51  ;;  %v6404_v18 = vld [vmem:[%s9064_s4 + $0x334] ss:$8 sps:$4 sm:$0xff]  }
 0x3a3   :  { %4538 = vmatprep.subr.bf16.mxu1 %v6365_v44  ;;  %v6399_v44 = vld [vmem:[%s9064_s4 + $0x320] ss:$8 sps:$4 sm:$0xff]  }
 0x3a4   :  { %2016 = vrot.lane.b32.xlu1 %v1876_v46, %s6905_s1  ;;  %4473 = vmatpush1.bf16.msra.mxu0 %v6504_v2  ;;  %v6410_v46 = vld [vmem:[%s9064_s4 + $0x354] ss:$8 sps:$4 sm:$0xff]  }
 0x3a5   :  { %v1817_v47 = vpop.f32.mrb[248].mxu0  ;;  %4474 = vmatprep.subr.bf16.mxu0 %v6512_v25  ;;  %v6435_v25 = vld [vmem:[%s9064_s4 + $0x3b0] ss:$8 sps:$4 sm:$0xff]  }
 0x3a6   :  { %v6075_v49 = vadd.f32 %v7860_v9, %v1817_v47  ;;  %4539 = vmatpush1.bf16.msra.mxu1 %v6363_v54  ;;  %v1933_v58 = vpop.permute.xlu1 %1932  ;;  %v5999_v13 = vpop.f32.mrb[249].mxu0  ;;  %v2034_v21 = vld [vmem:[#allocation2 + $0x38] sm:$0xff]  ;;  %v6411_v47 = vld [vmem:[%s9064_s4 + $0x360] ss:$8 sps:$4 sm:$0xff]  }
 0x3a7   :  { %1935 = vst.msk [vmem:[#allocation2 + $0x40] sm:$0xff] %vm1886_vm5, %v1933_v58  ;;  %v1820_v43 = vpop.f32.mrb[250].mxu0  ;;  %4540 = vmatprep.subr.bf16.mxu1 %v6368_v28  ;;  %v2059_v20 = vpack.c.bf16 %v2034_v21, %v2034_v21  ;;  %v6413_v28 = vld [vmem:[%s9064_s4 + $0x364] ss:$8 sps:$4 sm:$0xff]   ;;  %v6417_v13 = vld [vmem:[%s9064_s4 + $0x380] ss:$8 sps:$4 sm:$0xff]  }
 0x3a8   :  { %v1877_v35 = vmax.f32 %v6075_v49, 0.0  ;;  %v6076_v0 = vadd.f32 %v7860_v9, %v1820_v43  ;;  %1883 = vrot.lane.b32.xlu1 %v1832_v60, %s6905_s1  ;;  %v6000_v30 = vpop.f32.mrb[251].mxu0  ;;  %4475 = vmatpush1.bf16.msra.mxu0 %v6510_v10  ;;  %v6414_v49 = vld [vmem:[%s9064_s4 + $0x370] ss:$8 sps:$4 sm:$0xff]   ;;  %v6419_v58 = vld [vmem:[%s9064_s4 + $0x384] ss:$8 sps:$4 sm:$0xff]  }
 0x3a9   :  { %v6423_v43 = vld [vmem:[%s9064_s4 + $0x390] ss:$8 sps:$4 sm:$0xff]  }
 0x3aa   :  { %2020 = vst.msk [vmem:[#allocation2 + $0xb8] sm:$0xff] %vm1880_vm4, %v1877_v35  ;;  %v1878_v29 = vmax.f32 %v6076_v0, 0.0  ;;  %4541 = vmatpush1.bf16.msra.mxu1 %v6366_v61  ;;  %v6425_v61 = vld [vmem:[%s9064_s4 + $0x394] ss:$8 sps:$4 sm:$0xff]   ;;  %v6429_v35 = vld [vmem:[%s9064_s4 + $0x3a0] ss:$8 sps:$4 sm:$0xff]  }
 0x3ab   :  { %4542 = vmatprep.subr.bf16.mxu1 %v6371_v59  ;;  %v6431_v59 = vld [vmem:[%s9064_s4 + $0x3a4] ss:$8 sps:$4 sm:$0xff]   ;;  %v6437_v0 = vld [vmem:[%s9064_s4 + $0x3b4] ss:$8 sps:$4 sm:$0xff]  }
 0x3ac   :  { %2022 = vrot.lane.b32.xlu0 %v1878_v29, %s6905_s1  ;;  %v6441_v29 = vld [vmem:[%s9064_s4 + $0x3c0] ss:$8 sps:$4 sm:$0xff]  }
 0x3ad   :  { %v1825_v26 = vpop.f32.mrb[252].mxu0 }
 0x3ae   :  { %v6077_v52 = vadd.f32 %v7860_v9, %v1825_v26  ;;  %4543 = vmatpush1.bf16.msra.mxu1 %v6369_v14  ;;  %v1939_v24 = vpop.permute.xlu0 %1938  ;;  %v6003_v53 = vpop.f32.mrb[253].mxu0  ;;  %v6375_v9 = vld [vmem:[%s9064_s4 + $0x2a0] ss:$8 sps:$4 sm:$0xff]   ;;  %v6449_v14 = vld [vmem:[%s9064_s4 + $0x3d4] ss:$8 sps:$4 sm:$0xff]  }
 0x3af   :  { %1941 = vst.msk [vmem:[#allocation2 + $0x48] sm:$0xff] %vm1886_vm5, %v1939_v24  ;;  %v1828_v57 = vpop.f32.mrb[254].mxu0  ;;  %4544 = vmatprep.subr.bf16.mxu1 %v6374_v40  ;;  %v6447_v40 = vld [vmem:[%s9064_s4 + $0x3d0] ss:$8 sps:$4 sm:$0xff]   ;;  %v6455_v26 = vld [vmem:[%s9064_s4 + $0x3e4] ss:$8 sps:$4 sm:$0xff]  }
 0x3b0   :  { %v1879_v8 = vmax.f32 %v6077_v52, 0.0  ;;  %1890 = vrot.lane.b32.xlu0 %v1834_v39, %s6905_s1  ;;  %v6004_v22 = vpop.f32.mrb[255].mxu0  ;;  %v6453_v39 = vld [vmem:[%s9064_s4 + $0x3e0] ss:$8 sps:$4 sm:$0xff]   ;;  %v6461_v52 = vld [vmem:[%s9064_s4 + $0x3f4] ss:$8 sps:$4 sm:$0xff]  }
 0x3b1   :  { %v6459_v53 = vld [vmem:[%s9064_s4 + $0x3f0] ss:$8 sps:$4 sm:$0xff]  }
 0x3b2   :  { %2026 = vst.msk [vmem:[#allocation2 + $0xc0] sm:$0xff] %vm1880_vm4, %v1879_v8  ;;  %4545 = vmatpush1.bf16.msra.mxu1 %v6372_v45  ;;  %v6467_v45 = vld [vmem:[%s9064_s4 + $0x404] ss:$8 sps:$4 sm:$0xff]   ;;  %v2033_v57 = vld [vmem:[#allocation2 + $0x30] sm:$0xff]  ;;  %v6465_v8 = vld [vmem:[%s9064_s4 + $0x400] ss:$8 sps:$4 sm:$0xff]  }
 0x3b3   :  { %4546 = vmatprep.subr.bf16.mxu1 %v6377_v19  ;;  %v2058_v22 = vpack.c.bf16 %v2033_v57, %v2033_v57  ;;  %v6558_v57 = vld [vmem:[%s9064_s4 + $0x570] ss:$8 sps:$4 sm:$0xff]  }
 0x3b6   :  { %4547 = vmatpush1.bf16.msra.mxu1 %v6375_v9  ;;  %v1945_v7 = vpop.permute.xlu1 %1944  ;;  %v2036_v19 = vld [vmem:[#allocation2 + $0x48] sm:$0xff]  ;;  %v6473_v9 = vld [vmem:[%s9064_s4 + $0x414] ss:$8 sps:$4 sm:$0xff]  }
 0x3b7   :  { %1947 = vst.msk [vmem:[#allocation2 + $0x50] sm:$0xff] %vm1886_vm5, %v1945_v7  ;;  %4548 = vmatprep.subr.bf16.mxu1 %v6380_v56  ;;  %v2061_v56 = vpack.c.bf16 %v2036_v19, %v2036_v19  ;;  %v6563_v19 = vld [vmem:[%s9064_s4 + $0x584] ss:$8 sps:$4 sm:$0xff]  }
 0x3ba   :  { %4549 = vmatpush1.bf16.msra.mxu1 %v6378_v55  ;;  %v6471_v55 = vld [vmem:[%s9064_s4 + $0x410] ss:$8 sps:$4 sm:$0xff]  }
 0x3bb   :  { %4550 = vmatprep.subr.bf16.mxu1 %v6383_v23  ;;  %v6479_v23 = vld [vmem:[%s9064_s4 + $0x424] ss:$8 sps:$4 sm:$0xff]  }
 0x3be   :  { %4551 = vmatpush1.bf16.msra.mxu1 %v6381_v42  ;;  %v1951_v3 = vpop.permute.xlu0 %1950  ;;  %v6477_v42 = vld [vmem:[%s9064_s4 + $0x420] ss:$8 sps:$4 sm:$0xff]  }
 0x3bf   :  { %1953 = vst.msk [vmem:[#allocation2 + $0x58] sm:$0xff] %vm1886_vm5, %v1951_v3  ;;  %4552 = vmatprep.subr.bf16.mxu1 %v6386_v17  ;;  %v6485_v17 = vld [vmem:[%s9064_s4 + $0x434] ss:$8 sps:$4 sm:$0xff]  }
 0x3c2   :  { %4553 = vmatpush1.bf16.msra.mxu1 %v6384_v62  ;;  %v6483_v62 = vld [vmem:[%s9064_s4 + $0x430] ss:$8 sps:$4 sm:$0xff]  }
 0x3c3   :  { %4554 = vmatprep.subr.bf16.mxu1 %v6389_v36  ;;  %v6491_v36 = vld [vmem:[%s9064_s4 + $0x444] ss:$8 sps:$4 sm:$0xff]  }
 0x3c6   :  { %4555 = vmatpush1.bf16.msra.mxu1 %v6387_v6  ;;  %v1957_v32 = vpop.permute.xlu1 %1956 }
 0x3c7   :  { %1959 = vst.msk [vmem:[#allocation2 + $0x60] sm:$0xff] %vm1886_vm5, %v1957_v32  ;;  %4556 = vmatprep.subr.bf16.mxu1 %v6392_v4  ;;  %v6489_v4 = vld [vmem:[%s9064_s4 + $0x440] ss:$8 sps:$4 sm:$0xff]   ;;  %v6497_v32 = vld [vmem:[%s9064_s4 + $0x454] ss:$8 sps:$4 sm:$0xff]  }
 0x3ca   :  { %4557 = vmatpush1.bf16.msra.mxu1 %v6390_v41 }
 0x3cb   :  { %4567 = vmatprep.subr.bf16.mxu1 %v6395_v33  ;;  %v6495_v33 = vld [vmem:[%s9064_s4 + $0x450] ss:$8 sps:$4 sm:$0xff]  }
 0x3cd   :  { %4559 = vmatmul.mubr.bf16.vlgmr.msra.gmra.mrb[44].mxu1 %v2056_v38  ;;  %v6509_v38 = vld [vmem:[%s9064_s4 + $0x474] ss:$8 sps:$4 sm:$0xff]  }
 0x3ce   :  { %4568 = vmatpush1.bf16.msra.mxu1 %v6393_v16  ;;  %4599 = vmatprep.mubr.bf16.mxu1 %v2059_v20  ;;  %v1963_v51 = vpop.permute.xlu0 %1962  ;;  %v6501_v16 = vld [vmem:[%s9064_s4 + $0x460] ss:$8 sps:$4 sm:$0xff]   ;;  %v6515_v20 = vld [vmem:[%s9064_s4 + $0x484] ss:$8 sps:$4 sm:$0xff]  }
 0x3cf   :  { %1965 = vst.msk [vmem:[#allocation2 + $0x68] sm:$0xff] %vm1886_vm5, %v1963_v51  ;;  %4569 = vmatprep.subr.bf16.mxu1 %v6398_v27  ;;  %v6507_v27 = vld [vmem:[%s9064_s4 + $0x470] ss:$8 sps:$4 sm:$0xff]  }
 0x3d2   :  { %4570 = vmatpush1.bf16.msra.mxu1 %v6396_v50  ;;  %v6513_v50 = vld [vmem:[%s9064_s4 + $0x480] ss:$8 sps:$4 sm:$0xff]  }
 0x3d3   :  { %4571 = vmatprep.subr.bf16.mxu1 %v6401_v48 }
 0x3d6   :  { %4572 = vmatpush1.bf16.msra.mxu1 %v6399_v44  ;;  %v1969_v34 = vpop.permute.xlu1 %1968 }
 0x3d7   :  { %1971 = vst.msk [vmem:[#allocation2 + $0x70] sm:$0xff] %vm1886_vm5, %v1969_v34  ;;  %4573 = vmatprep.subr.bf16.mxu1 %v6404_v18  ;;  %v6518_v18 = vld [vmem:[%s9064_s4 + $0x494] ss:$8 sps:$4 sm:$0xff]  }
 0x3da   :  { %4574 = vmatpush1.bf16.msra.mxu1 %v6402_v31  ;;  %v6516_v31 = vld [vmem:[%s9064_s4 + $0x490] ss:$8 sps:$4 sm:$0xff]  }
 0x3db   :  { %4575 = vmatprep.subr.bf16.mxu1 %v6407_v11  ;;  %v6521_v11 = vld [vmem:[%s9064_s4 + $0x4a4] ss:$8 sps:$4 sm:$0xff]  }
 0x3de   :  { %4576 = vmatpush1.bf16.msra.mxu1 %v6405_v12  ;;  %v1975_v54 = vpop.permute.xlu0 %1974  ;;  %v6519_v12 = vld [vmem:[%s9064_s4 + $0x4a0] ss:$8 sps:$4 sm:$0xff]  }
 0x3df   :  { %1977 = vst.msk [vmem:[#allocation2 + $0x78] sm:$0xff] %vm1886_vm5, %v1975_v54  ;;  %4577 = vmatprep.subr.bf16.mxu1 %v6410_v46  ;;  %v6524_v46 = vld [vmem:[%s9064_s4 + $0x4b4] ss:$8 sps:$4 sm:$0xff]   ;;  %v6522_v54 = vld [vmem:[%s9064_s4 + $0x4b0] ss:$8 sps:$4 sm:$0xff]  }
 0x3e2   :  { %4578 = vmatpush1.bf16.msra.mxu1 %v6408_v15  ;;  %v6527_v15 = vld [vmem:[%s9064_s4 + $0x4c4] ss:$8 sps:$4 sm:$0xff]  }
 0x3e3   :  { %4579 = vmatprep.subr.bf16.mxu1 %v6413_v28  ;;  %v6525_v28 = vld [vmem:[%s9064_s4 + $0x4c0] ss:$8 sps:$4 sm:$0xff]  }
 0x3e6   :  { %4580 = vmatpush1.bf16.msra.mxu1 %v6411_v47  ;;  %v1981_v60 = vpop.permute.xlu1 %1980  ;;  %v6530_v47 = vld [vmem:[%s9064_s4 + $0x4d4] ss:$8 sps:$4 sm:$0xff]  }
 0x3e7   :  { %1983 = vst.msk [vmem:[#allocation2 + $0x80] sm:$0xff] %vm1886_vm5, %v1981_v60  ;;  %4581 = vmatprep.subr.bf16.mxu1 %v6416_v37  ;;  %v6528_v37 = vld [vmem:[%s9064_s4 + $0x4d0] ss:$8 sps:$4 sm:$0xff]   ;;  %v6533_v60 = vld [vmem:[%s9064_s4 + $0x4e4] ss:$8 sps:$4 sm:$0xff]  }
 0x3ea   :  { %4582 = vmatpush1.bf16.msra.mxu1 %v6414_v49  ;;  %v6531_v49 = vld [vmem:[%s9064_s4 + $0x4e0] ss:$8 sps:$4 sm:$0xff]  }
 0x3eb   :  { %4583 = vmatprep.subr.bf16.mxu1 %v6419_v58  ;;  %v6536_v58 = vld [vmem:[%s9064_s4 + $0x4f4] ss:$8 sps:$4 sm:$0xff]  }
 0x3ee   :  { %4584 = vmatpush1.bf16.msra.mxu1 %v6417_v13  ;;  %v1987_v2 = vpop.permute.xlu0 %1986  ;;  %v6534_v13 = vld [vmem:[%s9064_s4 + $0x4f0] ss:$8 sps:$4 sm:$0xff]  }
 0x3ef   :  { %1989 = vst.msk [vmem:[#allocation2 + $0x88] sm:$0xff] %vm1886_vm5, %v1987_v2  ;;  %4585 = vmatprep.subr.bf16.mxu1 %v6425_v61  ;;  %v6539_v61 = vld [vmem:[%s9064_s4 + $0x504] ss:$8 sps:$4 sm:$0xff]  }
 0x3f0   :  { %v2035_v2 = vld [vmem:[#allocation2 + $0x40] sm:$0xff] }
 0x3f2   :  { %4586 = vmatpush1.bf16.msra.mxu1 %v6423_v43  ;;  %v2038_v43 = vld [vmem:[#allocation2 + $0x58] sm:$0xff] }
 0x3f3   :  { %4587 = vmatprep.subr.bf16.mxu1 %v6431_v59  ;;  %v6537_v59 = vld [vmem:[%s9064_s4 + $0x500] ss:$8 sps:$4 sm:$0xff]  }
 0x3f6   :  { %4588 = vmatpush1.bf16.msra.mxu1 %v6429_v35  ;;  %v1993_v30 = vpop.permute.xlu1 %1992  ;;  %v2060_v35 = vpack.c.bf16 %v2035_v2, %v2035_v2  ;;  %v6623_v2 = vld [vmem:[%s9064_s4 + $0x6c4] ss:$8 sps:$4 sm:$0xff]  }
 0x3f7   :  { %1995 = vst.msk [vmem:[#allocation2 + $0x90] sm:$0xff] %vm1886_vm5, %v1993_v30  ;;  %4589 = vmatprep.subr.bf16.mxu1 %v6437_v0  ;;  %v6542_v0 = vld [vmem:[%s9064_s4 + $0x514] ss:$8 sps:$4 sm:$0xff]   ;;  %v2063_v30 = vpack.c.bf16 %v2038_v43, %v2038_v43  ;;  %v6621_v43 = vld [vmem:[%s9064_s4 + $0x6c0] ss:$8 sps:$4 sm:$0xff]  }
 0x3fa   :  { %4590 = vmatpush1.bf16.msra.mxu1 %v6435_v25  ;;  %v6540_v25 = vld [vmem:[%s9064_s4 + $0x510] ss:$8 sps:$4 sm:$0xff]  }
 0x3fb   :  { %4591 = vmatprep.subr.bf16.mxu1 %v6443_v5  ;;  %v6545_v5 = vld [vmem:[%s9064_s4 + $0x524] ss:$8 sps:$4 sm:$0xff]  }
 0x3fe   :  { %4592 = vmatpush1.bf16.msra.mxu1 %v6441_v29  ;;  %v1999_v10 = vpop.permute.xlu0 %1998  ;;  %v6543_v29 = vld [vmem:[%s9064_s4 + $0x520] ss:$8 sps:$4 sm:$0xff]  }
 0x3ff   :  { %2001 = vst.msk [vmem:[#allocation2 + $0x98] sm:$0xff] %vm1886_vm5, %v1999_v10  ;;  %4593 = vmatprep.subr.bf16.mxu1 %v6449_v14  ;;  %v6548_v14 = vld [vmem:[%s9064_s4 + $0x534] ss:$8 sps:$4 sm:$0xff]   ;;  %v6546_v10 = vld [vmem:[%s9064_s4 + $0x530] ss:$8 sps:$4 sm:$0xff]  }
 0x402   :  { %4594 = vmatpush1.bf16.msra.mxu1 %v6447_v40  ;;  %v6551_v40 = vld [vmem:[%s9064_s4 + $0x544] ss:$8 sps:$4 sm:$0xff]  }
 0x403   :  { %4595 = vmatprep.subr.bf16.mxu1 %v6455_v26  ;;  %v6549_v26 = vld [vmem:[%s9064_s4 + $0x540] ss:$8 sps:$4 sm:$0xff]  }
 0x406   :  { %4596 = vmatpush1.bf16.msra.mxu1 %v6453_v39  ;;  %v2005_v24 = vpop.permute.xlu1 %2004  ;;  %v6554_v39 = vld [vmem:[%s9064_s4 + $0x554] ss:$8 sps:$4 sm:$0xff]  }
 0x407   :  { %2007 = vst.msk [vmem:[#allocation2 + $0xa0] sm:$0xff] %vm1886_vm5, %v2005_v24  ;;  %4597 = vmatprep.subr.bf16.mxu1 %v6461_v52  ;;  %v6552_v52 = vld [vmem:[%s9064_s4 + $0x550] ss:$8 sps:$4 sm:$0xff]   ;;  %v6557_v24 = vld [vmem:[%s9064_s4 + $0x564] ss:$8 sps:$4 sm:$0xff]  }
 0x40a   :  { %4598 = vmatpush1.bf16.msra.mxu1 %v6459_v53  ;;  %v6555_v53 = vld [vmem:[%s9064_s4 + $0x560] ss:$8 sps:$4 sm:$0xff]  }
 0x40b   :  { %4608 = vmatprep.subr.bf16.mxu1 %v6467_v45  ;;  %v6560_v45 = vld [vmem:[%s9064_s4 + $0x574] ss:$8 sps:$4 sm:$0xff]  }
 0x40d   :  { %4600 = vmatmul.mubr.bf16.vlgmr.msra.gmra.mrb[44].mxu1 %v2058_v22  ;;  %v6566_v22 = vld [vmem:[%s9064_s4 + $0x594] ss:$8 sps:$4 sm:$0xff]  }
 0x40e   :  { %4609 = vmatpush1.bf16.msra.mxu1 %v6465_v8  ;;  %4640 = vmatprep.mubr.bf16.mxu1 %v2061_v56  ;;  %v2011_v7 = vpop.permute.xlu0 %2010  ;;  %v6561_v8 = vld [vmem:[%s9064_s4 + $0x580] ss:$8 sps:$4 sm:$0xff]   ;;  %v6569_v56 = vld [vmem:[%s9064_s4 + $0x5a4] ss:$8 sps:$4 sm:$0xff]  }
 0x40f   :  { %2013 = vst.msk [vmem:[#allocation2 + $0xa8] sm:$0xff] %vm1886_vm5, %v2011_v7  ;;  %4610 = vmatprep.subr.bf16.mxu1 %v6473_v9  ;;  %v6564_v9 = vld [vmem:[%s9064_s4 + $0x590] ss:$8 sps:$4 sm:$0xff]   ;;  %v6567_v7 = vld [vmem:[%s9064_s4 + $0x5a0] ss:$8 sps:$4 sm:$0xff]  }
 0x412   :  { %4611 = vmatpush1.bf16.msra.mxu1 %v6471_v55  ;;  %v6572_v55 = vld [vmem:[%s9064_s4 + $0x5b4] ss:$8 sps:$4 sm:$0xff]  }
 0x413   :  { %4612 = vmatprep.subr.bf16.mxu1 %v6479_v23  ;;  %v6570_v23 = vld [vmem:[%s9064_s4 + $0x5b0] ss:$8 sps:$4 sm:$0xff]  }
 0x416   :  { %4613 = vmatpush1.bf16.msra.mxu1 %v6477_v42  ;;  %v2017_v3 = vpop.permute.xlu1 %2016  ;;  %v6575_v42 = vld [vmem:[%s9064_s4 + $0x5c4] ss:$8 sps:$4 sm:$0xff]  }
 0x417   :  { %2019 = vst.msk [vmem:[#allocation2 + $0xb0] sm:$0xff] %vm1886_vm5, %v2017_v3  ;;  %4614 = vmatprep.subr.bf16.mxu1 %v6485_v17  ;;  %v6573_v17 = vld [vmem:[%s9064_s4 + $0x5c0] ss:$8 sps:$4 sm:$0xff]   ;;  %v6578_v3 = vld [vmem:[%s9064_s4 + $0x5d4] ss:$8 sps:$4 sm:$0xff]  }
 0x41a   :  { %4615 = vmatpush1.bf16.msra.mxu1 %v6483_v62  ;;  %v1884_v6 = vpop.permute.xlu1 %1883  ;;  %v6576_v62 = vld [vmem:[%s9064_s4 + $0x5d0] ss:$8 sps:$4 sm:$0xff]  }
 0x41b   :  { %1887 = vst.msk [vmem:[#allocation2] sm:$0xff] %vm1886_vm5, %v1884_v6  ;;  %4616 = vmatprep.subr.bf16.mxu1 %v6491_v36  ;;  %v6581_v36 = vld [vmem:[%s9064_s4 + $0x5e4] ss:$8 sps:$4 sm:$0xff]   ;;  %v6579_v6 = vld [vmem:[%s9064_s4 + $0x5e0] ss:$8 sps:$4 sm:$0xff]  }
 0x41e   :  { %4617 = vmatpush1.bf16.msra.mxu1 %v6489_v4  ;;  %v2023_v41 = vpop.permute.xlu0 %2022  ;;  %v6584_v4 = vld [vmem:[%s9064_s4 + $0x5f4] ss:$8 sps:$4 sm:$0xff]  }
 0x41f   :  { %2025 = vst.msk [vmem:[#allocation2 + $0xb8] sm:$0xff] %vm1886_vm5, %v2023_v41  ;;  %4618 = vmatprep.subr.bf16.mxu1 %v6497_v32  ;;  %v6582_v32 = vld [vmem:[%s9064_s4 + $0x5f0] ss:$8 sps:$4 sm:$0xff]   ;;  %v6587_v41 = vld [vmem:[%s9064_s4 + $0x604] ss:$8 sps:$4 sm:$0xff]  }
 0x422   :  { %4619 = vmatpush1.bf16.msra.mxu1 %v6495_v33  ;;  %v1891_v21 = vpop.permute.xlu0 %1890  ;;  %v2027_v51 = vld [vmem:[#allocation2] sm:$0xff]  ;;  %v2037_v33 = vld [vmem:[#allocation2 + $0x50] sm:$0xff] }
 0x423   :  { %1893 = vst.msk [vmem:[#allocation2 + $0x8] sm:$0xff] %vm1886_vm5, %v1891_v21  ;;  %4620 = vmatprep.subr.bf16.mxu1 %v6503_v63  ;;  %v2052_v34 = vpack.c.bf16 %v2027_v51, %v2027_v51  ;;  %v2040_v63 = vld [vmem:[#allocation2 + $0x68] sm:$0xff] }
 0x424   :  { %v6585_v21 = vld [vmem:[%s9064_s4 + $0x600] ss:$8 sps:$4 sm:$0xff]   ;;  %v6593_v51 = vld [vmem:[%s9064_s4 + $0x624] ss:$8 sps:$4 sm:$0xff]  }
 0x426   :  { %4621 = vmatpush1.bf16.msra.mxu1 %v6501_v16  ;;  %v2062_v16 = vpack.c.bf16 %v2037_v33, %v2037_v33  ;;  %v6671_v33 = vld [vmem:[%s9064_s4 + $0x7c4] ss:$8 sps:$4 sm:$0xff]  }
 0x427   :  { %4622 = vmatprep.subr.bf16.mxu1 %v6509_v38  ;;  %v6590_v38 = vld [vmem:[%s9064_s4 + $0x614] ss:$8 sps:$4 sm:$0xff]  }
 0x42a   :  { %4623 = vmatpush1.bf16.msra.mxu1 %v6507_v27  ;;  %v2028_v48 = vld [vmem:[#allocation2 + $0x8] sm:$0xff]  ;;  %v2065_v27 = vpack.c.bf16 %v2040_v63, %v2040_v63 }
 0x42b   :  { %4624 = vmatprep.subr.bf16.mxu1 %v6515_v20  ;;  %v2053_v44 = vpack.c.bf16 %v2028_v48, %v2028_v48  ;;  %v6588_v20 = vld [vmem:[%s9064_s4 + $0x610] ss:$8 sps:$4 sm:$0xff]   ;;  %v6596_v48 = vld [vmem:[%s9064_s4 + $0x634] ss:$8 sps:$4 sm:$0xff]   ;;  %v6669_v63 = vld [vmem:[%s9064_s4 + $0x7c0] ss:$8 sps:$4 sm:$0xff]  }
 0x42d   :  { %4476 = vmatprep.mubr.bf16.mxu0 %v2053_v44  ;;  %v6594_v44 = vld [vmem:[%s9064_s4 + $0x630] ss:$8 sps:$4 sm:$0xff]  }
 0x42e   :  { %4625 = vmatpush1.bf16.msra.mxu1 %v6513_v50  ;;  %4477 = vmatmul.mubr.bf16.vlgmr.msra.gmra.mrb[0].mxu0 %v2052_v34  ;;  %v6591_v50 = vld [vmem:[%s9064_s4 + $0x620] ss:$8 sps:$4 sm:$0xff]  }
 0x42f   :  { %4626 = vmatprep.subr.bf16.mxu1 %v6518_v18  ;;  %v6599_v18 = vld [vmem:[%s9064_s4 + $0x644] ss:$8 sps:$4 sm:$0xff]   ;;  %v6597_v34 = vld [vmem:[%s9064_s4 + $0x640] ss:$8 sps:$4 sm:$0xff]  }
 0x432   :  { %4627 = vmatpush1.bf16.msra.mxu1 %v6516_v31  ;;  %v6602_v31 = vld [vmem:[%s9064_s4 + $0x654] ss:$8 sps:$4 sm:$0xff]  }
 0x433   :  { %4628 = vmatprep.subr.bf16.mxu1 %v6521_v11  ;;  %v6600_v11 = vld [vmem:[%s9064_s4 + $0x650] ss:$8 sps:$4 sm:$0xff]  }
 0x436   :  { %4629 = vmatpush1.bf16.msra.mxu1 %v6519_v12  ;;  %v6605_v12 = vld [vmem:[%s9064_s4 + $0x664] ss:$8 sps:$4 sm:$0xff]  }
 0x437   :  { %4630 = vmatprep.subr.bf16.mxu1 %v6524_v46  ;;  %v6603_v46 = vld [vmem:[%s9064_s4 + $0x660] ss:$8 sps:$4 sm:$0xff]  }
 0x43a   :  { %4631 = vmatpush1.bf16.msra.mxu1 %v6522_v54  ;;  %v6608_v54 = vld [vmem:[%s9064_s4 + $0x674] ss:$8 sps:$4 sm:$0xff]  }
 0x43b   :  { %4632 = vmatprep.subr.bf16.mxu1 %v6527_v15  ;;  %v6606_v15 = vld [vmem:[%s9064_s4 + $0x670] ss:$8 sps:$4 sm:$0xff]  }
 0x43e   :  { %4633 = vmatpush1.bf16.msra.mxu1 %v6525_v28  ;;  %v6611_v28 = vld [vmem:[%s9064_s4 + $0x684] ss:$8 sps:$4 sm:$0xff]  }
 0x43f   :  { %4634 = vmatprep.subr.bf16.mxu1 %v6530_v47  ;;  %v6609_v47 = vld [vmem:[%s9064_s4 + $0x680] ss:$8 sps:$4 sm:$0xff]  }
 0x442   :  { %4635 = vmatpush1.bf16.msra.mxu1 %v6528_v37  ;;  %v6614_v37 = vld [vmem:[%s9064_s4 + $0x694] ss:$8 sps:$4 sm:$0xff]  }
 0x443   :  { %4636 = vmatprep.subr.bf16.mxu1 %v6533_v60  ;;  %v6612_v60 = vld [vmem:[%s9064_s4 + $0x690] ss:$8 sps:$4 sm:$0xff]  }
 0x446   :  { %4637 = vmatpush1.bf16.msra.mxu1 %v6531_v49  ;;  %v6617_v49 = vld [vmem:[%s9064_s4 + $0x6a4] ss:$8 sps:$4 sm:$0xff]  }
 0x447   :  { %4638 = vmatprep.subr.bf16.mxu1 %v6536_v58  ;;  %v6615_v58 = vld [vmem:[%s9064_s4 + $0x6a0] ss:$8 sps:$4 sm:$0xff]  }
 0x44a   :  { %4639 = vmatpush1.bf16.msra.mxu1 %v6534_v13  ;;  %v6620_v13 = vld [vmem:[%s9064_s4 + $0x6b4] ss:$8 sps:$4 sm:$0xff]  }
 0x44b   :  { %4649 = vmatprep.subr.bf16.mxu1 %v6539_v61  ;;  %v6618_v61 = vld [vmem:[%s9064_s4 + $0x6b0] ss:$8 sps:$4 sm:$0xff]  }
 0x44d   :  { %4641 = vmatmul.mubr.bf16.vlgmr.msra.gmra.mrb[44].mxu1 %v2060_v35  ;;  %v6624_v35 = vld [vmem:[%s9064_s4 + $0x6d0] ss:$8 sps:$4 sm:$0xff]  }
 0x44e   :  { %4650 = vmatpush1.bf16.msra.mxu1 %v6537_v59  ;;  %4681 = vmatprep.mubr.bf16.mxu1 %v2063_v30  ;;  %v6626_v59 = vld [vmem:[%s9064_s4 + $0x6d4] ss:$8 sps:$4 sm:$0xff]   ;;  %v6627_v30 = vld [vmem:[%s9064_s4 + $0x6e0] ss:$8 sps:$4 sm:$0xff]  }
 0x44f   :  { %4651 = vmatprep.subr.bf16.mxu1 %v6542_v0  ;;  %v6629_v0 = vld [vmem:[%s9064_s4 + $0x6e4] ss:$8 sps:$4 sm:$0xff]  }
 0x452   :  { %4652 = vmatpush1.bf16.msra.mxu1 %v6540_v25  ;;  %v6632_v25 = vld [vmem:[%s9064_s4 + $0x6f4] ss:$8 sps:$4 sm:$0xff]  }
 0x453   :  { %4653 = vmatprep.subr.bf16.mxu1 %v6545_v5  ;;  %v6630_v5 = vld [vmem:[%s9064_s4 + $0x6f0] ss:$8 sps:$4 sm:$0xff]  }
 0x456   :  { %4654 = vmatpush1.bf16.msra.mxu1 %v6543_v29  ;;  %v6635_v29 = vld [vmem:[%s9064_s4 + $0x704] ss:$8 sps:$4 sm:$0xff]  }
 0x457   :  { %4655 = vmatprep.subr.bf16.mxu1 %v6548_v14  ;;  %v2039_v14 = vld [vmem:[#allocation2 + $0x60] sm:$0xff] }
 0x45a   :  { %4656 = vmatpush1.bf16.msra.mxu1 %v6546_v10  ;;  %v2042_v10 = vld [vmem:[#allocation2 + $0x78] sm:$0xff] }
 0x45b   :  { %4657 = vmatprep.subr.bf16.mxu1 %v6551_v40  ;;  %v6633_v40 = vld [vmem:[%s9064_s4 + $0x700] ss:$8 sps:$4 sm:$0xff]  }
 0x45e   :  { %4658 = vmatpush1.bf16.msra.mxu1 %v6549_v26  ;;  %v2064_v26 = vpack.c.bf16 %v2039_v14, %v2039_v14  ;;  %v6713_v14 = vld [vmem:[%s9064_s4 + $0x8a4] ss:$8 sps:$4 sm:$0xff]  }
 0x45f   :  { %4659 = vmatprep.subr.bf16.mxu1 %v6554_v39  ;;  %v6638_v39 = vld [vmem:[%s9064_s4 + $0x714] ss:$8 sps:$4 sm:$0xff]  }
 0x462   :  { %4660 = vmatpush1.bf16.msra.mxu1 %v6552_v52  ;;  %v2067_v52 = vpack.c.bf16 %v2042_v10, %v2042_v10  ;;  %v6711_v10 = vld [vmem:[%s9064_s4 + $0x8a0] ss:$8 sps:$4 sm:$0xff]  }
 0x463   :  { %4661 = vmatprep.subr.bf16.mxu1 %v6557_v24  ;;  %v6636_v24 = vld [vmem:[%s9064_s4 + $0x710] ss:$8 sps:$4 sm:$0xff]  }
 0x466   :  { %4662 = vmatpush1.bf16.msra.mxu1 %v6555_v53  ;;  %v6641_v53 = vld [vmem:[%s9064_s4 + $0x724] ss:$8 sps:$4 sm:$0xff]  }
 0x467   :  { %4663 = vmatprep.subr.bf16.mxu1 %v6560_v45  ;;  %v6639_v45 = vld [vmem:[%s9064_s4 + $0x720] ss:$8 sps:$4 sm:$0xff]  }
 0x46a   :  { %4664 = vmatpush1.bf16.msra.mxu1 %v6558_v57  ;;  %v6644_v57 = vld [vmem:[%s9064_s4 + $0x734] ss:$8 sps:$4 sm:$0xff]  }
 0x46b   :  { %4665 = vmatprep.subr.bf16.mxu1 %v6563_v19  ;;  %v6642_v19 = vld [vmem:[%s9064_s4 + $0x730] ss:$8 sps:$4 sm:$0xff]  }
 0x46e   :  { %4666 = vmatpush1.bf16.msra.mxu1 %v6561_v8  ;;  %v6647_v8 = vld [vmem:[%s9064_s4 + $0x744] ss:$8 sps:$4 sm:$0xff]  }
 0x46f   :  { %4667 = vmatprep.subr.bf16.mxu1 %v6566_v22  ;;  %v6645_v22 = vld [vmem:[%s9064_s4 + $0x740] ss:$8 sps:$4 sm:$0xff]  }
 0x472   :  { %4668 = vmatpush1.bf16.msra.mxu1 %v6564_v9  ;;  %v6650_v9 = vld [vmem:[%s9064_s4 + $0x754] ss:$8 sps:$4 sm:$0xff]  }
 0x473   :  { %4669 = vmatprep.subr.bf16.mxu1 %v6569_v56  ;;  %v6648_v56 = vld [vmem:[%s9064_s4 + $0x750] ss:$8 sps:$4 sm:$0xff]  }
 0x476   :  { %4670 = vmatpush1.bf16.msra.mxu1 %v6567_v7  ;;  %v6653_v7 = vld [vmem:[%s9064_s4 + $0x764] ss:$8 sps:$4 sm:$0xff]  }
 0x477   :  { %4671 = vmatprep.subr.bf16.mxu1 %v6572_v55  ;;  %v6651_v55 = vld [vmem:[%s9064_s4 + $0x760] ss:$8 sps:$4 sm:$0xff]  }
 0x47a   :  { %4672 = vmatpush1.bf16.msra.mxu1 %v6570_v23  ;;  %v6656_v23 = vld [vmem:[%s9064_s4 + $0x774] ss:$8 sps:$4 sm:$0xff]  }
 0x47b   :  { %4673 = vmatprep.subr.bf16.mxu1 %v6575_v42  ;;  %v6654_v42 = vld [vmem:[%s9064_s4 + $0x770] ss:$8 sps:$4 sm:$0xff]  }
 0x47e   :  { %4674 = vmatpush1.bf16.msra.mxu1 %v6573_v17  ;;  %v6659_v17 = vld [vmem:[%s9064_s4 + $0x784] ss:$8 sps:$4 sm:$0xff]  }
 0x47f   :  { %4675 = vmatprep.subr.bf16.mxu1 %v6578_v3  ;;  %v6657_v3 = vld [vmem:[%s9064_s4 + $0x780] ss:$8 sps:$4 sm:$0xff]  }
 0x482   :  { %4676 = vmatpush1.bf16.msra.mxu1 %v6576_v62  ;;  %v6662_v62 = vld [vmem:[%s9064_s4 + $0x794] ss:$8 sps:$4 sm:$0xff]  }
 0x483   :  { %4677 = vmatprep.subr.bf16.mxu1 %v6581_v36  ;;  %v6660_v36 = vld [vmem:[%s9064_s4 + $0x790] ss:$8 sps:$4 sm:$0xff]  }
 0x486   :  { %4678 = vmatpush1.bf16.msra.mxu1 %v6579_v6  ;;  %v6665_v6 = vld [vmem:[%s9064_s4 + $0x7a4] ss:$8 sps:$4 sm:$0xff]  }
 0x487   :  { %4679 = vmatprep.subr.bf16.mxu1 %v6584_v4  ;;  %v6663_v4 = vld [vmem:[%s9064_s4 + $0x7a0] ss:$8 sps:$4 sm:$0xff]  }
 0x48a   :  { %4680 = vmatpush1.bf16.msra.mxu1 %v6582_v32  ;;  %v6668_v32 = vld [vmem:[%s9064_s4 + $0x7b4] ss:$8 sps:$4 sm:$0xff]  }
 0x48b   :  { %4690 = vmatprep.subr.bf16.mxu1 %v6587_v41  ;;  %v6666_v41 = vld [vmem:[%s9064_s4 + $0x7b0] ss:$8 sps:$4 sm:$0xff]  }
 0x48d   :  { %4682 = vmatmul.mubr.bf16.vlgmr.msra.gmra.mrb[44].mxu1 %v2062_v16  ;;  %v6672_v16 = vld [vmem:[%s9064_s4 + $0x7d0] ss:$8 sps:$4 sm:$0xff]  }
 0x48e   :  { %4691 = vmatpush1.bf16.msra.mxu1 %v6585_v21  ;;  %4722 = vmatprep.mubr.bf16.mxu1 %v2065_v27  ;;  %v6674_v21 = vld [vmem:[%s9064_s4 + $0x7d4] ss:$8 sps:$4 sm:$0xff]  }
 0x48f   :  { %4692 = vmatprep.subr.bf16.mxu1 %v6590_v38  ;;  %v6677_v38 = vld [vmem:[%s9064_s4 + $0x7e4] ss:$8 sps:$4 sm:$0xff]  }
 0x492   :  { %4693 = vmatpush1.bf16.msra.mxu1 %v6588_v20 }
 0x493   :  { %4694 = vmatprep.subr.bf16.mxu1 %v6593_v51  ;;  %v6675_v51 = vld [vmem:[%s9064_s4 + $0x7e0] ss:$8 sps:$4 sm:$0xff]  }
 0x496   :  { %4695 = vmatpush1.bf16.msra.mxu1 %v6591_v50 }
 0x497   :  { %4696 = vmatprep.subr.bf16.mxu1 %v6596_v48  ;;  %v6680_v48 = vld [vmem:[%s9064_s4 + $0x7f4] ss:$8 sps:$4 sm:$0xff]  }
 0x49a   :  { %4697 = vmatpush1.bf16.msra.mxu1 %v6594_v44 }
 0x49b   :  { %4698 = vmatprep.subr.bf16.mxu1 %v6599_v18  ;;  %v6678_v18 = vld [vmem:[%s9064_s4 + $0x7f0] ss:$8 sps:$4 sm:$0xff]  }
 0x49e   :  { %4699 = vmatpush1.bf16.msra.mxu1 %v6597_v34  ;;  %v6683_v34 = vld [vmem:[%s9064_s4 + $0x804] ss:$8 sps:$4 sm:$0xff]  }
 0x49f   :  { %4700 = vmatprep.subr.bf16.mxu1 %v6602_v31  ;;  %v2041_v31 = vld [vmem:[#allocation2 + $0x70] sm:$0xff] }
 0x4a2   :  { %4701 = vmatpush1.bf16.msra.mxu1 %v6600_v11  ;;  %v2044_v11 = vld [vmem:[#allocation2 + $0x88] sm:$0xff] }
 0x4a3   :  { %4702 = vmatprep.subr.bf16.mxu1 %v6605_v12  ;;  %v6681_v12 = vld [vmem:[%s9064_s4 + $0x800] ss:$8 sps:$4 sm:$0xff]  }
 0x4a6   :  { %4703 = vmatpush1.bf16.msra.mxu1 %v6603_v46  ;;  %v2066_v46 = vpack.c.bf16 %v2041_v31, %v2041_v31  ;;  %v6764_v31 = vld [vmem:[%s9064_s4 + $0x9b4] ss:$8 sps:$4 sm:$0xff]  }
 0x4a7   :  { %4704 = vmatprep.subr.bf16.mxu1 %v6608_v54  ;;  %v6686_v54 = vld [vmem:[%s9064_s4 + $0x814] ss:$8 sps:$4 sm:$0xff]  }
 0x4aa   :  { %4705 = vmatpush1.bf16.msra.mxu1 %v6606_v15  ;;  %v2069_v15 = vpack.c.bf16 %v2044_v11, %v2044_v11  ;;  %v6762_v11 = vld [vmem:[%s9064_s4 + $0x9b0] ss:$8 sps:$4 sm:$0xff]  }
 0x4ab   :  { %4706 = vmatprep.subr.bf16.mxu1 %v6611_v28  ;;  %v6684_v28 = vld [vmem:[%s9064_s4 + $0x810] ss:$8 sps:$4 sm:$0xff]  }
 0x4ae   :  { %4707 = vmatpush1.bf16.msra.mxu1 %v6609_v47  ;;  %v6689_v47 = vld [vmem:[%s9064_s4 + $0x824] ss:$8 sps:$4 sm:$0xff]  }
 0x4af   :  { %4708 = vmatprep.subr.bf16.mxu1 %v6614_v37  ;;  %v6687_v37 = vld [vmem:[%s9064_s4 + $0x820] ss:$8 sps:$4 sm:$0xff]  }
 0x4b2   :  { %4709 = vmatpush1.bf16.msra.mxu1 %v6612_v60  ;;  %v6692_v60 = vld [vmem:[%s9064_s4 + $0x834] ss:$8 sps:$4 sm:$0xff]  }
 0x4b3   :  { %4710 = vmatprep.subr.bf16.mxu1 %v6617_v49  ;;  %v6690_v49 = vld [vmem:[%s9064_s4 + $0x830] ss:$8 sps:$4 sm:$0xff]  }
 0x4b6   :  { %4711 = vmatpush1.bf16.msra.mxu1 %v6615_v58  ;;  %v6695_v58 = vld [vmem:[%s9064_s4 + $0x844] ss:$8 sps:$4 sm:$0xff]  }
 0x4b7   :  { %4712 = vmatprep.subr.bf16.mxu1 %v6620_v13  ;;  %v6693_v13 = vld [vmem:[%s9064_s4 + $0x840] ss:$8 sps:$4 sm:$0xff]  }
 0x4ba   :  { %4713 = vmatpush1.bf16.msra.mxu1 %v6618_v61  ;;  %v6698_v61 = vld [vmem:[%s9064_s4 + $0x854] ss:$8 sps:$4 sm:$0xff]  }
 0x4bb   :  { %4714 = vmatprep.subr.bf16.mxu1 %v6623_v2  ;;  %v6696_v2 = vld [vmem:[%s9064_s4 + $0x850] ss:$8 sps:$4 sm:$0xff]  }
 0x4be   :  { %4715 = vmatpush1.bf16.msra.mxu1 %v6621_v43  ;;  %v6701_v43 = vld [vmem:[%s9064_s4 + $0x864] ss:$8 sps:$4 sm:$0xff]  }
 0x4bf   :  { %4716 = vmatprep.subr.bf16.mxu1 %v6626_v59  ;;  %v6699_v59 = vld [vmem:[%s9064_s4 + $0x860] ss:$8 sps:$4 sm:$0xff]  }
 0x4c2   :  { %4717 = vmatpush1.bf16.msra.mxu1 %v6624_v35  ;;  %v6704_v35 = vld [vmem:[%s9064_s4 + $0x874] ss:$8 sps:$4 sm:$0xff]  }
 0x4c3   :  { %4718 = vmatprep.subr.bf16.mxu1 %v6629_v0  ;;  %v6702_v0 = vld [vmem:[%s9064_s4 + $0x870] ss:$8 sps:$4 sm:$0xff]  }
 0x4c6   :  { %4719 = vmatpush1.bf16.msra.mxu1 %v6627_v30  ;;  %v6707_v30 = vld [vmem:[%s9064_s4 + $0x884] ss:$8 sps:$4 sm:$0xff]  }
 0x4c7   :  { %4720 = vmatprep.subr.bf16.mxu1 %v6632_v25  ;;  %v6705_v25 = vld [vmem:[%s9064_s4 + $0x880] ss:$8 sps:$4 sm:$0xff]  }
 0x4ca   :  { %4721 = vmatpush1.bf16.msra.mxu1 %v6630_v5  ;;  %v6710_v5 = vld [vmem:[%s9064_s4 + $0x894] ss:$8 sps:$4 sm:$0xff]  }
 0x4cb   :  { %4731 = vmatprep.subr.bf16.mxu1 %v6635_v29  ;;  %v6708_v29 = vld [vmem:[%s9064_s4 + $0x890] ss:$8 sps:$4 sm:$0xff]  }
 0x4cd   :  { %4723 = vmatmul.mubr.bf16.vlgmr.msra.gmra.mrb[44].mxu1 %v2064_v26  ;;  %v6714_v26 = vld [vmem:[%s9064_s4 + $0x8b0] ss:$8 sps:$4 sm:$0xff]  }
 0x4ce   :  { %4732 = vmatpush1.bf16.msra.mxu1 %v6633_v40  ;;  %4763 = vmatprep.mubr.bf16.mxu1 %v2067_v52  ;;  %v6716_v40 = vld [vmem:[%s9064_s4 + $0x8b4] ss:$8 sps:$4 sm:$0xff]   ;;  %v6717_v52 = vld [vmem:[%s9064_s4 + $0x8c0] ss:$8 sps:$4 sm:$0xff]  }
 0x4cf   :  { %4733 = vmatprep.subr.bf16.mxu1 %v6638_v39  ;;  %v6719_v39 = vld [vmem:[%s9064_s4 + $0x8c4] ss:$8 sps:$4 sm:$0xff]  }
 0x4d2   :  { %4734 = vmatpush1.bf16.msra.mxu1 %v6636_v24  ;;  %v6722_v24 = vld [vmem:[%s9064_s4 + $0x8d4] ss:$8 sps:$4 sm:$0xff]  }
 0x4d3   :  { %4735 = vmatprep.subr.bf16.mxu1 %v6641_v53  ;;  %v6720_v53 = vld [vmem:[%s9064_s4 + $0x8d0] ss:$8 sps:$4 sm:$0xff]  }
 0x4d6   :  { %4736 = vmatpush1.bf16.msra.mxu1 %v6639_v45  ;;  %v6725_v45 = vld [vmem:[%s9064_s4 + $0x8e4] ss:$8 sps:$4 sm:$0xff]  }
 0x4d7   :  { %4737 = vmatprep.subr.bf16.mxu1 %v6644_v57  ;;  %v6723_v57 = vld [vmem:[%s9064_s4 + $0x8e0] ss:$8 sps:$4 sm:$0xff]  }
 0x4da   :  { %4738 = vmatpush1.bf16.msra.mxu1 %v6642_v19  ;;  %v6728_v19 = vld [vmem:[%s9064_s4 + $0x8f4] ss:$8 sps:$4 sm:$0xff]  }
 0x4db   :  { %4739 = vmatprep.subr.bf16.mxu1 %v6647_v8  ;;  %v6726_v8 = vld [vmem:[%s9064_s4 + $0x8f0] ss:$8 sps:$4 sm:$0xff]  }
 0x4de   :  { %4740 = vmatpush1.bf16.msra.mxu1 %v6645_v22  ;;  %v6731_v22 = vld [vmem:[%s9064_s4 + $0x904] ss:$8 sps:$4 sm:$0xff]  }
 0x4df   :  { %4741 = vmatprep.subr.bf16.mxu1 %v6650_v9  ;;  %v2043_v9 = vld [vmem:[#allocation2 + $0x80] sm:$0xff] }
 0x4e2   :  { %4742 = vmatpush1.bf16.msra.mxu1 %v6648_v56  ;;  %v2046_v56 = vld [vmem:[#allocation2 + $0x98] sm:$0xff] }
 0x4e3   :  { %4743 = vmatprep.subr.bf16.mxu1 %v6653_v7  ;;  %v6729_v7 = vld [vmem:[%s9064_s4 + $0x900] ss:$8 sps:$4 sm:$0xff]  }
 0x4e6   :  { %4744 = vmatpush1.bf16.msra.mxu1 %v6651_v55  ;;  %v2068_v55 = vpack.c.bf16 %v2043_v9, %v2043_v9  ;;  %v6891_v9 = vld [vmem:[%s9066_s6 + $0x58] sm:$0xff]  }
 0x4e7   :  { %4745 = vmatprep.subr.bf16.mxu1 %v6656_v23  ;;  %v6734_v23 = vld [vmem:[%s9064_s4 + $0x914] ss:$8 sps:$4 sm:$0xff]  }
 0x4ea   :  { %4746 = vmatpush1.bf16.msra.mxu1 %v6654_v42  ;;  %v2071_v42 = vpack.c.bf16 %v2046_v56, %v2046_v56  ;;  %v6803_v56 = vld [vmem:[%s9064_s4 + $0xa84] ss:$8 sps:$4 sm:$0xff]  }
 0x4eb   :  { %4747 = vmatprep.subr.bf16.mxu1 %v6659_v17  ;;  %v6732_v17 = vld [vmem:[%s9064_s4 + $0x910] ss:$8 sps:$4 sm:$0xff]  }
 0x4ee   :  { %4748 = vmatpush1.bf16.msra.mxu1 %v6657_v3  ;;  %v6737_v3 = vld [vmem:[%s9064_s4 + $0x924] ss:$8 sps:$4 sm:$0xff]  }
 0x4ef   :  { %4749 = vmatprep.subr.bf16.mxu1 %v6662_v62  ;;  %v6735_v62 = vld [vmem:[%s9064_s4 + $0x920] ss:$8 sps:$4 sm:$0xff]  }
 0x4f2   :  { %4750 = vmatpush1.bf16.msra.mxu1 %v6660_v36  ;;  %v6740_v36 = vld [vmem:[%s9064_s4 + $0x934] ss:$8 sps:$4 sm:$0xff]  }
 0x4f3   :  { %4751 = vmatprep.subr.bf16.mxu1 %v6665_v6  ;;  %v6738_v6 = vld [vmem:[%s9064_s4 + $0x930] ss:$8 sps:$4 sm:$0xff]  }
 0x4f6   :  { %4752 = vmatpush1.bf16.msra.mxu1 %v6663_v4  ;;  %v6743_v4 = vld [vmem:[%s9064_s4 + $0x944] ss:$8 sps:$4 sm:$0xff]  }
 0x4f7   :  { %4753 = vmatprep.subr.bf16.mxu1 %v6668_v32  ;;  %v6741_v32 = vld [vmem:[%s9064_s4 + $0x940] ss:$8 sps:$4 sm:$0xff]  }
 0x4fa   :  { %4754 = vmatpush1.bf16.msra.mxu1 %v6666_v41  ;;  %v6746_v41 = vld [vmem:[%s9064_s4 + $0x954] ss:$8 sps:$4 sm:$0xff]  }
 0x4fb   :  { %4755 = vmatprep.subr.bf16.mxu1 %v6671_v33  ;;  %v6744_v33 = vld [vmem:[%s9064_s4 + $0x950] ss:$8 sps:$4 sm:$0xff]  }
 0x4fe   :  { %4756 = vmatpush1.bf16.msra.mxu1 %v6669_v63  ;;  %v6749_v63 = vld [vmem:[%s9064_s4 + $0x964] ss:$8 sps:$4 sm:$0xff]  }
 0x4ff   :  { %4757 = vmatprep.subr.bf16.mxu1 %v6674_v21  ;;  %v6747_v21 = vld [vmem:[%s9064_s4 + $0x960] ss:$8 sps:$4 sm:$0xff]  }
 0x501   :  { %v8579_v27 = vpop.f32.mrb[0].mxu0 }
 0x502   :  { %4758 = vmatpush1.bf16.msra.mxu1 %v6672_v16  ;;  %v8581_v20 = vpop.f32.mrb[1].mxu0  ;;  %v6752_v16 = vld [vmem:[%s9064_s4 + $0x974] ss:$8 sps:$4 sm:$0xff]  }
 0x503   :  { %v4482_v50 = vpop.f32.mrb[2].mxu0  ;;  %4759 = vmatprep.subr.bf16.mxu1 %v6677_v38  ;;  %v6750_v38 = vld [vmem:[%s9064_s4 + $0x970] ss:$8 sps:$4 sm:$0xff]  }
 0x504   :  { %v4483_v44 = vpop.f32.mrb[3].mxu0  ;;  %v6753_v50 = vld [vmem:[%s9064_s4 + $0x980] ss:$8 sps:$4 sm:$0xff]  }
 0x505   :  { %v6756_v44 = vld [vmem:[%s9064_s4 + $0x990] ss:$8 sps:$4 sm:$0xff]  }
 0x506   :  { %4760 = vmatpush1.bf16.msra.mxu1 %v6675_v51  ;;  %v6755_v51 = vld [vmem:[%s9064_s4 + $0x984] ss:$8 sps:$4 sm:$0xff]  }
 0x507   :  { %4761 = vmatprep.subr.bf16.mxu1 %v6680_v48  ;;  %v6758_v48 = vld [vmem:[%s9064_s4 + $0x994] ss:$8 sps:$4 sm:$0xff]  }
 0x50a   :  { %4762 = vmatpush1.bf16.msra.mxu1 %v6678_v18  ;;  %v6761_v18 = vld [vmem:[%s9064_s4 + $0x9a4] ss:$8 sps:$4 sm:$0xff]  }
 0x50b   :  { %4772 = vmatprep.subr.bf16.mxu1 %v6683_v34  ;;  %v6759_v34 = vld [vmem:[%s9064_s4 + $0x9a0] ss:$8 sps:$4 sm:$0xff]  }
 0x50d   :  { %4764 = vmatmul.mubr.bf16.vlgmr.msra.gmra.mrb[44].mxu1 %v2066_v46  ;;  %v6765_v46 = vld [vmem:[%s9064_s4 + $0x9c0] ss:$8 sps:$4 sm:$0xff]  }
 0x50e   :  { %4773 = vmatpush1.bf16.msra.mxu1 %v6681_v12  ;;  %4804 = vmatprep.mubr.bf16.mxu1 %v2069_v15  ;;  %v6767_v12 = vld [vmem:[%s9064_s4 + $0x9c4] ss:$8 sps:$4 sm:$0xff]   ;;  %v6768_v15 = vld [vmem:[%s9064_s4 + $0x9d0] ss:$8 sps:$4 sm:$0xff]  }
 0x50f   :  { %4774 = vmatprep.subr.bf16.mxu1 %v6686_v54  ;;  %v6770_v54 = vld [vmem:[%s9064_s4 + $0x9d4] ss:$8 sps:$4 sm:$0xff]  }
 0x512   :  { %4775 = vmatpush1.bf16.msra.mxu1 %v6684_v28  ;;  %v6773_v28 = vld [vmem:[%s9064_s4 + $0x9e4] ss:$8 sps:$4 sm:$0xff]  }
 0x513   :  { %4776 = vmatprep.subr.bf16.mxu1 %v6689_v47  ;;  %v6771_v47 = vld [vmem:[%s9064_s4 + $0x9e0] ss:$8 sps:$4 sm:$0xff]  }
 0x516   :  { %4777 = vmatpush1.bf16.msra.mxu1 %v6687_v37  ;;  %v6776_v37 = vld [vmem:[%s9064_s4 + $0x9f4] ss:$8 sps:$4 sm:$0xff]  }
 0x517   :  { %4778 = vmatprep.subr.bf16.mxu1 %v6692_v60  ;;  %v6774_v60 = vld [vmem:[%s9064_s4 + $0x9f0] ss:$8 sps:$4 sm:$0xff]  }
 0x51a   :  { %4779 = vmatpush1.bf16.msra.mxu1 %v6690_v49  ;;  %v6779_v49 = vld [vmem:[%s9064_s4 + $0xa04] ss:$8 sps:$4 sm:$0xff]  }
 0x51b   :  { %4780 = vmatprep.subr.bf16.mxu1 %v6695_v58  ;;  %v2045_v58 = vld [vmem:[#allocation2 + $0x90] sm:$0xff] }
 0x51e   :  { %4781 = vmatpush1.bf16.msra.mxu1 %v6693_v13  ;;  %v2048_v13 = vld [vmem:[#allocation2 + $0xa8] sm:$0xff] }
 0x51f   :  { %4782 = vmatprep.subr.bf16.mxu1 %v6698_v61  ;;  %v6777_v61 = vld [vmem:[%s9064_s4 + $0xa00] ss:$8 sps:$4 sm:$0xff]  }
 0x522   :  { %4783 = vmatpush1.bf16.msra.mxu1 %v6696_v2  ;;  %v2070_v2 = vpack.c.bf16 %v2045_v58, %v2045_v58  ;;  %v6842_v58 = vld [vmem:[%s9064_s4 + $0xb54] ss:$8 sps:$4 sm:$0xff]  }
 0x523   :  { %4784 = vmatprep.subr.bf16.mxu1 %v6701_v43  ;;  %v6782_v43 = vld [vmem:[%s9064_s4 + $0xa14] ss:$8 sps:$4 sm:$0xff]  }
 0x526   :  { %4785 = vmatpush1.bf16.msra.mxu1 %v6699_v59  ;;  %v2073_v59 = vpack.c.bf16 %v2048_v13, %v2048_v13  ;;  %v6840_v13 = vld [vmem:[%s9064_s4 + $0xb50] ss:$8 sps:$4 sm:$0xff]  }
 0x527   :  { %4786 = vmatprep.subr.bf16.mxu1 %v6704_v35  ;;  %v6780_v35 = vld [vmem:[%s9064_s4 + $0xa10] ss:$8 sps:$4 sm:$0xff]  }
 0x52a   :  { %4787 = vmatpush1.bf16.msra.mxu1 %v6702_v0  ;;  %v6785_v0 = vld [vmem:[%s9064_s4 + $0xa24] ss:$8 sps:$4 sm:$0xff]  }
 0x52b   :  { %4788 = vmatprep.subr.bf16.mxu1 %v6707_v30  ;;  %v6783_v30 = vld [vmem:[%s9064_s4 + $0xa20] ss:$8 sps:$4 sm:$0xff]  }
 0x52e   :  { %4789 = vmatpush1.bf16.msra.mxu1 %v6705_v25  ;;  %v6788_v25 = vld [vmem:[%s9064_s4 + $0xa34] ss:$8 sps:$4 sm:$0xff]  }
 0x52f   :  { %4790 = vmatprep.subr.bf16.mxu1 %v6710_v5  ;;  %v6786_v5 = vld [vmem:[%s9064_s4 + $0xa30] ss:$8 sps:$4 sm:$0xff]  }
 0x532   :  { %4791 = vmatpush1.bf16.msra.mxu1 %v6708_v29  ;;  %v6791_v29 = vld [vmem:[%s9064_s4 + $0xa44] ss:$8 sps:$4 sm:$0xff]  }
 0x533   :  { %4792 = vmatprep.subr.bf16.mxu1 %v6713_v14  ;;  %v6789_v14 = vld [vmem:[%s9064_s4 + $0xa40] ss:$8 sps:$4 sm:$0xff]  }
 0x536   :  { %4793 = vmatpush1.bf16.msra.mxu1 %v6711_v10  ;;  %v6794_v10 = vld [vmem:[%s9064_s4 + $0xa54] ss:$8 sps:$4 sm:$0xff]  }
 0x537   :  { %4794 = vmatprep.subr.bf16.mxu1 %v6716_v40  ;;  %v6792_v40 = vld [vmem:[%s9064_s4 + $0xa50] ss:$8 sps:$4 sm:$0xff]  }
 0x53a   :  { %4795 = vmatpush1.bf16.msra.mxu1 %v6714_v26  ;;  %v6797_v26 = vld [vmem:[%s9064_s4 + $0xa64] ss:$8 sps:$4 sm:$0xff]  }
 0x53b   :  { %4796 = vmatprep.subr.bf16.mxu1 %v6719_v39  ;;  %v6885_v39 = vld [vmem:[%s9066_s6 + $0x40] sm:$0xff]  }
 0x53c   :  { %5767 = vmatprep.subr.bf16.mxu0 %v6885_v39  ;;  %v6866_v39 = vld [vmem:[%s9064_s4 + $0xbd4] ss:$8 sps:$4 sm:$0xff]  }
 0x53e   :  { %4797 = vmatpush1.bf16.msra.mxu1 %v6717_v52  ;;  %v6886_v52 = vld [vmem:[%s9066_s6] sm:$0xff]  }
 0x53f   :  { %4798 = vmatprep.subr.bf16.mxu1 %v6722_v24  ;;  %v6795_v24 = vld [vmem:[%s9064_s4 + $0xa60] ss:$8 sps:$4 sm:$0xff]   ;;  %5768 = vmatpush3.bf16.msra.mxu0 %v6886_v52  ;;  %v6864_v52 = vld [vmem:[%s9064_s4 + $0xbd0] ss:$8 sps:$4 sm:$0xff]  }
 0x542   :  { %4799 = vmatpush1.bf16.msra.mxu1 %v6720_v53  ;;  %v6887_v53 = vld [vmem:[%s9066_s6 + $0x48] sm:$0xff]  }
 0x543   :  { %4800 = vmatprep.subr.bf16.mxu1 %v6725_v45  ;;  %v6888_v45 = vld [vmem:[%s9066_s6 + $0x8] sm:$0xff]   ;;  %5769 = vmatprep.subr.bf16.mxu0 %v6887_v53 }
 0x544   :  { %5770 = vmatpush3.bf16.msra.mxu0 %v6888_v45  ;;  %v6867_v53 = vld [vmem:[%s9064_s4 + $0xbe0] ss:$8 sps:$4 sm:$0xff]   ;;  %v6872_v45 = vld [vmem:[%s9064_s4 + $0xbf4] ss:$8 sps:$4 sm:$0xff]  }
 0x546   :  { %4801 = vmatpush1.bf16.msra.mxu1 %v6723_v57  ;;  %v6889_v57 = vld [vmem:[%s9066_s6 + $0x50] sm:$0xff]  }
 0x547   :  { %4802 = vmatprep.subr.bf16.mxu1 %v6728_v19  ;;  %v6800_v19 = vld [vmem:[%s9064_s4 + $0xa74] ss:$8 sps:$4 sm:$0xff]   ;;  %5771 = vmatprep.subr.bf16.mxu0 %v6889_v57  ;;  %v6870_v57 = vld [vmem:[%s9064_s4 + $0xbf0] ss:$8 sps:$4 sm:$0xff]  }
 0x54a   :  { %4803 = vmatpush1.bf16.msra.mxu1 %v6726_v8  ;;  %v6798_v8 = vld [vmem:[%s9064_s4 + $0xa70] ss:$8 sps:$4 sm:$0xff]  }
 0x54b   :  { %4813 = vmatprep.subr.bf16.mxu1 %v6731_v22  ;;  %v6890_v22 = vld [vmem:[%s9066_s6 + $0x10] sm:$0xff]  }
 0x54c   :  { %5772 = vmatpush3.bf16.msra.mxu0 %v6890_v22  ;;  %v6873_v22 = vld [vmem:[%s9064_s4 + $0xc00] ss:$8 sps:$4 sm:$0xff]  }
 0x54d   :  { %4805 = vmatmul.mubr.bf16.vlgmr.msra.gmra.mrb[44].mxu1 %v2068_v55  ;;  %v6892_v55 = vld [vmem:[%s9066_s6 + $0x18] sm:$0xff]   ;;  %5773 = vmatprep.subr.bf16.mxu0 %v6891_v9 }
 0x54e   :  { %4814 = vmatpush1.bf16.msra.mxu1 %v6729_v7  ;;  %4845 = vmatprep.mubr.bf16.mxu1 %v2071_v42  ;;  %v6801_v7 = vld [vmem:[%s9064_s4 + $0xa80] ss:$8 sps:$4 sm:$0xff]  }
 0x54f   :  { %4815 = vmatprep.subr.bf16.mxu1 %v6734_v23  ;;  %v6806_v23 = vld [vmem:[%s9064_s4 + $0xa94] ss:$8 sps:$4 sm:$0xff]   ;;  %v6893_v42 = vld [vmem:[%s9066_s6 + $0x60] sm:$0xff]  }
 0x550   :  { %5774 = vmatpush3.bf16.msra.mxu0 %v6892_v55  ;;  %v6881_v55 = vld [vmem:[%s9064_s4 + $0xc24] ss:$8 sps:$4 sm:$0xff]  }
 0x551   :  { %5775 = vmatprep.subr.bf16.mxu0 %v6893_v42  ;;  %v6884_v42 = vld [vmem:[%s9064_s4 + $0xc34] ss:$8 sps:$4 sm:$0xff]  }
 0x552   :  { %4816 = vmatpush1.bf16.msra.mxu1 %v6732_v17  ;;  %v6894_v17 = vld [vmem:[%s9066_s6 + $0x20] sm:$0xff]  }
 0x553   :  { %4817 = vmatprep.subr.bf16.mxu1 %v6737_v3  ;;  %v6804_v3 = vld [vmem:[%s9064_s4 + $0xa90] ss:$8 sps:$4 sm:$0xff]  }
 0x554   :  { %5776 = vmatpush3.bf16.msra.mxu0 %v6894_v17  ;;  %v2051_v17 = vld [vmem:[#allocation2 + $0xc0] sm:$0xff] }
 0x556   :  { %4818 = vmatpush1.bf16.msra.mxu1 %v6735_v62  ;;  %v6895_v62 = vld [vmem:[%s9066_s6 + $0x68] sm:$0xff]  }
 0x557   :  { %4819 = vmatprep.subr.bf16.mxu1 %v6740_v36  ;;  %v6809_v36 = vld [vmem:[%s9064_s4 + $0xaa4] ss:$8 sps:$4 sm:$0xff]   ;;  %5777 = vmatprep.subr.bf16.mxu0 %v6895_v62  ;;  %v6897_v62 = vld [vmem:[%s9066_s6 + $0x70] sm:$0xff]  }
 0x55a   :  { %4820 = vmatpush1.bf16.msra.mxu1 %v6738_v6  ;;  %v6896_v6 = vld [vmem:[%s9066_s6 + $0x28] sm:$0xff]  }
 0x55b   :  { %4821 = vmatprep.subr.bf16.mxu1 %v6743_v4  ;;  %v6807_v4 = vld [vmem:[%s9064_s4 + $0xaa0] ss:$8 sps:$4 sm:$0xff]   ;;  %5778 = vmatpush3.bf16.msra.mxu0 %v6896_v6  ;;  %v6899_v6 = vld [vmem:[%s9066_s6 + $0x78] sm:$0xff]  }
 0x55c   :  { %5779 = vmatprep.subr.bf16.mxu0 %v6897_v62 }
 0x55e   :  { %4822 = vmatpush1.bf16.msra.mxu1 %v6741_v32  ;;  %v6812_v32 = vld [vmem:[%s9064_s4 + $0xab4] ss:$8 sps:$4 sm:$0xff]  }
 0x55f   :  { %4823 = vmatprep.subr.bf16.mxu1 %v6746_v41  ;;  %v6810_v41 = vld [vmem:[%s9064_s4 + $0xab0] ss:$8 sps:$4 sm:$0xff]  }
 0x562   :  { %4824 = vmatpush1.bf16.msra.mxu1 %v6744_v33  ;;  %v6815_v33 = vld [vmem:[%s9064_s4 + $0xac4] ss:$8 sps:$4 sm:$0xff]  }
 0x563   :  { %4825 = vmatprep.subr.bf16.mxu1 %v6749_v63  ;;  %v6813_v63 = vld [vmem:[%s9064_s4 + $0xac0] ss:$8 sps:$4 sm:$0xff]  }
 0x566   :  { %4826 = vmatpush1.bf16.msra.mxu1 %v6747_v21  ;;  %v6818_v21 = vld [vmem:[%s9064_s4 + $0xad4] ss:$8 sps:$4 sm:$0xff]  }
 0x567   :  { %4827 = vmatprep.subr.bf16.mxu1 %v6752_v16  ;;  %v6816_v16 = vld [vmem:[%s9064_s4 + $0xad0] ss:$8 sps:$4 sm:$0xff]  }
 0x56a   :  { %4828 = vmatpush1.bf16.msra.mxu1 %v6750_v38  ;;  %v6821_v38 = vld [vmem:[%s9064_s4 + $0xae4] ss:$8 sps:$4 sm:$0xff]  }
 0x56b   :  { %4829 = vmatprep.subr.bf16.mxu1 %v6755_v51  ;;  %v6819_v51 = vld [vmem:[%s9064_s4 + $0xae0] ss:$8 sps:$4 sm:$0xff]  }
 0x56e   :  { %4830 = vmatpush1.bf16.msra.mxu1 %v6753_v50  ;;  %v6824_v50 = vld [vmem:[%s9064_s4 + $0xaf4] ss:$8 sps:$4 sm:$0xff]  }
 0x56f   :  { %4831 = vmatprep.subr.bf16.mxu1 %v6758_v48  ;;  %v6822_v48 = vld [vmem:[%s9064_s4 + $0xaf0] ss:$8 sps:$4 sm:$0xff]  }
 0x572   :  { %4832 = vmatpush1.bf16.msra.mxu1 %v6756_v44  ;;  %v6827_v44 = vld [vmem:[%s9064_s4 + $0xb04] ss:$8 sps:$4 sm:$0xff]  }
 0x573   :  { %4833 = vmatprep.subr.bf16.mxu1 %v6761_v18  ;;  %v2047_v18 = vld [vmem:[#allocation2 + $0xa0] sm:$0xff] }
 0x576   :  { %4834 = vmatpush1.bf16.msra.mxu1 %v6759_v34  ;;  %v2050_v34 = vld [vmem:[#allocation2 + $0xb8] sm:$0xff] }
 0x577   :  { %4835 = vmatprep.subr.bf16.mxu1 %v6764_v31  ;;  %v6825_v31 = vld [vmem:[%s9064_s4 + $0xb00] ss:$8 sps:$4 sm:$0xff]  }
 0x57a   :  { %4836 = vmatpush1.bf16.msra.mxu1 %v6762_v11  ;;  %v2072_v11 = vpack.c.bf16 %v2047_v18, %v2047_v18 }
 0x57b   :  { %4837 = vmatprep.subr.bf16.mxu1 %v6767_v12  ;;  %v6830_v12 = vld [vmem:[%s9064_s4 + $0xb14] ss:$8 sps:$4 sm:$0xff]  }
 0x57e   :  { %4838 = vmatpush1.bf16.msra.mxu1 %v6765_v46  ;;  %v2075_v46 = vpack.c.bf16 %v2050_v34, %v2050_v34 }
 0x57f   :  { %4839 = vmatprep.subr.bf16.mxu1 %v6770_v54  ;;  %v6828_v54 = vld [vmem:[%s9064_s4 + $0xb10] ss:$8 sps:$4 sm:$0xff]  }
 0x582   :  { %4840 = vmatpush1.bf16.msra.mxu1 %v6768_v15  ;;  %v6833_v15 = vld [vmem:[%s9064_s4 + $0xb24] ss:$8 sps:$4 sm:$0xff]  }
 0x583   :  { %4841 = vmatprep.subr.bf16.mxu1 %v6773_v28  ;;  %v6831_v28 = vld [vmem:[%s9064_s4 + $0xb20] ss:$8 sps:$4 sm:$0xff]  }
 0x586   :  { %4842 = vmatpush1.bf16.msra.mxu1 %v6771_v47  ;;  %v6836_v47 = vld [vmem:[%s9064_s4 + $0xb34] ss:$8 sps:$4 sm:$0xff]  }
 0x587   :  { %4843 = vmatprep.subr.bf16.mxu1 %v6776_v37  ;;  %v6834_v37 = vld [vmem:[%s9064_s4 + $0xb30] ss:$8 sps:$4 sm:$0xff]  }
 0x58a   :  { %4844 = vmatpush1.bf16.msra.mxu1 %v6774_v60  ;;  %v6839_v60 = vld [vmem:[%s9064_s4 + $0xb44] ss:$8 sps:$4 sm:$0xff]  }
 0x58b   :  { %4854 = vmatprep.subr.bf16.mxu1 %v6779_v49  ;;  %v6837_v49 = vld [vmem:[%s9064_s4 + $0xb40] ss:$8 sps:$4 sm:$0xff]  }
 0x58d   :  { %4846 = vmatmul.mubr.bf16.vlgmr.msra.gmra.mrb[44].mxu1 %v2070_v2  ;;  %v6843_v2 = vld [vmem:[%s9064_s4 + $0xb60] ss:$8 sps:$4 sm:$0xff]  }
 0x58e   :  { %4855 = vmatpush1.bf16.msra.mxu1 %v6777_v61  ;;  %4886 = vmatprep.mubr.bf16.mxu1 %v2073_v59  ;;  %v6845_v61 = vld [vmem:[%s9064_s4 + $0xb64] ss:$8 sps:$4 sm:$0xff]   ;;  %v6846_v59 = vld [vmem:[%s9064_s4 + $0xb70] ss:$8 sps:$4 sm:$0xff]  }
 0x58f   :  { %4856 = vmatprep.subr.bf16.mxu1 %v6782_v43  ;;  %v6848_v43 = vld [vmem:[%s9064_s4 + $0xb74] ss:$8 sps:$4 sm:$0xff]  }
 0x592   :  { %4857 = vmatpush1.bf16.msra.mxu1 %v6780_v35  ;;  %v6851_v35 = vld [vmem:[%s9064_s4 + $0xb84] ss:$8 sps:$4 sm:$0xff]  }
 0x593   :  { %4858 = vmatprep.subr.bf16.mxu1 %v6785_v0  ;;  %v6849_v0 = vld [vmem:[%s9064_s4 + $0xb80] ss:$8 sps:$4 sm:$0xff]  }
 0x596   :  { %4859 = vmatpush1.bf16.msra.mxu1 %v6783_v30  ;;  %v6854_v30 = vld [vmem:[%s9064_s4 + $0xb94] ss:$8 sps:$4 sm:$0xff]  }
 0x597   :  { %4860 = vmatprep.subr.bf16.mxu1 %v6788_v25  ;;  %v6852_v25 = vld [vmem:[%s9064_s4 + $0xb90] ss:$8 sps:$4 sm:$0xff]  }
 0x59a   :  { %4861 = vmatpush1.bf16.msra.mxu1 %v6786_v5  ;;  %v6857_v5 = vld [vmem:[%s9064_s4 + $0xba4] ss:$8 sps:$4 sm:$0xff]  }
 0x59b   :  { %4862 = vmatprep.subr.bf16.mxu1 %v6791_v29  ;;  %v6855_v29 = vld [vmem:[%s9064_s4 + $0xba0] ss:$8 sps:$4 sm:$0xff]  }
 0x59e   :  { %4863 = vmatpush1.bf16.msra.mxu1 %v6789_v14  ;;  %v6860_v14 = vld [vmem:[%s9064_s4 + $0xbb4] ss:$8 sps:$4 sm:$0xff]  }
 0x59f   :  { %4864 = vmatprep.subr.bf16.mxu1 %v6794_v10  ;;  %v6858_v10 = vld [vmem:[%s9064_s4 + $0xbb0] ss:$8 sps:$4 sm:$0xff]  }
 0x5a2   :  { %4865 = vmatpush1.bf16.msra.mxu1 %v6792_v40  ;;  %v6863_v40 = vld [vmem:[%s9064_s4 + $0xbc4] ss:$8 sps:$4 sm:$0xff]  }
 0x5a3   :  { %4866 = vmatprep.subr.bf16.mxu1 %v6797_v26  ;;  %v6861_v26 = vld [vmem:[%s9064_s4 + $0xbc0] ss:$8 sps:$4 sm:$0xff]  }
 0x5a6   :  { %4867 = vmatpush1.bf16.msra.mxu1 %v6795_v24  ;;  %v6869_v24 = vld [vmem:[%s9064_s4 + $0xbe4] ss:$8 sps:$4 sm:$0xff]  }
 0x5a7   :  { %4868 = vmatprep.subr.bf16.mxu1 %v6800_v19  ;;  %v6875_v19 = vld [vmem:[%s9064_s4 + $0xc04] ss:$8 sps:$4 sm:$0xff]  }
 0x5aa   :  { %4869 = vmatpush1.bf16.msra.mxu1 %v6798_v8  ;;  %v2049_v8 = vld [vmem:[#allocation2 + $0xb0] sm:$0xff] }
 0x5ab   :  { %4870 = vmatprep.subr.bf16.mxu1 %v6803_v56  ;;  %v2074_v9 = vpack.c.bf16 %v2049_v8, %v2049_v8  ;;  %v6878_v56 = vld [vmem:[%s9064_s4 + $0xc14] ss:$8 sps:$4 sm:$0xff]  }
 0x5ae   :  { %4871 = vmatpush1.bf16.msra.mxu1 %v6801_v7  ;;  %v6876_v7 = vld [vmem:[%s9064_s4 + $0xc10] ss:$8 sps:$4 sm:$0xff]  }
 0x5af   :  { %4872 = vmatprep.subr.bf16.mxu1 %v6806_v23  ;;  %v6879_v23 = vld [vmem:[%s9064_s4 + $0xc20] ss:$8 sps:$4 sm:$0xff]  }
 0x5b2   :  { %4873 = vmatpush1.bf16.msra.mxu1 %v6804_v3  ;;  %v2076_v3 = vpack.c.bf16 %v2051_v17, %v2051_v17 }
 0x5b3   :  { %4874 = vmatprep.subr.bf16.mxu1 %v6809_v36  ;;  %v6898_v36 = vld [vmem:[%s9066_s6 + $0x30] sm:$0xff]  }
 0x5b4   :  { %5780 = vmatpush3.bf16.msra.mxu0 %v6898_v36 }
 0x5b5   :  { %5781 = vmatprep.subr.bf16.mxu0 %v6899_v6 }
 0x5b6   :  { %4875 = vmatpush1.bf16.msra.mxu1 %v6807_v4  ;;  %v6900_v4 = vld [vmem:[%s9066_s6 + $0x38] sm:$0xff]  }
 0x5b7   :  { %4876 = vmatprep.subr.bf16.mxu1 %v6812_v32  ;;  %v2471_v32 = vlaneseq }
 0x5b8   :  { %5782 = vmatpush3.bf16.msra.mxu0 %v6900_v4 }
 0x5ba   :  { %4877 = vmatpush1.bf16.msra.mxu1 %v6810_v41  ;;  %v2472_v41 = vshrl.u32 %v2471_v32, 7 }
 0x5bb   :  { %4878 = vmatprep.subr.bf16.mxu1 %v6815_v33 }
 0x5bc   :  { %v2473_v33 = vsub.s32 0, %v2472_v41 }
 0x5be   :  { %4879 = vmatpush1.bf16.msra.mxu1 %v6813_v63  ;;  %v2469_v63 = vld [vmem:[%s9067_s5] sm:$0x3] }
 0x5bf   :  { %4880 = vmatprep.subr.bf16.mxu1 %v6818_v21  ;;  %v2477_v21 = vsub.s32 1, %v2472_v41 }
 0x5c2   :  { %4881 = vmatpush1.bf16.msra.mxu1 %v6816_v16  ;;  %v2474_v16 = vrot.slane %v2469_v63, %v2473_v33 }
 0x5c3   :  { %4882 = vmatprep.subr.bf16.mxu1 %v6821_v38  ;;  %v2478_v38 = vrot.slane %v2469_v63, %v2477_v21 }
 0x5c6   :  { %4883 = vmatpush1.bf16.msra.mxu1 %v6819_v51  ;;  %v4479_v51 = vadd.f32 %v8579_v27, %v2474_v16 }
 0x5c7   :  { %4884 = vmatprep.subr.bf16.mxu1 %v6824_v50  ;;  %v4481_v50 = vadd.f32 %v8581_v20, %v2478_v38 }
 0x5ca   :  { %4885 = vmatpush1.bf16.msra.mxu1 %v6822_v48 }
 0x5cb   :  { %4895 = vmatprep.subr.bf16.mxu1 %v6827_v44 }
 0x5cd   :  { %4887 = vmatmul.mubr.bf16.vlgmr.msra.gmra.mrb[44].mxu1 %v2072_v11 }
 0x5ce   :  { %4896 = vmatpush1.bf16.msra.mxu1 %v6825_v31  ;;  %4927 = vmatprep.mubr.bf16.mxu1 %v2075_v46 }
 0x5cf   :  { %4897 = vmatprep.subr.bf16.mxu1 %v6830_v12 }
 0x5d2   :  { %4898 = vmatpush1.bf16.msra.mxu1 %v6828_v54 }
 0x5d3   :  { %4899 = vmatprep.subr.bf16.mxu1 %v6833_v15 }
 0x5d6   :  { %4900 = vmatpush1.bf16.msra.mxu1 %v6831_v28 }
 0x5d7   :  { %4901 = vmatprep.subr.bf16.mxu1 %v6836_v47  ;;  %v5692_v47 = vld [vmem:[%s9068_s7] ss:$0 sm:$0xff] }
 0x5da   :  { %4902 = vmatpush1.bf16.msra.mxu1 %v6834_v37 }
 0x5db   :  { %4903 = vmatprep.subr.bf16.mxu1 %v6839_v60 }
 0x5de   :  { %4904 = vmatpush1.bf16.msra.mxu1 %v6837_v49 }
 0x5df   :  { %4905 = vmatprep.subr.bf16.mxu1 %v6842_v58 }
 0x5e2   :  { %4906 = vmatpush1.bf16.msra.mxu1 %v6840_v13 }
 0x5e3   :  { %4907 = vmatprep.subr.bf16.mxu1 %v6845_v61 }
 0x5e6   :  { %4908 = vmatpush1.bf16.msra.mxu1 %v6843_v2 }
 0x5e7   :  { %4909 = vmatprep.subr.bf16.mxu1 %v6848_v43 }
 0x5ea   :  { %4910 = vmatpush1.bf16.msra.mxu1 %v6846_v59 }
 0x5eb   :  { %4911 = vmatprep.subr.bf16.mxu1 %v6851_v35 }
 0x5ee   :  { %4912 = vmatpush1.bf16.msra.mxu1 %v6849_v0 }
 0x5ef   :  { %4913 = vmatprep.subr.bf16.mxu1 %v6854_v30 }
 0x5f2   :  { %4914 = vmatpush1.bf16.msra.mxu1 %v6852_v25 }
 0x5f3   :  { %4915 = vmatprep.subr.bf16.mxu1 %v6857_v5 }
 0x5f6   :  { %4916 = vmatpush1.bf16.msra.mxu1 %v6855_v29 }
 0x5f7   :  { %4917 = vmatprep.subr.bf16.mxu1 %v6860_v14 }
 0x5fa   :  { %4918 = vmatpush1.bf16.msra.mxu1 %v6858_v10 }
 0x5fb   :  { %4919 = vmatprep.subr.bf16.mxu1 %v6863_v40 }
 0x5fe   :  { %4920 = vmatpush1.bf16.msra.mxu1 %v6861_v26 }
 0x5ff   :  { %4921 = vmatprep.subr.bf16.mxu1 %v6866_v39 }
 0x602   :  { %4922 = vmatpush1.bf16.msra.mxu1 %v6864_v52 }
 0x603   :  { %4923 = vmatprep.subr.bf16.mxu1 %v6869_v24 }
 0x606   :  { %4924 = vmatpush1.bf16.msra.mxu1 %v6867_v53 }
 0x607   :  { %4925 = vmatprep.subr.bf16.mxu1 %v6872_v45 }
 0x60a   :  { %4926 = vmatpush1.bf16.msra.mxu1 %v6870_v57 }
 0x60b   :  { %4936 = vmatprep.subr.bf16.mxu1 %v6875_v19 }
 0x60d   :  { %4928 = vmatmul.mubr.bf16.vlgmr.msra.gmra.mrb[44].mxu1 %v2074_v9 }
 0x60e   :  { %4937 = vmatpush1.bf16.msra.mxu1 %v6873_v22  ;;  %4968 = vmatprep.mubr.bf16.mxu1 %v6902_v1  ;;  %v6882_v1 = vld [vmem:[%s9064_s4 + $0xc30] ss:$8 sps:$4 sm:$0xff]  }
 0x60f   :  { %4938 = vmatprep.subr.bf16.mxu1 %v6878_v56 }
 0x612   :  { %4939 = vmatpush1.bf16.msra.mxu1 %v6876_v7 }
 0x613   :  { %4940 = vmatprep.subr.bf16.mxu1 %v6881_v55 }
 0x616   :  { %4941 = vmatpush1.bf16.msra.mxu1 %v6879_v23 }
 0x617   :  { %4942 = vmatprep.subr.bf16.mxu1 %v6884_v42 }
 0x61a   :  { %4943 = vmatpush1.bf16.msra.mxu1 %v6882_v1 }
 0x61d   :  { %5691 = vmatmul.mubr.msk.bf16.vlgmr.msra.gmra.mrb[44].mxu1 %vm1880_vm4, %v2076_v3 }
 0x6f0   :  { %v4970_v48 = vpop.f32.mrb[44].mxu1 }
 0x6f1   :  { %v6079_v44 = vadd.f32 %v4970_v48, %v4479_v51  ;;  %v4972_v18 = vpop.f32.mrb[45].mxu1 }
 0x6f2   :  { %v6081_v34 = vadd.f32 %v4972_v18, %v4481_v50  ;;  %v4974_v31 = vpop.f32.mrb[46].mxu1 }
 0x6f3   :  { %v4977_v11 = vmax.f32 %v6079_v44, 0.0  ;;  %v4975_v12 = vpop.f32.mrb[47].mxu1 }
 0x6f4   :  { %v4978_v46 = vmax.f32 %v6081_v34, 0.0 }
 0x6f5   :  { %v4979_v15 = vpack.c.bf16 %v4977_v11, %v4977_v11 }
 0x6f6   :  { %v4980_v54 = vpack.c.bf16 %v4978_v46, %v4978_v46 }
 0x6f8   :  { %5148 = vmatprep.mubr.bf16.mxu0 %v4980_v54 }
 0x6f9   :  { %5149 = vmatmul.mubr.bf16.vlgmr.msra.gmra.mrb[4].mxu0 %v4979_v15 }
 0x7cc   :  { %v5783_v28 = vpop.f32.mrb[4].mxu0 }
 0x7cd   :  { %v5784_v27 = vpop.f32.mrb[5].mxu0 }
 0x7ce   :  { %v5785_v37 = vadd.f32 %v5784_v27, %v5783_v28  ;;  %v5786_v20 = vpop.f32.mrb[6].mxu0 }
 0x7cf   :  { %v5787_v60 = vpop.f32.mrb[7].mxu0 }
 0x7d0   :  { %v5151_v49 = vadd.f32 %v5785_v37, %v5692_v47 }
 0x7d2   :  { %5156 = vst [vmem:[%s9069_s8] sm:$0xff] %v5151_v49 }

</bundles_post_ra>
